<compile_context>
chip_gen: v7x
topology: tpu7x:2x2x1
jax: 0.10.0
libtpu: 0.0.40
codegen_flags: <defaults>
</compile_context>

<pallas_src>
import jax
import jax.numpy as jnp
from jax.experimental import pallas as pl
from jax.experimental.pallas import tpu as pltpu

_VMEM_LIMIT = 32 * 1024 * 1024  # safe on every generation (v7x: 64 MiB/TC physical)


def _tensorcores_per_chip():
    """2 on v7x, 1 on v5e/v6e.  Trace-time host query; defaults to 1."""
    try:
        kind = jax.devices()[0].device_kind.lower()
    except Exception:
        return 1
    return 2 if ("v7" in kind or "7x" in kind) else 1


# ----------------------------------------------------------------------------
# Pallas kernel 1: fused  x @ w + b  with ReLU   (used for the three convs)
# ----------------------------------------------------------------------------
def _mm_bias_relu_kernel(x_ref, w_ref, b_ref, o_ref):
    y = jnp.dot(x_ref[...], w_ref[...], preferred_element_type=jnp.float32)
    o_ref[...] = jnp.maximum(y + b_ref[...], 0.0)


def matmul_bias_relu(x, w, b2, *, bm=None):
    """x: (M, K) f32, w: (K, N) f32, b2: (1, N) f32 -> relu(x @ w + b), (M, N) f32.

    If `bm` evenly tiles M, the M dimension becomes a "parallel" grid axis
    (used only on 2-TC chips); weight/bias block indices are grid-invariant
    so they are DMA'd once and stay resident in VMEM.
    """
    M, K = x.shape
    K2, N = w.shape
    assert K == K2, (K, K2)
    if bm is None or M % bm != 0:
        bm = M
    grid = (M // bm,)
    flops = 2 * M * K * N + 2 * M * N
    bytes_accessed = int((x.size + w.size + b2.size + M * N) * 4)
    return pl.pallas_call(
        _mm_bias_relu_kernel,
        out_shape=jax.ShapeDtypeStruct((M, N), jnp.float32),
        grid=grid,
        in_specs=[
            pl.BlockSpec((bm, K), lambda i: (i, 0)),
            pl.BlockSpec((K, N), lambda i: (0, 0)),   # resident across grid
            pl.BlockSpec((1, N), lambda i: (0, 0)),   # resident across grid
        ],
        out_specs=pl.BlockSpec((bm, N), lambda i: (i, 0)),
        compiler_params=pltpu.CompilerParams(
            dimension_semantics=("parallel",),
            vmem_limit_bytes=_VMEM_LIMIT),
        cost_estimate=pl.CostEstimate(
            flops=flops, transcendentals=0, bytes_accessed=bytes_accessed),
    )(x, w, b2)


# ----------------------------------------------------------------------------
# Pallas kernel 2: fused head  —  relu(feat @ w4 + b4) @ wq + bq
#   * w4 AND wq are bf16 (weight-load-bound); MXU bf16 x bf16, f32 accumulate.
#   * the (B, 512) hidden lives only in registers/VMEM, never in HBM.
#   * wq/bq are zero-padded to 128 lanes for lane-dense stores.
# ----------------------------------------------------------------------------
def _head_kernel(feat_ref, w4_ref, b4_ref, wq_ref, bq_ref, o_ref):
    f = feat_ref[...].astype(jnp.bfloat16)
    h = jnp.dot(f, w4_ref[...], preferred_element_type=jnp.float32)
    h = jnp.maximum(h + b4_ref[...], 0.0)
    q = jnp.dot(h.astype(jnp.bfloat16), wq_ref[...],
                preferred_element_type=jnp.float32)
    o_ref[...] = q + bq_ref[...]


def head(feat, w4_bf16, b4, wq_bf16, bq_pad):
    """feat: (B, 2560) f32 -> (B, 128) f32 padded Q-values."""
    B, K = feat.shape
    K2, H = w4_bf16.shape
    H2, Np = wq_bf16.shape
    assert K == K2 and H == H2, (K, K2, H, H2)
    flops = 2 * B * K * H + 2 * B * H * Np + 3 * B * H + 2 * B * Np
    bytes_accessed = int(feat.size * 4 + w4_bf16.size * 2 + b4.size * 4
                         + wq_bf16.size * 2 + bq_pad.size * 4 + B * Np * 4)
    return pl.pallas_call(
        _head_kernel,
        out_shape=jax.ShapeDtypeStruct((B, Np), jnp.float32),
        grid=(1,),
        in_specs=[
            pl.BlockSpec((B, K), lambda i: (0, 0)),
            pl.BlockSpec((K, H), lambda i: (0, 0)),
            pl.BlockSpec((1, H), lambda i: (0, 0)),
            pl.BlockSpec((H, Np), lambda i: (0, 0)),
            pl.BlockSpec((1, Np), lambda i: (0, 0)),
        ],
        out_specs=pl.BlockSpec((B, Np), lambda i: (0, 0)),
        compiler_params=pltpu.CompilerParams(
            dimension_semantics=("arbitrary",),
            vmem_limit_bytes=_VMEM_LIMIT),
        cost_estimate=pl.CostEstimate(
            flops=flops, transcendentals=0, bytes_accessed=bytes_accessed),
    )(feat, w4_bf16, b4, wq_bf16, bq_pad)


# ----------------------------------------------------------------------------
# Glue: patch extraction as ONE XLA op per layer.
# Patch feature order is channel-major: index = c*(kh*kw) + i*kw + j,
# matching the (Cin, KH, KW)-flattened conv weights.
# ----------------------------------------------------------------------------
def _patches(x_nhwc, kh, kw, stride):
    B, H, W, C = x_nhwc.shape
    oh = (H - kh) // stride + 1
    ow = (W - kw) // stride + 1
    p = jax.lax.conv_general_dilated_patches(
        x_nhwc, (kh, kw), (stride, stride), "VALID",
        dimension_numbers=("NHWC", "HWIO", "NHWC"))   # (B, oh, ow, C*kh*kw)
    return p.reshape(B * oh * ow, C * kh * kw), oh, ow


# ----------------------------------------------------------------------------
# Parameters (deterministic synthetic init — shapes from the module __init__)
# ----------------------------------------------------------------------------
def init_params(num_actions, key):
    ks = jax.random.split(key, 5)

    def conv_w(k, kh, kw, cin, cout):
        # Rows in (Cin, KH, KW) order to match conv_general_dilated_patches.
        # Real PyTorch Conv2d weights are OIHW; convert with
        #   w_oihw.transpose(1, 2, 3, 0).reshape(cin*kh*kw, cout).
        fan_in = kh * kw * cin
        w = (jax.random.normal(k, (cin, kh, kw, cout), jnp.float32)
             * jnp.sqrt(2.0 / fan_in))
        return w.reshape(cin * kh * kw, cout)

    def lin_w(k, fin, fout, gain):
        return (jax.random.normal(k, (fin, fout), jnp.float32)
                * jnp.sqrt(gain / fin))

    # /255 input scaling folded into the tiny conv1 weight once at init:
    # (x/255) @ W == x @ (W/255).  (For real torch weights, scale them too.)
    w1 = conv_w(ks[0], 8, 8, 3, 32) * (1.0 / 255.0)

    # w4's 2560 input rows are stored in (H, W, C) order so the NHWC conv3
    # output flattens directly.  Real PyTorch fc weight (512, 2560) expects
    # (C, H, W) flatten order; permute once:
    #   w4 = w_torch.T.reshape(64, 5, 8, 512).transpose(1, 2, 0, 3).reshape(2560, 512)
    # Kept in bf16 (weight-load-bound layer; f32 accumulation in-kernel).
    w4 = lin_w(ks[3], 2560, 512, 2.0).astype(jnp.bfloat16)

    # q-head weight/bias zero-padded to 128 output lanes (lane-dense stores),
    # stored in bf16; padded columns are exact zeros, sliced off in glue.
    wq = lin_w(ks[4], 512, num_actions, 1.0)
    wq_pad = (jnp.zeros((512, 128), jnp.float32)
              .at[:, :num_actions].set(wq).astype(jnp.bfloat16))

    return {
        "w1": w1,                           "b1": jnp.zeros((1, 32), jnp.float32),
        "w2": conv_w(ks[1], 4, 4, 32, 64),  "b2": jnp.zeros((1, 64), jnp.float32),
        "w3": conv_w(ks[2], 3, 3, 64, 64),  "b3": jnp.zeros((1, 64), jnp.float32),
        "w4": w4,                           "b4": jnp.zeros((1, 512), jnp.float32),
        "wq": wq_pad,                       "bq": jnp.zeros((1, 128), jnp.float32),
    }


# ----------------------------------------------------------------------------
# Forward pass
# ----------------------------------------------------------------------------
def soft_q_forward(params, x_nchw, *, num_actions):
    """x_nchw: (B, 3, 68, 92) float32 in [0, 255]. Returns (B, num_actions)."""
    B = x_nchw.shape[0]
    x = jnp.transpose(x_nchw, (0, 2, 3, 1))            # NCHW -> NHWC (glue)

    # Only split M across the grid when a second TensorCore exists (v7x).
    two_tc = _tensorcores_per_chip() >= 2

    # conv1: 3->32, k=8, s=4, ReLU   (w1 already carries the /255 scaling)
    p, oh, ow = _patches(x, 8, 8, 4)                    # (704, 192)
    y = matmul_bias_relu(p, params["w1"], params["b1"], bm=352 if two_tc else None)
    x = y.reshape(B, oh, ow, 32)

    # conv2: 32->64, k=4, s=2, ReLU
    p, oh, ow = _patches(x, 4, 4, 2)                    # (140, 512)
    y = matmul_bias_relu(p, params["w2"], params["b2"])
    x = y.reshape(B, oh, ow, 64)

    # conv3: 64->64, k=3, s=1, ReLU
    p, oh, ow = _patches(x, 3, 3, 1)                    # (80, 576)
    y = matmul_bias_relu(p, params["w3"], params["b3"], bm=40 if two_tc else None)

    # Flatten NHWC directly — w4 rows are stored in (H, W, C) order, so no
    # relayout is needed to match torch.nn.Flatten semantics (given the
    # documented one-time weight permute).
    feat = y.reshape(B, oh * ow * 64)                   # (B, 2560)

    # Fused fc(2560->512, ReLU) + q_value(512->A) kernel; hidden stays in VMEM.
    q_pad = head(feat, params["w4"], params["b4"], params["wq"], params["bq"])
    return q_pad[:, :num_actions]


# ----------------------------------------------------------------------------
if __name__ == "__main__":
    num_actions = 6
    key = jax.random.PRNGKey(0)
    k_in, k_par = jax.random.split(key)

    # Deterministic "image" input in [0, 255], NCHW like the PyTorch module.
    # 68 x 92 -> conv stack -> 64 x 5 x 8 = 2560 features (matches Linear(2560, 512)).
    x = jax.random.uniform(k_in, (2, 3, 68, 92), jnp.float32, 0.0, 255.0)

    params = init_params(num_actions, k_par)

    fwd = jax.jit(soft_q_forward, static_argnames="num_actions")
    q = fwd(params, x, num_actions=num_actions)
    jax.block_until_ready(q)

    assert q.shape == (2, num_actions), q.shape
    assert q.dtype == jnp.float32
    print("KERNEL_OK")
</pallas_src>

<mosaic_0001>
module attributes {stable_mosaic.version = 11 : i64} {
  func.func @_mm_bias_relu_kernel(%arg0: i32, %arg1: memref<704x192xf32, #tpu.memory_space<vmem>>, %arg2: memref<192x32xf32, #tpu.memory_space<vmem>>, %arg3: memref<1x32xf32, #tpu.memory_space<vmem>>, %arg4: memref<704x32xf32, #tpu.memory_space<vmem>>) attributes {dimension_semantics = [#tpu.dimension_semantics<parallel>], iteration_bounds = array<i64: 1>, scalar_prefetch = 0 : i64, scratch_operands = 0 : i64, tpu.core_type = #tpu.core_type<tc>, window_params = [{transform_indices = @transform_0, window_bounds = array<i64: 704, 192>}, {pipeline_mode = #tpu.pipeline_mode<synchronous>, transform_indices = @transform_1, window_bounds = array<i64: 192, 32>}, {pipeline_mode = #tpu.pipeline_mode<synchronous>, transform_indices = @transform_2, window_bounds = array<i64: 1, 32>}, {transform_indices = @transform_3, window_bounds = array<i64: 704, 32>}]} {
    %c0 = arith.constant 0 : index
    %c0_0 = arith.constant 0 : index
    %0 = vector.load %arg1[%c0, %c0_0] : memref<704x192xf32, #tpu.memory_space<vmem>>, vector<704x192xf32>
    %c0_1 = arith.constant 0 : index
    %c0_2 = arith.constant 0 : index
    %1 = vector.load %arg2[%c0_1, %c0_2] : memref<192x32xf32, #tpu.memory_space<vmem>>, vector<192x32xf32>
    %cst = arith.constant dense<0.000000e+00> : vector<704x32xf32>
    %2 = tpu.matmul %0, %1, %cst {dimension_numbers = #tpu.dot_dimension_numbers<[1], [0], [0], [1], [0, 0, 1, 1], [], []>} : vector<704x192xf32>, vector<192x32xf32>, vector<704x32xf32> -> vector<704x32xf32>
    %c0_3 = arith.constant 0 : index
    %c0_4 = arith.constant 0 : index
    %3 = vector.load %arg3[%c0_3, %c0_4] : memref<1x32xf32, #tpu.memory_space<vmem>>, vector<1x32xf32>
    %4 = vector.broadcast %3 : vector<1x32xf32> to vector<704x32xf32>
    %5 = arith.addf %2, %4 : vector<704x32xf32>
    %cst_5 = arith.constant 0.000000e+00 : f32
    %6 = vector.broadcast %cst_5 : f32 to vector<704x32xf32>
    %7 = arith.maximumf %5, %6 : vector<704x32xf32>
    %c0_6 = arith.constant 0 : index
    %c0_7 = arith.constant 0 : index
    %8 = vector.load %arg4[%c0_6, %c0_7] : memref<704x32xf32, #tpu.memory_space<vmem>>, vector<704x32xf32>
    tpu.vector_store %arg4[%c0_6, %c0_7], %7 {strides = array<i32>} : memref<704x32xf32, #tpu.memory_space<vmem>>, vector<704x32xf32>,
    return
  }
  func.func @transform_0(%arg0: i32) -> (i32, i32) {
    %c0_i32 = arith.constant 0 : i32
    %c0_i32_0 = arith.constant 0 : i32
    return %arg0, %c0_i32 : i32, i32
  }
  func.func @transform_1(%arg0: i32) -> (i32, i32) {
    %c0_i32 = arith.constant 0 : i32
    %c0_i32_0 = arith.constant 0 : i32
    %c0_i32_1 = arith.constant 0 : i32
    return %c0_i32, %c0_i32_0 : i32, i32
  }
  func.func @transform_2(%arg0: i32) -> (i32, i32) {
    %c0_i32 = arith.constant 0 : i32
    %c0_i32_0 = arith.constant 0 : i32
    %c0_i32_1 = arith.constant 0 : i32
    return %c0_i32, %c0_i32_0 : i32, i32
  }
  func.func @transform_3(%arg0: i32) -> (i32, i32) {
    %c0_i32 = arith.constant 0 : i32
    %c0_i32_0 = arith.constant 0 : i32
    return %arg0, %c0_i32 : i32, i32
  }
}

module attributes {stable_mosaic.version = 11 : i64} {
  func.func @_mm_bias_relu_kernel(%arg0: i32, %arg1: memref<140x512xf32, #tpu.memory_space<vmem>>, %arg2: memref<512x64xf32, #tpu.memory_space<vmem>>, %arg3: memref<1x64xf32, #tpu.memory_space<vmem>>, %arg4: memref<140x64xf32, #tpu.memory_space<vmem>>) attributes {dimension_semantics = [#tpu.dimension_semantics<parallel>], iteration_bounds = array<i64: 1>, scalar_prefetch = 0 : i64, scratch_operands = 0 : i64, tpu.core_type = #tpu.core_type<tc>, window_params = [{transform_indices = @transform_0, window_bounds = array<i64: 140, 512>}, {pipeline_mode = #tpu.pipeline_mode<synchronous>, transform_indices = @transform_1, window_bounds = array<i64: 512, 64>}, {pipeline_mode = #tpu.pipeline_mode<synchronous>, transform_indices = @transform_2, window_bounds = array<i64: 1, 64>}, {transform_indices = @transform_3, window_bounds = array<i64: 140, 64>}]} {
    %c0 = arith.constant 0 : index
    %c0_0 = arith.constant 0 : index
    %0 = vector.load %arg1[%c0, %c0_0] : memref<140x512xf32, #tpu.memory_space<vmem>>, vector<140x512xf32>
    %c0_1 = arith.constant 0 : index
    %c0_2 = arith.constant 0 : index
    %1 = vector.load %arg2[%c0_1, %c0_2] : memref<512x64xf32, #tpu.memory_space<vmem>>, vector<512x64xf32>
    %cst = arith.constant dense<0.000000e+00> : vector<140x64xf32>
    %2 = tpu.matmul %0, %1, %cst {dimension_numbers = #tpu.dot_dimension_numbers<[1], [0], [0], [1], [0, 0, 1, 1], [], []>} : vector<140x512xf32>, vector<512x64xf32>, vector<140x64xf32> -> vector<140x64xf32>
    %c0_3 = arith.constant 0 : index
    %c0_4 = arith.constant 0 : index
    %3 = vector.load %arg3[%c0_3, %c0_4] : memref<1x64xf32, #tpu.memory_space<vmem>>, vector<1x64xf32>
    %4 = vector.broadcast %3 : vector<1x64xf32> to vector<140x64xf32>
    %5 = arith.addf %2, %4 : vector<140x64xf32>
    %cst_5 = arith.constant 0.000000e+00 : f32
    %6 = vector.broadcast %cst_5 : f32 to vector<140x64xf32>
    %7 = arith.maximumf %5, %6 : vector<140x64xf32>
    %c0_6 = arith.constant 0 : index
    %c0_7 = arith.constant 0 : index
    %8 = vector.load %arg4[%c0_6, %c0_7] : memref<140x64xf32, #tpu.memory_space<vmem>>, vector<140x64xf32>
    tpu.vector_store %arg4[%c0_6, %c0_7], %7 {strides = array<i32>} : memref<140x64xf32, #tpu.memory_space<vmem>>, vector<140x64xf32>,
    return
  }
  func.func @transform_0(%arg0: i32) -> (i32, i32) {
    %c0_i32 = arith.constant 0 : i32
    %c0_i32_0 = arith.constant 0 : i32
    return %arg0, %c0_i32 : i32, i32
  }
  func.func @transform_1(%arg0: i32) -> (i32, i32) {
    %c0_i32 = arith.constant 0 : i32
    %c0_i32_0 = arith.constant 0 : i32
    %c0_i32_1 = arith.constant 0 : i32
    return %c0_i32, %c0_i32_0 : i32, i32
  }
  func.func @transform_2(%arg0: i32) -> (i32, i32) {
    %c0_i32 = arith.constant 0 : i32
    %c0_i32_0 = arith.constant 0 : i32
    %c0_i32_1 = arith.constant 0 : i32
    return %c0_i32, %c0_i32_0 : i32, i32
  }
  func.func @transform_3(%arg0: i32) -> (i32, i32) {
    %c0_i32 = arith.constant 0 : i32
    %c0_i32_0 = arith.constant 0 : i32
    return %arg0, %c0_i32 : i32, i32
  }
}

module attributes {stable_mosaic.version = 11 : i64} {
  func.func @_mm_bias_relu_kernel(%arg0: i32, %arg1: memref<80x576xf32, #tpu.memory_space<vmem>>, %arg2: memref<576x64xf32, #tpu.memory_space<vmem>>, %arg3: memref<1x64xf32, #tpu.memory_space<vmem>>, %arg4: memref<80x64xf32, #tpu.memory_space<vmem>>) attributes {dimension_semantics = [#tpu.dimension_semantics<parallel>], iteration_bounds = array<i64: 1>, scalar_prefetch = 0 : i64, scratch_operands = 0 : i64, tpu.core_type = #tpu.core_type<tc>, window_params = [{transform_indices = @transform_0, window_bounds = array<i64: 80, 576>}, {pipeline_mode = #tpu.pipeline_mode<synchronous>, transform_indices = @transform_1, window_bounds = array<i64: 576, 64>}, {pipeline_mode = #tpu.pipeline_mode<synchronous>, transform_indices = @transform_2, window_bounds = array<i64: 1, 64>}, {transform_indices = @transform_3, window_bounds = array<i64: 80, 64>}]} {
    %c0 = arith.constant 0 : index
    %c0_0 = arith.constant 0 : index
    %0 = vector.load %arg1[%c0, %c0_0] : memref<80x576xf32, #tpu.memory_space<vmem>>, vector<80x576xf32>
    %c0_1 = arith.constant 0 : index
    %c0_2 = arith.constant 0 : index
    %1 = vector.load %arg2[%c0_1, %c0_2] : memref<576x64xf32, #tpu.memory_space<vmem>>, vector<576x64xf32>
    %cst = arith.constant dense<0.000000e+00> : vector<80x64xf32>
    %2 = tpu.matmul %0, %1, %cst {dimension_numbers = #tpu.dot_dimension_numbers<[1], [0], [0], [1], [0, 0, 1, 1], [], []>} : vector<80x576xf32>, vector<576x64xf32>, vector<80x64xf32> -> vector<80x64xf32>
    %c0_3 = arith.constant 0 : index
    %c0_4 = arith.constant 0 : index
    %3 = vector.load %arg3[%c0_3, %c0_4] : memref<1x64xf32, #tpu.memory_space<vmem>>, vector<1x64xf32>
    %4 = vector.broadcast %3 : vector<1x64xf32> to vector<80x64xf32>
    %5 = arith.addf %2, %4 : vector<80x64xf32>
    %cst_5 = arith.constant 0.000000e+00 : f32
    %6 = vector.broadcast %cst_5 : f32 to vector<80x64xf32>
    %7 = arith.maximumf %5, %6 : vector<80x64xf32>
    %c0_6 = arith.constant 0 : index
    %c0_7 = arith.constant 0 : index
    %8 = vector.load %arg4[%c0_6, %c0_7] : memref<80x64xf32, #tpu.memory_space<vmem>>, vector<80x64xf32>
    tpu.vector_store %arg4[%c0_6, %c0_7], %7 {strides = array<i32>} : memref<80x64xf32, #tpu.memory_space<vmem>>, vector<80x64xf32>,
    return
  }
  func.func @transform_0(%arg0: i32) -> (i32, i32) {
    %c0_i32 = arith.constant 0 : i32
    %c0_i32_0 = arith.constant 0 : i32
    return %arg0, %c0_i32 : i32, i32
  }
  func.func @transform_1(%arg0: i32) -> (i32, i32) {
    %c0_i32 = arith.constant 0 : i32
    %c0_i32_0 = arith.constant 0 : i32
    %c0_i32_1 = arith.constant 0 : i32
    return %c0_i32, %c0_i32_0 : i32, i32
  }
  func.func @transform_2(%arg0: i32) -> (i32, i32) {
    %c0_i32 = arith.constant 0 : i32
    %c0_i32_0 = arith.constant 0 : i32
    %c0_i32_1 = arith.constant 0 : i32
    return %c0_i32, %c0_i32_0 : i32, i32
  }
  func.func @transform_3(%arg0: i32) -> (i32, i32) {
    %c0_i32 = arith.constant 0 : i32
    %c0_i32_0 = arith.constant 0 : i32
    return %arg0, %c0_i32 : i32, i32
  }
}

module attributes {stable_mosaic.version = 11 : i64} {
  func.func @_head_kernel(%arg0: i32, %arg1: memref<2x2560xf32, #tpu.memory_space<vmem>>, %arg2: memref<2560x512xbf16, #tpu.memory_space<vmem>>, %arg3: memref<1x512xf32, #tpu.memory_space<vmem>>, %arg4: memref<512x128xbf16, #tpu.memory_space<vmem>>, %arg5: memref<1x128xf32, #tpu.memory_space<vmem>>, %arg6: memref<2x128xf32, #tpu.memory_space<vmem>>) attributes {dimension_semantics = [#tpu.dimension_semantics<arbitrary>], iteration_bounds = array<i64: 1>, scalar_prefetch = 0 : i64, scratch_operands = 0 : i64, tpu.core_type = #tpu.core_type<tc>, window_params = [{pipeline_mode = #tpu.pipeline_mode<synchronous>, transform_indices = @transform_0, window_bounds = array<i64: 2, 2560>}, {pipeline_mode = #tpu.pipeline_mode<synchronous>, transform_indices = @transform_1, window_bounds = array<i64: 2560, 512>}, {pipeline_mode = #tpu.pipeline_mode<synchronous>, transform_indices = @transform_2, window_bounds = array<i64: 1, 512>}, {pipeline_mode = #tpu.pipeline_mode<synchronous>, transform_indices = @transform_3, window_bounds = array<i64: 512, 128>}, {pipeline_mode = #tpu.pipeline_mode<synchronous>, transform_indices = @transform_4, window_bounds = array<i64: 1, 128>}, {pipeline_mode = #tpu.pipeline_mode<synchronous>, transform_indices = @transform_5, window_bounds = array<i64: 2, 128>}]} {
    %c0 = arith.constant 0 : index
    %c0_0 = arith.constant 0 : index
    %0 = vector.load %arg1[%c0, %c0_0] : memref<2x2560xf32, #tpu.memory_space<vmem>>, vector<2x2560xf32>
    %1 = arith.truncf %0 : vector<2x2560xf32> to vector<2x2560xbf16>
    %c0_1 = arith.constant 0 : index
    %c0_2 = arith.constant 0 : index
    %2 = vector.load %arg2[%c0_1, %c0_2] : memref<2560x512xbf16, #tpu.memory_space<vmem>>, vector<2560x512xbf16>
    %cst = arith.constant dense<0.000000e+00> : vector<2x512xf32>
    %3 = tpu.matmul %1, %2, %cst {dimension_numbers = #tpu.dot_dimension_numbers<[1], [0], [0], [1], [0, 0, 1, 1], [], []>} : vector<2x2560xbf16>, vector<2560x512xbf16>, vector<2x512xf32> -> vector<2x512xf32>
    %c0_3 = arith.constant 0 : index
    %c0_4 = arith.constant 0 : index
    %4 = vector.load %arg3[%c0_3, %c0_4] : memref<1x512xf32, #tpu.memory_space<vmem>>, vector<1x512xf32>
    %5 = vector.broadcast %4 : vector<1x512xf32> to vector<2x512xf32>
    %6 = arith.addf %3, %5 : vector<2x512xf32>
    %cst_5 = arith.constant 0.000000e+00 : f32
    %7 = vector.broadcast %cst_5 : f32 to vector<2x512xf32>
    %8 = arith.maximumf %6, %7 : vector<2x512xf32>
    %9 = arith.truncf %8 : vector<2x512xf32> to vector<2x512xbf16>
    %c0_6 = arith.constant 0 : index
    %c0_7 = arith.constant 0 : index
    %10 = vector.load %arg4[%c0_6, %c0_7] : memref<512x128xbf16, #tpu.memory_space<vmem>>, vector<512x128xbf16>
    %cst_8 = arith.constant dense<0.000000e+00> : vector<2x128xf32>
    %11 = tpu.matmul %9, %10, %cst_8 {dimension_numbers = #tpu.dot_dimension_numbers<[1], [0], [0], [1], [0, 0, 1, 1], [], []>} : vector<2x512xbf16>, vector<512x128xbf16>, vector<2x128xf32> -> vector<2x128xf32>
    %c0_9 = arith.constant 0 : index
    %c0_10 = arith.constant 0 : index
    %12 = vector.load %arg5[%c0_9, %c0_10] : memref<1x128xf32, #tpu.memory_space<vmem>>, vector<1x128xf32>
    %13 = vector.broadcast %12 : vector<1x128xf32> to vector<2x128xf32>
    %14 = arith.addf %11, %13 : vector<2x128xf32>
    %c0_11 = arith.constant 0 : index
    %c0_12 = arith.constant 0 : index
    %15 = vector.load %arg6[%c0_11, %c0_12] : memref<2x128xf32, #tpu.memory_space<vmem>>, vector<2x128xf32>
    tpu.vector_store %arg6[%c0_11, %c0_12], %14 {strides = array<i32>} : memref<2x128xf32, #tpu.memory_space<vmem>>, vector<2x128xf32>,
    return
  }
  func.func @transform_0(%arg0: i32) -> (i32, i32) {
    %c0_i32 = arith.constant 0 : i32
    %c0_i32_0 = arith.constant 0 : i32
    %c0_i32_1 = arith.constant 0 : i32
    return %c0_i32, %c0_i32_0 : i32, i32
  }
  func.func @transform_1(%arg0: i32) -> (i32, i32) {
    %c0_i32 = arith.constant 0 : i32
    %c0_i32_0 = arith.constant 0 : i32
    %c0_i32_1 = arith.constant 0 : i32
    return %c0_i32, %c0_i32_0 : i32, i32
  }
  func.func @transform_2(%arg0: i32) -> (i32, i32) {
    %c0_i32 = arith.constant 0 : i32
    %c0_i32_0 = arith.constant 0 : i32
    %c0_i32_1 = arith.constant 0 : i32
    return %c0_i32, %c0_i32_0 : i32, i32
  }
  func.func @transform_3(%arg0: i32) -> (i32, i32) {
    %c0_i32 = arith.constant 0 : i32
    %c0_i32_0 = arith.constant 0 : i32
    %c0_i32_1 = arith.constant 0 : i32
    return %c0_i32, %c0_i32_0 : i32, i32
  }
  func.func @transform_4(%arg0: i32) -> (i32, i32) {
    %c0_i32 = arith.constant 0 : i32
    %c0_i32_0 = arith.constant 0 : i32
    %c0_i32_1 = arith.constant 0 : i32
    return %c0_i32, %c0_i32_0 : i32, i32
  }
  func.func @transform_5(%arg0: i32) -> (i32, i32) {
    %c0_i32 = arith.constant 0 : i32
    %c0_i32_0 = arith.constant 0 : i32
    %c0_i32_1 = arith.constant 0 : i32
    return %c0_i32, %c0_i32_0 : i32, i32
  }
}

</mosaic_0001>

<bundles_post_ra>
// kernel: soft_q_forward.4
= control target key start
LH: loop header
LB: loop body
LE: loop exit
PB: predicated region body
PF: predicated region fallthrough
CT: control target
= control target key end

     0   :  { %v1322_v0 = vmov 0.0|0.0   ;;  %vm221_vm0 = vcmask 523264   ;;  %vm1079_vm1 = vcmask 261120   ;;  %s2500_s1 = inlined_call_operand.vmem [shape: f32[192,32], index: 1, kind: input, shape index: {}]   ;;  %s2501_s0 = inlined_call_operand.vmem [shape: f32[704,192], index: 0, kind: input, shape index: {}]   ;;  %s2502_s2 = inlined_call_operand.vmem [shape: f32[1,32], index: 2, kind: input, shape index: {}]   ;;  %s2503_s3 = inlined_call_operand.vmem [shape: f32[704,32], index: 3, kind: output, shape index: {}]  }
   0x1   :  { %1261 = vmatprep.subr.bf16.mxu0 %v1322_v0  ;;  %1297 = vmatprep.subr.bf16.mxu1 %v1322_v0  ;;  %v190_v1 = vld [vmem:[%s2500_s1] sm:$0xff]  ;;  %v191_v2 = vld [vmem:[%s2500_s1 + $0x8] sm:$0xff]  ;;  %v192_v3 = vld [vmem:[%s2500_s1 + $0x10] sm:$0xff] }
   0x2   :  { %v1262_v4 = vpack.c.bf16 %v191_v2, %v190_v1  ;;  %v193_v5 = vld [vmem:[%s2500_s1 + $0x18] sm:$0xff]  ;;  %v194_v7 = vld [vmem:[%s2500_s1 + $0x20] sm:$0xff]  ;;  %v195_v8 = vld [vmem:[%s2500_s1 + $0x28] sm:$0xff] }
   0x3   :  { %v1265_v6 = vpack.c.bf16 %v193_v5, %v192_v3  ;;  %v1268_v9 = vpack.c.bf16 %v195_v8, %v194_v7  ;;  %v196_v10 = vld [vmem:[%s2500_s1 + $0x30] sm:$0xff]  ;;  %v197_v11 = vld [vmem:[%s2500_s1 + $0x38] sm:$0xff]  ;;  %v15_v12 = vld [vmem:[%s2501_s0 + $0x8] sm:$0xff] }
   0x4   :  { %1263 = vmatpush1.bf16.msra.mxu0 %v1262_v4  ;;  %1309 = vmatpush1.bf16.msra.mxu1 %v1262_v4  ;;  %v103_v13 = vld [vmem:[%s2501_s0 + $0x2c8] sm:$0xff]  ;;  %v1271_v14 = vpack.c.bf16 %v197_v11, %v196_v10  ;;  %v198_v15 = vld [vmem:[%s2500_s1 + $0x40] sm:$0xff]  ;;  %v200_v18 = vld [vmem:[%s2500_s1 + $0x50] sm:$0xff] }
   0x5   :  { %1264 = vmatprep.subr.bf16.mxu0 %v1322_v0  ;;  %1298 = vmatprep.subr.bf16.mxu1 %v1322_v0  ;;  %v199_v16 = vld [vmem:[%s2500_s1 + $0x48] sm:$0xff]  ;;  %v201_v19 = vld [vmem:[%s2500_s1 + $0x58] sm:$0xff]  ;;  %v202_v21 = vld [vmem:[%s2500_s1 + $0x60] sm:$0xff] }
   0x6   :  { %1173 = vmatprep.mubr.msk.f32.mxu0 %vm221_vm0, %v15_v12  ;;  %1217 = vmatprep.mubr.msk.f32.mxu1 %vm221_vm0, %v103_v13  ;;  %v1274_v17 = vpack.c.bf16 %v199_v16, %v198_v15  ;;  %v1277_v20 = vpack.c.bf16 %v201_v19, %v200_v18  ;;  %v203_v22 = vld [vmem:[%s2500_s1 + $0x68] sm:$0xff]  ;;  %v204_v24 = vld [vmem:[%s2500_s1 + $0x70] sm:$0xff]  ;;  %v205_v25 = vld [vmem:[%s2500_s1 + $0x78] sm:$0xff] }
   0x7   :  { %v1280_v23 = vpack.c.bf16 %v203_v22, %v202_v21  ;;  %v1283_v26 = vpack.c.bf16 %v205_v25, %v204_v24  ;;  %v206_v27 = vld [vmem:[%s2500_s1 + $0x80] sm:$0xff]  ;;  %v207_v28 = vld [vmem:[%s2500_s1 + $0x88] sm:$0xff]  ;;  %v208_v30 = vld [vmem:[%s2500_s1 + $0x90] sm:$0xff] }
   0x8   :  { %1266 = vmatpush1.bf16.msra.mxu0 %v1265_v6  ;;  %1310 = vmatpush1.bf16.msra.mxu1 %v1265_v6  ;;  %v1286_v29 = vpack.c.bf16 %v207_v28, %v206_v27  ;;  %v209_v31 = vld [vmem:[%s2500_s1 + $0x98] sm:$0xff]  ;;  %v210_v33 = vld [vmem:[%s2500_s1 + $0xa0] sm:$0xff]  ;;  %v211_v34 = vld [vmem:[%s2500_s1 + $0xa8] sm:$0xff] }
   0x9   :  { %1267 = vmatprep.subr.bf16.mxu0 %v1322_v0  ;;  %1299 = vmatprep.subr.bf16.mxu1 %v1322_v0  ;;  %v1289_v32 = vpack.c.bf16 %v209_v31, %v208_v30  ;;  %v1292_v35 = vpack.c.bf16 %v211_v34, %v210_v33  ;;  %v212_v36 = vld [vmem:[%s2500_s1 + $0xb0] sm:$0xff]  ;;  %v213_v37 = vld [vmem:[%s2500_s1 + $0xb8] sm:$0xff]  ;;  %v14_v39 = vld [vmem:[%s2501_s0] sm:$0xff] }
   0xa   :  { %v1295_v38 = vpack.c.bf16 %v213_v37, %v212_v36  ;;  %v102_v40 = vld [vmem:[%s2501_s0 + $0x2c0] sm:$0xff]  ;;  %v17_v41 = vld [vmem:[%s2501_s0 + $0x18] sm:$0xff]  ;;  %v16_v43 = vld [vmem:[%s2501_s0 + $0x10] sm:$0xff] }
   0xb   :  { %v105_v42 = vld [vmem:[%s2501_s0 + $0x2d8] sm:$0xff]  ;;  %v104_v44 = vld [vmem:[%s2501_s0 + $0x2d0] sm:$0xff]  ;;  %v19_v45 = vld [vmem:[%s2501_s0 + $0x28] sm:$0xff] }
   0xc   :  { %1269 = vmatpush1.bf16.msra.mxu0 %v1268_v9  ;;  %1311 = vmatpush1.bf16.msra.mxu1 %v1268_v9  ;;  %v107_v46 = vld [vmem:[%s2501_s0 + $0x2e8] sm:$0xff]  ;;  %v18_v47 = vld [vmem:[%s2501_s0 + $0x20] sm:$0xff]  ;;  %v21_v49 = vld [vmem:[%s2501_s0 + $0x38] sm:$0xff] }
   0xd   :  { %1270 = vmatprep.subr.bf16.mxu0 %v1322_v0  ;;  %1300 = vmatprep.subr.bf16.mxu1 %v1322_v0  ;;  %v106_v48 = vld [vmem:[%s2501_s0 + $0x2e0] sm:$0xff]  ;;  %v109_v50 = vld [vmem:[%s2501_s0 + $0x2f8] sm:$0xff]  ;;  %v20_v51 = vld [vmem:[%s2501_s0 + $0x30] sm:$0xff] }
   0xe   :  { %v108_v52 = vld [vmem:[%s2501_s0 + $0x2f0] sm:$0xff]  ;;  %v23_v53 = vld [vmem:[%s2501_s0 + $0x48] sm:$0xff]  ;;  %v22_v55 = vld [vmem:[%s2501_s0 + $0x40] sm:$0xff] }
   0xf   :  { %v111_v54 = vld [vmem:[%s2501_s0 + $0x308] sm:$0xff]  ;;  %v110_v56 = vld [vmem:[%s2501_s0 + $0x300] sm:$0xff]  ;;  %v25_v57 = vld [vmem:[%s2501_s0 + $0x58] sm:$0xff] }
  0x10   :  { %1272 = vmatpush1.bf16.msra.mxu0 %v1271_v14  ;;  %1312 = vmatpush1.bf16.msra.mxu1 %v1271_v14  ;;  %v113_v58 = vld [vmem:[%s2501_s0 + $0x318] sm:$0xff]  ;;  %v24_v59 = vld [vmem:[%s2501_s0 + $0x50] sm:$0xff]  ;;  %v27_v61 = vld [vmem:[%s2501_s0 + $0x68] sm:$0xff] }
  0x11   :  { %1273 = vmatprep.subr.bf16.mxu0 %v1322_v0  ;;  %1301 = vmatprep.subr.bf16.mxu1 %v1322_v0  ;;  %v112_v60 = vld [vmem:[%s2501_s0 + $0x310] sm:$0xff]  ;;  %v115_v62 = vld [vmem:[%s2501_s0 + $0x328] sm:$0xff]  ;;  %v26_v63 = vld [vmem:[%s2501_s0 + $0x60] sm:$0xff] }
  0x12   :  { %v29_v1 = vld [vmem:[%s2501_s0 + $0x78] sm:$0xff]  ;;  %v28_v3 = vld [vmem:[%s2501_s0 + $0x70] sm:$0xff]  ;;  %v31_v5 = vld [vmem:[%s2501_s0 + $0x88] sm:$0xff] }
  0x13   :  { %v117_v2 = vld [vmem:[%s2501_s0 + $0x338] sm:$0xff]  ;;  %v116_v4 = vld [vmem:[%s2501_s0 + $0x330] sm:$0xff]  ;;  %v119_v6 = vld [vmem:[%s2501_s0 + $0x348] sm:$0xff] }
  0x14   :  { %1275 = vmatpush1.bf16.msra.mxu0 %v1274_v17  ;;  %1313 = vmatpush1.bf16.msra.mxu1 %v1274_v17  ;;  %v30_v7 = vld [vmem:[%s2501_s0 + $0x80] sm:$0xff]  ;;  %v33_v9 = vld [vmem:[%s2501_s0 + $0x98] sm:$0xff]  ;;  %v32_v11 = vld [vmem:[%s2501_s0 + $0x90] sm:$0xff] }
  0x15   :  { %1276 = vmatprep.subr.bf16.mxu0 %v1322_v0  ;;  %1302 = vmatprep.subr.bf16.mxu1 %v1322_v0  ;;  %v118_v8 = vld [vmem:[%s2501_s0 + $0x340] sm:$0xff]  ;;  %v121_v10 = vld [vmem:[%s2501_s0 + $0x358] sm:$0xff]  ;;  %v120_v12 = vld [vmem:[%s2501_s0 + $0x350] sm:$0xff] }
  0x16   :  { %v35_v13 = vld [vmem:[%s2501_s0 + $0xa8] sm:$0xff]  ;;  %v34_v15 = vld [vmem:[%s2501_s0 + $0xa0] sm:$0xff]  ;;  %v37_v17 = vld [vmem:[%s2501_s0 + $0xb8] sm:$0xff] }
  0x17   :  { %v123_v14 = vld [vmem:[%s2501_s0 + $0x368] sm:$0xff]  ;;  %v122_v16 = vld [vmem:[%s2501_s0 + $0x360] sm:$0xff]  ;;  %v125_v18 = vld [vmem:[%s2501_s0 + $0x378] sm:$0xff] }
  0x18   :  { %1278 = vmatpush1.bf16.msra.mxu0 %v1277_v20  ;;  %1314 = vmatpush1.bf16.msra.mxu1 %v1277_v20  ;;  %v36_v19 = vld [vmem:[%s2501_s0 + $0xb0] sm:$0xff]  ;;  %v39_v21 = vld [vmem:[%s2501_s0 + $0xc8] sm:$0xff]  ;;  %v126_v24 = vld [vmem:[%s2501_s0 + $0x380] sm:$0xff] }
  0x19   :  { %1279 = vmatprep.subr.bf16.mxu0 %v1322_v0  ;;  %1303 = vmatprep.subr.bf16.mxu1 %v1322_v0  ;;  %v124_v20 = vld [vmem:[%s2501_s0 + $0x370] sm:$0xff]  ;;  %v127_v22 = vld [vmem:[%s2501_s0 + $0x388] sm:$0xff]  ;;  %v41_v25 = vld [vmem:[%s2501_s0 + $0xd8] sm:$0xff] }
  0x1a   :  { %v40_v27 = vld [vmem:[%s2501_s0 + $0xd0] sm:$0xff]  ;;  %v131_v30 = vld [vmem:[%s2501_s0 + $0x3a8] sm:$0xff]  ;;  %v42_v31 = vld [vmem:[%s2501_s0 + $0xe0] sm:$0xff] }
  0x1b   :  { %v128_v28 = vld [vmem:[%s2501_s0 + $0x390] sm:$0xff]  ;;  %v45_v33 = vld [vmem:[%s2501_s0 + $0xf8] sm:$0xff]  ;;  %v47_v37 = vld [vmem:[%s2501_s0 + $0x108] sm:$0xff] }
  0x1c   :  { %1281 = vmatpush1.bf16.msra.mxu0 %v1280_v23  ;;  %1315 = vmatpush1.bf16.msra.mxu1 %v1280_v23  ;;  %v38_v23 = vld [vmem:[%s2501_s0 + $0xc0] sm:$0xff]  ;;  %v133_v34 = vld [vmem:[%s2501_s0 + $0x3b8] sm:$0xff]  ;;  %v132_v36 = vld [vmem:[%s2501_s0 + $0x3b0] sm:$0xff] }
  0x1d   :  { %1282 = vmatprep.subr.bf16.mxu0 %v1322_v0  ;;  %1304 = vmatprep.subr.bf16.mxu1 %v1322_v0 }
  0x20   :  { %1284 = vmatpush1.bf16.msra.mxu0 %v1283_v26  ;;  %1316 = vmatpush1.bf16.msra.mxu1 %v1283_v26  ;;  %v129_v26 = vld [vmem:[%s2501_s0 + $0x398] sm:$0xff] }
  0x21   :  { %1285 = vmatprep.subr.bf16.mxu0 %v1322_v0  ;;  %1305 = vmatprep.subr.bf16.mxu1 %v1322_v0 }
  0x24   :  { %1287 = vmatpush1.bf16.msra.mxu0 %v1286_v29  ;;  %1317 = vmatpush1.bf16.msra.mxu1 %v1286_v29  ;;  %v43_v29 = vld [vmem:[%s2501_s0 + $0xe8] sm:$0xff] }
  0x25   :  { %1288 = vmatprep.subr.bf16.mxu0 %v1322_v0  ;;  %1306 = vmatprep.subr.bf16.mxu1 %v1322_v0 }
  0x28   :  { %1290 = vmatpush1.bf16.msra.mxu0 %v1289_v32  ;;  %1318 = vmatpush1.bf16.msra.mxu1 %v1289_v32  ;;  %v130_v32 = vld [vmem:[%s2501_s0 + $0x3a0] sm:$0xff] }
  0x29   :  { %1291 = vmatprep.subr.bf16.mxu0 %v1322_v0  ;;  %1307 = vmatprep.subr.bf16.mxu1 %v1322_v0 }
  0x2c   :  { %1293 = vmatpush1.bf16.msra.mxu0 %v1292_v35  ;;  %1319 = vmatpush1.bf16.msra.mxu1 %v1292_v35  ;;  %v44_v35 = vld [vmem:[%s2501_s0 + $0xf0] sm:$0xff] }
  0x2d   :  { %1294 = vmatprep.subr.bf16.mxu0 %v1322_v0  ;;  %1308 = vmatprep.subr.bf16.mxu1 %v1322_v0  ;;  %v114_v0 = vld [vmem:[%s2501_s0 + $0x320] sm:$0xff] }
  0x30   :  { %1296 = vmatpush1.bf16.msra.mxu0 %v1295_v38  ;;  %1320 = vmatpush1.bf16.msra.mxu1 %v1295_v38  ;;  %v135_v38 = vld [vmem:[%s2501_s0 + $0x3c8] sm:$0xff] }
  0x33   :  { %551 = vmatmul.mubr.f32.vlgmr.msra.gmra.mrb[0].mxu0 %v14_v39  ;;  %771 = vmatmul.mubr.f32.vlgmr.msra.gmra.mrb[0].mxu1 %v102_v40  ;;  %v46_v39 = vld [vmem:[%s2501_s0 + $0x100] sm:$0xff] }
  0x34   :  { %1174 = vmatprep.mubr.msk.f32.mxu0 %vm221_vm0, %v17_v41  ;;  %1218 = vmatprep.mubr.msk.f32.mxu1 %vm221_vm0, %v105_v42  ;;  %v134_v40 = vld [vmem:[%s2501_s0 + $0x3c0] sm:$0xff]  ;;  %v49_v41 = vld [vmem:[%s2501_s0 + $0x118] sm:$0xff] }
  0x35   :  { %v137_v42 = vld [vmem:[%s2501_s0 + $0x3d8] sm:$0xff] }
  0x37   :  { %556 = vmatmul.mubr.f32.gmra.mrb[2].mxu0 %v16_v43  ;;  %776 = vmatmul.mubr.f32.gmra.mrb[2].mxu1 %v104_v44  ;;  %v48_v43 = vld [vmem:[%s2501_s0 + $0x110] sm:$0xff] }
  0x38   :  { %1175 = vmatprep.mubr.msk.f32.mxu0 %vm221_vm0, %v19_v45  ;;  %1219 = vmatprep.mubr.msk.f32.mxu1 %vm221_vm0, %v107_v46  ;;  %v136_v44 = vld [vmem:[%s2501_s0 + $0x3d0] sm:$0xff]  ;;  %v51_v45 = vld [vmem:[%s2501_s0 + $0x128] sm:$0xff] }
  0x39   :  { %v139_v46 = vld [vmem:[%s2501_s0 + $0x3e8] sm:$0xff] }
  0x3b   :  { %561 = vmatmul.mubr.f32.gmra.mrb[4].mxu0 %v18_v47  ;;  %781 = vmatmul.mubr.f32.gmra.mrb[4].mxu1 %v106_v48  ;;  %v50_v47 = vld [vmem:[%s2501_s0 + $0x120] sm:$0xff] }
  0x3c   :  { %1176 = vmatprep.mubr.msk.f32.mxu0 %vm221_vm0, %v21_v49  ;;  %1220 = vmatprep.mubr.msk.f32.mxu1 %vm221_vm0, %v109_v50  ;;  %v138_v48 = vld [vmem:[%s2501_s0 + $0x3e0] sm:$0xff]  ;;  %v53_v49 = vld [vmem:[%s2501_s0 + $0x138] sm:$0xff] }
  0x3d   :  { %v141_v50 = vld [vmem:[%s2501_s0 + $0x3f8] sm:$0xff] }
  0x3f   :  { %566 = vmatmul.mubr.f32.gmra.mrb[6].mxu0 %v20_v51  ;;  %786 = vmatmul.mubr.f32.gmra.mrb[6].mxu1 %v108_v52  ;;  %v52_v51 = vld [vmem:[%s2501_s0 + $0x130] sm:$0xff] }
  0x40   :  { %1177 = vmatprep.mubr.msk.f32.mxu0 %vm221_vm0, %v23_v53  ;;  %1221 = vmatprep.mubr.msk.f32.mxu1 %vm221_vm0, %v111_v54  ;;  %v140_v52 = vld [vmem:[%s2501_s0 + $0x3f0] sm:$0xff]  ;;  %v55_v53 = vld [vmem:[%s2501_s0 + $0x148] sm:$0xff] }
  0x41   :  { %v143_v54 = vld [vmem:[%s2501_s0 + $0x408] sm:$0xff] }
  0x43   :  { %571 = vmatmul.mubr.f32.gmra.mrb[8].mxu0 %v22_v55  ;;  %791 = vmatmul.mubr.f32.gmra.mrb[8].mxu1 %v110_v56  ;;  %v54_v55 = vld [vmem:[%s2501_s0 + $0x140] sm:$0xff] }
  0x44   :  { %1178 = vmatprep.mubr.msk.f32.mxu0 %vm221_vm0, %v25_v57  ;;  %1222 = vmatprep.mubr.msk.f32.mxu1 %vm221_vm0, %v113_v58  ;;  %v142_v56 = vld [vmem:[%s2501_s0 + $0x400] sm:$0xff]  ;;  %v57_v57 = vld [vmem:[%s2501_s0 + $0x158] sm:$0xff] }
  0x45   :  { %v145_v58 = vld [vmem:[%s2501_s0 + $0x418] sm:$0xff] }
  0x47   :  { %576 = vmatmul.mubr.f32.gmra.mrb[10].mxu0 %v24_v59  ;;  %796 = vmatmul.mubr.f32.gmra.mrb[10].mxu1 %v112_v60  ;;  %v56_v59 = vld [vmem:[%s2501_s0 + $0x150] sm:$0xff] }
  0x48   :  { %1179 = vmatprep.mubr.msk.f32.mxu0 %vm221_vm0, %v27_v61  ;;  %1223 = vmatprep.mubr.msk.f32.mxu1 %vm221_vm0, %v115_v62  ;;  %v144_v60 = vld [vmem:[%s2501_s0 + $0x410] sm:$0xff]  ;;  %v59_v61 = vld [vmem:[%s2501_s0 + $0x168] sm:$0xff] }
  0x49   :  { %v147_v62 = vld [vmem:[%s2501_s0 + $0x428] sm:$0xff] }
  0x4b   :  { %581 = vmatmul.mubr.f32.gmra.mrb[12].mxu0 %v26_v63  ;;  %801 = vmatmul.mubr.f32.gmra.mrb[12].mxu1 %v114_v0  ;;  %v58_v63 = vld [vmem:[%s2501_s0 + $0x160] sm:$0xff] }
  0x4c   :  { %1180 = vmatprep.mubr.msk.f32.mxu0 %vm221_vm0, %v29_v1  ;;  %1224 = vmatprep.mubr.msk.f32.mxu1 %vm221_vm0, %v117_v2  ;;  %v146_v0 = vld [vmem:[%s2501_s0 + $0x420] sm:$0xff]  ;;  %v61_v1 = vld [vmem:[%s2501_s0 + $0x178] sm:$0xff] }
  0x4d   :  { %v149_v2 = vld [vmem:[%s2501_s0 + $0x438] sm:$0xff] }
  0x4f   :  { %586 = vmatmul.mubr.f32.gmra.mrb[14].mxu0 %v28_v3  ;;  %806 = vmatmul.mubr.f32.gmra.mrb[14].mxu1 %v116_v4  ;;  %v60_v3 = vld [vmem:[%s2501_s0 + $0x170] sm:$0xff] }
  0x50   :  { %1181 = vmatprep.mubr.msk.f32.mxu0 %vm221_vm0, %v31_v5  ;;  %1225 = vmatprep.mubr.msk.f32.mxu1 %vm221_vm0, %v119_v6  ;;  %v148_v4 = vld [vmem:[%s2501_s0 + $0x430] sm:$0xff]  ;;  %v63_v5 = vld [vmem:[%s2501_s0 + $0x188] sm:$0xff] }
  0x51   :  { %v151_v6 = vld [vmem:[%s2501_s0 + $0x448] sm:$0xff] }
  0x53   :  { %591 = vmatmul.mubr.f32.gmra.mrb[16].mxu0 %v30_v7  ;;  %811 = vmatmul.mubr.f32.gmra.mrb[16].mxu1 %v118_v8  ;;  %v62_v7 = vld [vmem:[%s2501_s0 + $0x180] sm:$0xff] }
  0x54   :  { %1182 = vmatprep.mubr.msk.f32.mxu0 %vm221_vm0, %v33_v9  ;;  %1226 = vmatprep.mubr.msk.f32.mxu1 %vm221_vm0, %v121_v10  ;;  %v150_v8 = vld [vmem:[%s2501_s0 + $0x440] sm:$0xff]  ;;  %v65_v9 = vld [vmem:[%s2501_s0 + $0x198] sm:$0xff] }
  0x55   :  { %v153_v10 = vld [vmem:[%s2501_s0 + $0x458] sm:$0xff] }
  0x57   :  { %596 = vmatmul.mubr.f32.gmra.mrb[18].mxu0 %v32_v11  ;;  %816 = vmatmul.mubr.f32.gmra.mrb[18].mxu1 %v120_v12  ;;  %v64_v11 = vld [vmem:[%s2501_s0 + $0x190] sm:$0xff] }
  0x58   :  { %1183 = vmatprep.mubr.msk.f32.mxu0 %vm221_vm0, %v35_v13  ;;  %1227 = vmatprep.mubr.msk.f32.mxu1 %vm221_vm0, %v123_v14  ;;  %v152_v12 = vld [vmem:[%s2501_s0 + $0x450] sm:$0xff]  ;;  %v67_v13 = vld [vmem:[%s2501_s0 + $0x1a8] sm:$0xff] }
  0x59   :  { %v155_v14 = vld [vmem:[%s2501_s0 + $0x468] sm:$0xff] }
  0x5b   :  { %601 = vmatmul.mubr.f32.gmra.mrb[20].mxu0 %v34_v15  ;;  %821 = vmatmul.mubr.f32.gmra.mrb[20].mxu1 %v122_v16  ;;  %v66_v15 = vld [vmem:[%s2501_s0 + $0x1a0] sm:$0xff] }
  0x5c   :  { %1184 = vmatprep.mubr.msk.f32.mxu0 %vm221_vm0, %v37_v17  ;;  %1228 = vmatprep.mubr.msk.f32.mxu1 %vm221_vm0, %v125_v18  ;;  %v154_v16 = vld [vmem:[%s2501_s0 + $0x460] sm:$0xff]  ;;  %v69_v17 = vld [vmem:[%s2501_s0 + $0x1b8] sm:$0xff] }
  0x5d   :  { %v157_v18 = vld [vmem:[%s2501_s0 + $0x478] sm:$0xff] }
  0x5f   :  { %606 = vmatmul.mubr.f32.gmra.mrb[22].mxu0 %v36_v19  ;;  %826 = vmatmul.mubr.f32.gmra.mrb[22].mxu1 %v124_v20  ;;  %v68_v19 = vld [vmem:[%s2501_s0 + $0x1b0] sm:$0xff] }
  0x60   :  { %1185 = vmatprep.mubr.msk.f32.mxu0 %vm221_vm0, %v39_v21  ;;  %1229 = vmatprep.mubr.msk.f32.mxu1 %vm221_vm0, %v127_v22  ;;  %v156_v20 = vld [vmem:[%s2501_s0 + $0x470] sm:$0xff]  ;;  %v71_v21 = vld [vmem:[%s2501_s0 + $0x1c8] sm:$0xff] }
  0x61   :  { %v159_v22 = vld [vmem:[%s2501_s0 + $0x488] sm:$0xff] }
  0x63   :  { %611 = vmatmul.mubr.f32.gmra.mrb[24].mxu0 %v38_v23  ;;  %831 = vmatmul.mubr.f32.gmra.mrb[24].mxu1 %v126_v24  ;;  %v70_v23 = vld [vmem:[%s2501_s0 + $0x1c0] sm:$0xff] }
  0x64   :  { %1186 = vmatprep.mubr.msk.f32.mxu0 %vm221_vm0, %v41_v25  ;;  %1230 = vmatprep.mubr.msk.f32.mxu1 %vm221_vm0, %v129_v26  ;;  %v158_v24 = vld [vmem:[%s2501_s0 + $0x480] sm:$0xff]  ;;  %v73_v25 = vld [vmem:[%s2501_s0 + $0x1d8] sm:$0xff] }
  0x65   :  { %v161_v26 = vld [vmem:[%s2501_s0 + $0x498] sm:$0xff] }
  0x67   :  { %616 = vmatmul.mubr.f32.gmra.mrb[26].mxu0 %v40_v27  ;;  %836 = vmatmul.mubr.f32.gmra.mrb[26].mxu1 %v128_v28  ;;  %v72_v27 = vld [vmem:[%s2501_s0 + $0x1d0] sm:$0xff] }
  0x68   :  { %1187 = vmatprep.mubr.msk.f32.mxu0 %vm221_vm0, %v43_v29  ;;  %1231 = vmatprep.mubr.msk.f32.mxu1 %vm221_vm0, %v131_v30  ;;  %v160_v28 = vld [vmem:[%s2501_s0 + $0x490] sm:$0xff]  ;;  %v75_v29 = vld [vmem:[%s2501_s0 + $0x1e8] sm:$0xff] }
  0x69   :  { %v163_v30 = vld [vmem:[%s2501_s0 + $0x4a8] sm:$0xff] }
  0x6b   :  { %621 = vmatmul.mubr.f32.gmra.mrb[28].mxu0 %v42_v31  ;;  %841 = vmatmul.mubr.f32.gmra.mrb[28].mxu1 %v130_v32  ;;  %v74_v31 = vld [vmem:[%s2501_s0 + $0x1e0] sm:$0xff] }
  0x6c   :  { %1188 = vmatprep.mubr.msk.f32.mxu0 %vm221_vm0, %v45_v33  ;;  %1232 = vmatprep.mubr.msk.f32.mxu1 %vm221_vm0, %v133_v34  ;;  %v162_v32 = vld [vmem:[%s2501_s0 + $0x4a0] sm:$0xff]  ;;  %v77_v33 = vld [vmem:[%s2501_s0 + $0x1f8] sm:$0xff] }
  0x6d   :  { %v165_v34 = vld [vmem:[%s2501_s0 + $0x4b8] sm:$0xff] }
  0x6f   :  { %626 = vmatmul.mubr.f32.gmra.mrb[30].mxu0 %v44_v35  ;;  %846 = vmatmul.mubr.f32.gmra.mrb[30].mxu1 %v132_v36  ;;  %v76_v35 = vld [vmem:[%s2501_s0 + $0x1f0] sm:$0xff] }
  0x70   :  { %1189 = vmatprep.mubr.msk.f32.mxu0 %vm221_vm0, %v47_v37  ;;  %1233 = vmatprep.mubr.msk.f32.mxu1 %vm221_vm0, %v135_v38  ;;  %v164_v36 = vld [vmem:[%s2501_s0 + $0x4b0] sm:$0xff]  ;;  %v79_v37 = vld [vmem:[%s2501_s0 + $0x208] sm:$0xff] }
  0x71   :  { %v167_v38 = vld [vmem:[%s2501_s0 + $0x4c8] sm:$0xff] }
  0x73   :  { %631 = vmatmul.mubr.f32.gmra.mrb[32].mxu0 %v46_v39  ;;  %851 = vmatmul.mubr.f32.gmra.mrb[32].mxu1 %v134_v40  ;;  %v78_v39 = vld [vmem:[%s2501_s0 + $0x200] sm:$0xff] }
  0x74   :  { %1190 = vmatprep.mubr.msk.f32.mxu0 %vm221_vm0, %v49_v41  ;;  %1234 = vmatprep.mubr.msk.f32.mxu1 %vm221_vm0, %v137_v42  ;;  %v166_v40 = vld [vmem:[%s2501_s0 + $0x4c0] sm:$0xff]  ;;  %v81_v41 = vld [vmem:[%s2501_s0 + $0x218] sm:$0xff] }
  0x75   :  { %v169_v42 = vld [vmem:[%s2501_s0 + $0x4d8] sm:$0xff] }
  0x77   :  { %636 = vmatmul.mubr.f32.gmra.mrb[34].mxu0 %v48_v43  ;;  %856 = vmatmul.mubr.f32.gmra.mrb[34].mxu1 %v136_v44  ;;  %v80_v43 = vld [vmem:[%s2501_s0 + $0x210] sm:$0xff] }
  0x78   :  { %1191 = vmatprep.mubr.msk.f32.mxu0 %vm221_vm0, %v51_v45  ;;  %1235 = vmatprep.mubr.msk.f32.mxu1 %vm221_vm0, %v139_v46  ;;  %v168_v44 = vld [vmem:[%s2501_s0 + $0x4d0] sm:$0xff]  ;;  %v83_v45 = vld [vmem:[%s2501_s0 + $0x228] sm:$0xff] }
  0x79   :  { %v171_v46 = vld [vmem:[%s2501_s0 + $0x4e8] sm:$0xff] }
  0x7b   :  { %641 = vmatmul.mubr.f32.gmra.mrb[36].mxu0 %v50_v47  ;;  %861 = vmatmul.mubr.f32.gmra.mrb[36].mxu1 %v138_v48  ;;  %v82_v47 = vld [vmem:[%s2501_s0 + $0x220] sm:$0xff] }
  0x7c   :  { %1192 = vmatprep.mubr.msk.f32.mxu0 %vm221_vm0, %v53_v49  ;;  %1236 = vmatprep.mubr.msk.f32.mxu1 %vm221_vm0, %v141_v50  ;;  %v170_v48 = vld [vmem:[%s2501_s0 + $0x4e0] sm:$0xff]  ;;  %v85_v49 = vld [vmem:[%s2501_s0 + $0x238] sm:$0xff] }
  0x7d   :  { %v173_v50 = vld [vmem:[%s2501_s0 + $0x4f8] sm:$0xff] }
  0x7f   :  { %646 = vmatmul.mubr.f32.gmra.mrb[38].mxu0 %v52_v51  ;;  %866 = vmatmul.mubr.f32.gmra.mrb[38].mxu1 %v140_v52  ;;  %v84_v51 = vld [vmem:[%s2501_s0 + $0x230] sm:$0xff] }
  0x80   :  { %1193 = vmatprep.mubr.msk.f32.mxu0 %vm221_vm0, %v55_v53  ;;  %1237 = vmatprep.mubr.msk.f32.mxu1 %vm221_vm0, %v143_v54  ;;  %v172_v52 = vld [vmem:[%s2501_s0 + $0x4f0] sm:$0xff]  ;;  %v87_v53 = vld [vmem:[%s2501_s0 + $0x248] sm:$0xff] }
  0x81   :  { %v175_v54 = vld [vmem:[%s2501_s0 + $0x508] sm:$0xff] }
  0x83   :  { %651 = vmatmul.mubr.f32.gmra.mrb[40].mxu0 %v54_v55  ;;  %871 = vmatmul.mubr.f32.gmra.mrb[40].mxu1 %v142_v56  ;;  %v86_v55 = vld [vmem:[%s2501_s0 + $0x240] sm:$0xff] }
  0x84   :  { %1194 = vmatprep.mubr.msk.f32.mxu0 %vm221_vm0, %v57_v57  ;;  %1238 = vmatprep.mubr.msk.f32.mxu1 %vm221_vm0, %v145_v58  ;;  %v174_v56 = vld [vmem:[%s2501_s0 + $0x500] sm:$0xff]  ;;  %v89_v57 = vld [vmem:[%s2501_s0 + $0x258] sm:$0xff] }
  0x85   :  { %v177_v58 = vld [vmem:[%s2501_s0 + $0x518] sm:$0xff] }
  0x87   :  { %656 = vmatmul.mubr.f32.gmra.mrb[42].mxu0 %v56_v59  ;;  %876 = vmatmul.mubr.f32.gmra.mrb[42].mxu1 %v144_v60  ;;  %v88_v59 = vld [vmem:[%s2501_s0 + $0x250] sm:$0xff] }
  0x88   :  { %1195 = vmatprep.mubr.msk.f32.mxu0 %vm221_vm0, %v59_v61  ;;  %1239 = vmatprep.mubr.msk.f32.mxu1 %vm221_vm0, %v147_v62  ;;  %v176_v60 = vld [vmem:[%s2501_s0 + $0x510] sm:$0xff]  ;;  %v91_v61 = vld [vmem:[%s2501_s0 + $0x268] sm:$0xff] }
  0x89   :  { %v179_v62 = vld [vmem:[%s2501_s0 + $0x528] sm:$0xff] }
  0x8b   :  { %661 = vmatmul.mubr.f32.gmra.mrb[44].mxu0 %v58_v63  ;;  %881 = vmatmul.mubr.f32.gmra.mrb[44].mxu1 %v146_v0  ;;  %v90_v63 = vld [vmem:[%s2501_s0 + $0x260] sm:$0xff] }
  0x8c   :  { %1196 = vmatprep.mubr.msk.f32.mxu0 %vm221_vm0, %v61_v1  ;;  %1240 = vmatprep.mubr.msk.f32.mxu1 %vm221_vm0, %v149_v2  ;;  %v178_v0 = vld [vmem:[%s2501_s0 + $0x520] sm:$0xff]  ;;  %v93_v1 = vld [vmem:[%s2501_s0 + $0x278] sm:$0xff] }
  0x8d   :  { %v181_v2 = vld [vmem:[%s2501_s0 + $0x538] sm:$0xff] }
  0x8f   :  { %666 = vmatmul.mubr.f32.gmra.mrb[46].mxu0 %v60_v3  ;;  %886 = vmatmul.mubr.f32.gmra.mrb[46].mxu1 %v148_v4  ;;  %v92_v3 = vld [vmem:[%s2501_s0 + $0x270] sm:$0xff] }
  0x90   :  { %1197 = vmatprep.mubr.msk.f32.mxu0 %vm221_vm0, %v63_v5  ;;  %1241 = vmatprep.mubr.msk.f32.mxu1 %vm221_vm0, %v151_v6  ;;  %v180_v4 = vld [vmem:[%s2501_s0 + $0x530] sm:$0xff]  ;;  %v95_v5 = vld [vmem:[%s2501_s0 + $0x288] sm:$0xff] }
  0x91   :  { %v183_v6 = vld [vmem:[%s2501_s0 + $0x548] sm:$0xff] }
  0x93   :  { %671 = vmatmul.mubr.f32.gmra.mrb[48].mxu0 %v62_v7  ;;  %891 = vmatmul.mubr.f32.gmra.mrb[48].mxu1 %v150_v8  ;;  %v94_v7 = vld [vmem:[%s2501_s0 + $0x280] sm:$0xff] }
  0x94   :  { %1198 = vmatprep.mubr.msk.f32.mxu0 %vm221_vm0, %v65_v9  ;;  %1242 = vmatprep.mubr.msk.f32.mxu1 %vm221_vm0, %v153_v10  ;;  %v182_v8 = vld [vmem:[%s2501_s0 + $0x540] sm:$0xff]  ;;  %v97_v9 = vld [vmem:[%s2501_s0 + $0x298] sm:$0xff] }
  0x95   :  { %v185_v10 = vld [vmem:[%s2501_s0 + $0x558] sm:$0xff] }
  0x97   :  { %676 = vmatmul.mubr.f32.gmra.mrb[50].mxu0 %v64_v11  ;;  %896 = vmatmul.mubr.f32.gmra.mrb[50].mxu1 %v152_v12  ;;  %v96_v11 = vld [vmem:[%s2501_s0 + $0x290] sm:$0xff] }
  0x98   :  { %1199 = vmatprep.mubr.msk.f32.mxu0 %vm221_vm0, %v67_v13  ;;  %1243 = vmatprep.mubr.msk.f32.mxu1 %vm221_vm0, %v155_v14  ;;  %v184_v12 = vld [vmem:[%s2501_s0 + $0x550] sm:$0xff]  ;;  %v99_v13 = vld [vmem:[%s2501_s0 + $0x2a8] sm:$0xff] }
  0x99   :  { %v187_v14 = vld [vmem:[%s2501_s0 + $0x568] sm:$0xff] }
  0x9b   :  { %681 = vmatmul.mubr.f32.gmra.mrb[52].mxu0 %v66_v15  ;;  %901 = vmatmul.mubr.f32.gmra.mrb[52].mxu1 %v154_v16  ;;  %v98_v15 = vld [vmem:[%s2501_s0 + $0x2a0] sm:$0xff] }
  0x9c   :  { %1200 = vmatprep.mubr.msk.f32.mxu0 %vm221_vm0, %v69_v17  ;;  %1244 = vmatprep.mubr.msk.f32.mxu1 %vm221_vm0, %v157_v18  ;;  %v186_v16 = vld [vmem:[%s2501_s0 + $0x560] sm:$0xff]  ;;  %v101_v17 = vld [vmem:[%s2501_s0 + $0x2b8] sm:$0xff] }
  0x9d   :  { %v189_v18 = vld [vmem:[%s2501_s0 + $0x578] sm:$0xff] }
  0x9f   :  { %686 = vmatmul.mubr.f32.gmra.mrb[54].mxu0 %v68_v19  ;;  %906 = vmatmul.mubr.f32.gmra.mrb[54].mxu1 %v156_v20  ;;  %v100_v19 = vld [vmem:[%s2501_s0 + $0x2b0] sm:$0xff] }
  0xa0   :  { %1201 = vmatprep.mubr.msk.f32.mxu0 %vm221_vm0, %v71_v21  ;;  %1245 = vmatprep.mubr.msk.f32.mxu1 %vm221_vm0, %v159_v22  ;;  %v188_v20 = vld [vmem:[%s2501_s0 + $0x570] sm:$0xff]  ;;  %v2058_v21 = vld [vmem:[%s2502_s2] ss:$0 sm:$0xff] }
  0xa3   :  { %691 = vmatmul.mubr.f32.gmra.mrb[56].mxu0 %v70_v23  ;;  %911 = vmatmul.mubr.f32.gmra.mrb[56].mxu1 %v158_v24 }
  0xa4   :  { %1202 = vmatprep.mubr.msk.f32.mxu0 %vm221_vm0, %v73_v25  ;;  %1246 = vmatprep.mubr.msk.f32.mxu1 %vm221_vm0, %v161_v26 }
  0xa7   :  { %696 = vmatmul.mubr.f32.gmra.mrb[58].mxu0 %v72_v27  ;;  %916 = vmatmul.mubr.f32.gmra.mrb[58].mxu1 %v160_v28 }
  0xa8   :  { %1203 = vmatprep.mubr.msk.f32.mxu0 %vm221_vm0, %v75_v29  ;;  %1247 = vmatprep.mubr.msk.f32.mxu1 %vm221_vm0, %v163_v30 }
  0xab   :  { %701 = vmatmul.mubr.f32.gmra.mrb[60].mxu0 %v74_v31  ;;  %921 = vmatmul.mubr.f32.gmra.mrb[60].mxu1 %v162_v32 }
  0xac   :  { %1204 = vmatprep.mubr.msk.f32.mxu0 %vm221_vm0, %v77_v33  ;;  %1248 = vmatprep.mubr.msk.f32.mxu1 %vm221_vm0, %v165_v34 }
  0xaf   :  { %706 = vmatmul.mubr.f32.gmra.mrb[62].mxu0 %v76_v35  ;;  %926 = vmatmul.mubr.f32.gmra.mrb[62].mxu1 %v164_v36 }
  0xb0   :  { %1205 = vmatprep.mubr.msk.f32.mxu0 %vm221_vm0, %v79_v37  ;;  %1249 = vmatprep.mubr.msk.f32.mxu1 %vm221_vm0, %v167_v38 }
  0xb3   :  { %711 = vmatmul.mubr.f32.gmra.mrb[64].mxu0 %v78_v39  ;;  %931 = vmatmul.mubr.f32.gmra.mrb[64].mxu1 %v166_v40 }
  0xb4   :  { %1206 = vmatprep.mubr.msk.f32.mxu0 %vm221_vm0, %v81_v41  ;;  %1250 = vmatprep.mubr.msk.f32.mxu1 %vm221_vm0, %v169_v42 }
  0xb7   :  { %716 = vmatmul.mubr.f32.gmra.mrb[66].mxu0 %v80_v43  ;;  %936 = vmatmul.mubr.f32.gmra.mrb[66].mxu1 %v168_v44 }
  0xb8   :  { %1207 = vmatprep.mubr.msk.f32.mxu0 %vm221_vm0, %v83_v45  ;;  %1251 = vmatprep.mubr.msk.f32.mxu1 %vm221_vm0, %v171_v46 }
  0xbb   :  { %721 = vmatmul.mubr.f32.gmra.mrb[68].mxu0 %v82_v47  ;;  %941 = vmatmul.mubr.f32.gmra.mrb[68].mxu1 %v170_v48 }
  0xbc   :  { %1208 = vmatprep.mubr.msk.f32.mxu0 %vm221_vm0, %v85_v49  ;;  %1252 = vmatprep.mubr.msk.f32.mxu1 %vm221_vm0, %v173_v50 }
  0xbf   :  { %726 = vmatmul.mubr.f32.gmra.mrb[70].mxu0 %v84_v51  ;;  %946 = vmatmul.mubr.f32.gmra.mrb[70].mxu1 %v172_v52 }
  0xc0   :  { %1209 = vmatprep.mubr.msk.f32.mxu0 %vm221_vm0, %v87_v53  ;;  %1253 = vmatprep.mubr.msk.f32.mxu1 %vm221_vm0, %v175_v54 }
  0xc3   :  { %731 = vmatmul.mubr.f32.gmra.mrb[72].mxu0 %v86_v55  ;;  %951 = vmatmul.mubr.f32.gmra.mrb[72].mxu1 %v174_v56 }
  0xc4   :  { %1210 = vmatprep.mubr.msk.f32.mxu0 %vm221_vm0, %v89_v57  ;;  %1254 = vmatprep.mubr.msk.f32.mxu1 %vm221_vm0, %v177_v58 }
  0xc7   :  { %736 = vmatmul.mubr.f32.gmra.mrb[74].mxu0 %v88_v59  ;;  %956 = vmatmul.mubr.f32.gmra.mrb[74].mxu1 %v176_v60 }
  0xc8   :  { %1211 = vmatprep.mubr.msk.f32.mxu0 %vm221_vm0, %v91_v61  ;;  %1255 = vmatprep.mubr.msk.f32.mxu1 %vm221_vm0, %v179_v62 }
  0xcb   :  { %741 = vmatmul.mubr.f32.gmra.mrb[76].mxu0 %v90_v63  ;;  %961 = vmatmul.mubr.f32.gmra.mrb[76].mxu1 %v178_v0 }
  0xcc   :  { %1212 = vmatprep.mubr.msk.f32.mxu0 %vm221_vm0, %v93_v1  ;;  %1256 = vmatprep.mubr.msk.f32.mxu1 %vm221_vm0, %v181_v2 }
  0xcf   :  { %746 = vmatmul.mubr.f32.gmra.mrb[78].mxu0 %v92_v3  ;;  %966 = vmatmul.mubr.f32.gmra.mrb[78].mxu1 %v180_v4 }
  0xd0   :  { %1213 = vmatprep.mubr.msk.f32.mxu0 %vm221_vm0, %v95_v5  ;;  %1257 = vmatprep.mubr.msk.f32.mxu1 %vm221_vm0, %v183_v6 }
  0xd3   :  { %751 = vmatmul.mubr.f32.gmra.mrb[80].mxu0 %v94_v7  ;;  %971 = vmatmul.mubr.f32.gmra.mrb[80].mxu1 %v182_v8 }
  0xd4   :  { %1214 = vmatprep.mubr.msk.f32.mxu0 %vm221_vm0, %v97_v9  ;;  %1258 = vmatprep.mubr.msk.f32.mxu1 %vm221_vm0, %v185_v10 }
  0xd7   :  { %756 = vmatmul.mubr.f32.gmra.mrb[82].mxu0 %v96_v11  ;;  %976 = vmatmul.mubr.f32.gmra.mrb[82].mxu1 %v184_v12 }
  0xd8   :  { %1215 = vmatprep.mubr.msk.f32.mxu0 %vm221_vm0, %v99_v13  ;;  %1259 = vmatprep.mubr.msk.f32.mxu1 %vm221_vm0, %v187_v14 }
  0xdb   :  { %761 = vmatmul.mubr.f32.gmra.mrb[84].mxu0 %v98_v15  ;;  %981 = vmatmul.mubr.f32.gmra.mrb[84].mxu1 %v186_v16 }
  0xdc   :  { %1216 = vmatprep.mubr.msk.f32.mxu0 %vm221_vm0, %v101_v17  ;;  %1260 = vmatprep.mubr.msk.f32.mxu1 %vm221_vm0, %v189_v18 }
  0xdf   :  { %766 = vmatmul.mubr.f32.gmra.mrb[86].mxu0 %v100_v19  ;;  %986 = vmatmul.mubr.f32.gmra.mrb[86].mxu1 %v188_v20 }
 0x106   :  { %v552_v22 = vpop.f32.mrb[0].mxu0  ;;  %v772_v23 = vpop.f32.mrb[0].mxu1 }
 0x107   :  { %v553_v24 = vadd.f32 %v2058_v21, %v552_v22  ;;  %v773_v25 = vadd.f32 %v2058_v21, %v772_v23  ;;  %v554_v26 = vpop.f32.mrb[1].mxu0  ;;  %v774_v27 = vpop.f32.mrb[1].mxu1 }
 0x109   :  { %v991_v28 = vmax.f32 %v553_v24, 0.0  ;;  %v1035_v29 = vmax.f32 %v773_v25, 0.0 }
 0x10a   :  { %v557_v30 = vpop.f32.mrb[2].mxu0  ;;  %v777_v31 = vpop.f32.mrb[2].mxu1 }
 0x10b   :  { %1080 = vst.msk [vmem:[%s2503_s3] sm:$0xff] %vm1079_vm1, %v991_v28  ;;  %1124 = vst.msk [vmem:[%s2503_s3 + $0x160] sm:$0xff] %vm1079_vm1, %v1035_v29  ;;  %v558_v32 = vadd.f32 %v2058_v21, %v557_v30  ;;  %v778_v33 = vadd.f32 %v2058_v21, %v777_v31  ;;  %v559_v34 = vpop.f32.mrb[3].mxu0  ;;  %v779_v35 = vpop.f32.mrb[3].mxu1 }
 0x10d   :  { %v992_v36 = vmax.f32 %v558_v32, 0.0  ;;  %v1036_v37 = vmax.f32 %v778_v33, 0.0 }
 0x10e   :  { %v562_v38 = vpop.f32.mrb[4].mxu0  ;;  %v782_v39 = vpop.f32.mrb[4].mxu1 }
 0x10f   :  { %1081 = vst.msk [vmem:[%s2503_s3 + $0x8] sm:$0xff] %vm1079_vm1, %v992_v36  ;;  %1125 = vst.msk [vmem:[%s2503_s3 + $0x168] sm:$0xff] %vm1079_vm1, %v1036_v37  ;;  %v563_v40 = vadd.f32 %v2058_v21, %v562_v38  ;;  %v783_v41 = vadd.f32 %v2058_v21, %v782_v39  ;;  %v564_v42 = vpop.f32.mrb[5].mxu0  ;;  %v784_v43 = vpop.f32.mrb[5].mxu1 }
 0x111   :  { %v993_v44 = vmax.f32 %v563_v40, 0.0  ;;  %v1037_v45 = vmax.f32 %v783_v41, 0.0 }
 0x112   :  { %v567_v46 = vpop.f32.mrb[6].mxu0  ;;  %v787_v47 = vpop.f32.mrb[6].mxu1 }
 0x113   :  { %1082 = vst.msk [vmem:[%s2503_s3 + $0x10] sm:$0xff] %vm1079_vm1, %v993_v44  ;;  %1126 = vst.msk [vmem:[%s2503_s3 + $0x170] sm:$0xff] %vm1079_vm1, %v1037_v45  ;;  %v568_v48 = vadd.f32 %v2058_v21, %v567_v46  ;;  %v788_v49 = vadd.f32 %v2058_v21, %v787_v47  ;;  %v569_v50 = vpop.f32.mrb[7].mxu0  ;;  %v789_v51 = vpop.f32.mrb[7].mxu1 }
 0x115   :  { %v994_v52 = vmax.f32 %v568_v48, 0.0  ;;  %v1038_v53 = vmax.f32 %v788_v49, 0.0 }
 0x116   :  { %v572_v54 = vpop.f32.mrb[8].mxu0  ;;  %v792_v55 = vpop.f32.mrb[8].mxu1 }
 0x117   :  { %1083 = vst.msk [vmem:[%s2503_s3 + $0x18] sm:$0xff] %vm1079_vm1, %v994_v52  ;;  %1127 = vst.msk [vmem:[%s2503_s3 + $0x178] sm:$0xff] %vm1079_vm1, %v1038_v53  ;;  %v573_v56 = vadd.f32 %v2058_v21, %v572_v54  ;;  %v793_v57 = vadd.f32 %v2058_v21, %v792_v55  ;;  %v574_v58 = vpop.f32.mrb[9].mxu0  ;;  %v794_v59 = vpop.f32.mrb[9].mxu1 }
 0x119   :  { %v995_v60 = vmax.f32 %v573_v56, 0.0  ;;  %v1039_v61 = vmax.f32 %v793_v57, 0.0 }
 0x11a   :  { %v577_v62 = vpop.f32.mrb[10].mxu0  ;;  %v797_v63 = vpop.f32.mrb[10].mxu1 }
 0x11b   :  { %1084 = vst.msk [vmem:[%s2503_s3 + $0x20] sm:$0xff] %vm1079_vm1, %v995_v60  ;;  %1128 = vst.msk [vmem:[%s2503_s3 + $0x180] sm:$0xff] %vm1079_vm1, %v1039_v61  ;;  %v578_v0 = vadd.f32 %v2058_v21, %v577_v62  ;;  %v798_v1 = vadd.f32 %v2058_v21, %v797_v63  ;;  %v579_v2 = vpop.f32.mrb[11].mxu0  ;;  %v799_v3 = vpop.f32.mrb[11].mxu1 }
 0x11d   :  { %v996_v4 = vmax.f32 %v578_v0, 0.0  ;;  %v1040_v5 = vmax.f32 %v798_v1, 0.0 }
 0x11e   :  { %v582_v6 = vpop.f32.mrb[12].mxu0  ;;  %v802_v7 = vpop.f32.mrb[12].mxu1 }
 0x11f   :  { %1085 = vst.msk [vmem:[%s2503_s3 + $0x28] sm:$0xff] %vm1079_vm1, %v996_v4  ;;  %1129 = vst.msk [vmem:[%s2503_s3 + $0x188] sm:$0xff] %vm1079_vm1, %v1040_v5  ;;  %v583_v8 = vadd.f32 %v2058_v21, %v582_v6  ;;  %v803_v9 = vadd.f32 %v2058_v21, %v802_v7  ;;  %v584_v10 = vpop.f32.mrb[13].mxu0  ;;  %v804_v11 = vpop.f32.mrb[13].mxu1 }
 0x121   :  { %v997_v12 = vmax.f32 %v583_v8, 0.0  ;;  %v1041_v13 = vmax.f32 %v803_v9, 0.0 }
 0x122   :  { %v587_v14 = vpop.f32.mrb[14].mxu0  ;;  %v807_v15 = vpop.f32.mrb[14].mxu1 }
 0x123   :  { %1086 = vst.msk [vmem:[%s2503_s3 + $0x30] sm:$0xff] %vm1079_vm1, %v997_v12  ;;  %1130 = vst.msk [vmem:[%s2503_s3 + $0x190] sm:$0xff] %vm1079_vm1, %v1041_v13  ;;  %v588_v16 = vadd.f32 %v2058_v21, %v587_v14  ;;  %v808_v17 = vadd.f32 %v2058_v21, %v807_v15  ;;  %v589_v18 = vpop.f32.mrb[15].mxu0  ;;  %v809_v19 = vpop.f32.mrb[15].mxu1 }
 0x125   :  { %v998_v20 = vmax.f32 %v588_v16, 0.0  ;;  %v1042_v22 = vmax.f32 %v808_v17, 0.0 }
 0x126   :  { %v592_v23 = vpop.f32.mrb[16].mxu0  ;;  %v812_v24 = vpop.f32.mrb[16].mxu1 }
 0x127   :  { %1087 = vst.msk [vmem:[%s2503_s3 + $0x38] sm:$0xff] %vm1079_vm1, %v998_v20  ;;  %1131 = vst.msk [vmem:[%s2503_s3 + $0x198] sm:$0xff] %vm1079_vm1, %v1042_v22  ;;  %v593_v25 = vadd.f32 %v2058_v21, %v592_v23  ;;  %v813_v26 = vadd.f32 %v2058_v21, %v812_v24  ;;  %v594_v27 = vpop.f32.mrb[17].mxu0  ;;  %v814_v28 = vpop.f32.mrb[17].mxu1 }
 0x129   :  { %v999_v29 = vmax.f32 %v593_v25, 0.0  ;;  %v1043_v30 = vmax.f32 %v813_v26, 0.0 }
 0x12a   :  { %v597_v31 = vpop.f32.mrb[18].mxu0  ;;  %v817_v32 = vpop.f32.mrb[18].mxu1 }
 0x12b   :  { %1088 = vst.msk [vmem:[%s2503_s3 + $0x40] sm:$0xff] %vm1079_vm1, %v999_v29  ;;  %1132 = vst.msk [vmem:[%s2503_s3 + $0x1a0] sm:$0xff] %vm1079_vm1, %v1043_v30  ;;  %v598_v33 = vadd.f32 %v2058_v21, %v597_v31  ;;  %v818_v34 = vadd.f32 %v2058_v21, %v817_v32  ;;  %v599_v35 = vpop.f32.mrb[19].mxu0  ;;  %v819_v36 = vpop.f32.mrb[19].mxu1 }
 0x12d   :  { %v1000_v37 = vmax.f32 %v598_v33, 0.0  ;;  %v1044_v38 = vmax.f32 %v818_v34, 0.0 }
 0x12e   :  { %v602_v39 = vpop.f32.mrb[20].mxu0  ;;  %v822_v40 = vpop.f32.mrb[20].mxu1 }
 0x12f   :  { %1089 = vst.msk [vmem:[%s2503_s3 + $0x48] sm:$0xff] %vm1079_vm1, %v1000_v37  ;;  %1133 = vst.msk [vmem:[%s2503_s3 + $0x1a8] sm:$0xff] %vm1079_vm1, %v1044_v38  ;;  %v603_v41 = vadd.f32 %v2058_v21, %v602_v39  ;;  %v823_v42 = vadd.f32 %v2058_v21, %v822_v40  ;;  %v604_v43 = vpop.f32.mrb[21].mxu0  ;;  %v824_v44 = vpop.f32.mrb[21].mxu1 }
 0x131   :  { %v1001_v45 = vmax.f32 %v603_v41, 0.0  ;;  %v1045_v46 = vmax.f32 %v823_v42, 0.0 }
 0x132   :  { %v607_v47 = vpop.f32.mrb[22].mxu0  ;;  %v827_v48 = vpop.f32.mrb[22].mxu1 }
 0x133   :  { %1090 = vst.msk [vmem:[%s2503_s3 + $0x50] sm:$0xff] %vm1079_vm1, %v1001_v45  ;;  %1134 = vst.msk [vmem:[%s2503_s3 + $0x1b0] sm:$0xff] %vm1079_vm1, %v1045_v46  ;;  %v608_v49 = vadd.f32 %v2058_v21, %v607_v47  ;;  %v828_v50 = vadd.f32 %v2058_v21, %v827_v48  ;;  %v609_v51 = vpop.f32.mrb[23].mxu0  ;;  %v829_v52 = vpop.f32.mrb[23].mxu1 }
 0x135   :  { %v1002_v53 = vmax.f32 %v608_v49, 0.0  ;;  %v1046_v54 = vmax.f32 %v828_v50, 0.0 }
 0x136   :  { %v612_v55 = vpop.f32.mrb[24].mxu0  ;;  %v832_v56 = vpop.f32.mrb[24].mxu1 }
 0x137   :  { %1091 = vst.msk [vmem:[%s2503_s3 + $0x58] sm:$0xff] %vm1079_vm1, %v1002_v53  ;;  %1135 = vst.msk [vmem:[%s2503_s3 + $0x1b8] sm:$0xff] %vm1079_vm1, %v1046_v54  ;;  %v613_v57 = vadd.f32 %v2058_v21, %v612_v55  ;;  %v833_v58 = vadd.f32 %v2058_v21, %v832_v56  ;;  %v614_v59 = vpop.f32.mrb[25].mxu0  ;;  %v834_v60 = vpop.f32.mrb[25].mxu1 }
 0x139   :  { %v1003_v61 = vmax.f32 %v613_v57, 0.0  ;;  %v1047_v62 = vmax.f32 %v833_v58, 0.0 }
 0x13a   :  { %v617_v63 = vpop.f32.mrb[26].mxu0  ;;  %v837_v0 = vpop.f32.mrb[26].mxu1 }
 0x13b   :  { %1092 = vst.msk [vmem:[%s2503_s3 + $0x60] sm:$0xff] %vm1079_vm1, %v1003_v61  ;;  %1136 = vst.msk [vmem:[%s2503_s3 + $0x1c0] sm:$0xff] %vm1079_vm1, %v1047_v62  ;;  %v618_v1 = vadd.f32 %v2058_v21, %v617_v63  ;;  %v838_v2 = vadd.f32 %v2058_v21, %v837_v0  ;;  %v619_v3 = vpop.f32.mrb[27].mxu0  ;;  %v839_v4 = vpop.f32.mrb[27].mxu1 }
 0x13d   :  { %v1004_v5 = vmax.f32 %v618_v1, 0.0  ;;  %v1048_v6 = vmax.f32 %v838_v2, 0.0 }
 0x13e   :  { %v622_v7 = vpop.f32.mrb[28].mxu0  ;;  %v842_v8 = vpop.f32.mrb[28].mxu1 }
 0x13f   :  { %1093 = vst.msk [vmem:[%s2503_s3 + $0x68] sm:$0xff] %vm1079_vm1, %v1004_v5  ;;  %1137 = vst.msk [vmem:[%s2503_s3 + $0x1c8] sm:$0xff] %vm1079_vm1, %v1048_v6  ;;  %v623_v9 = vadd.f32 %v2058_v21, %v622_v7  ;;  %v843_v10 = vadd.f32 %v2058_v21, %v842_v8  ;;  %v624_v11 = vpop.f32.mrb[29].mxu0  ;;  %v844_v12 = vpop.f32.mrb[29].mxu1 }
 0x141   :  { %v1005_v13 = vmax.f32 %v623_v9, 0.0  ;;  %v1049_v14 = vmax.f32 %v843_v10, 0.0 }
 0x142   :  { %v627_v15 = vpop.f32.mrb[30].mxu0  ;;  %v847_v16 = vpop.f32.mrb[30].mxu1 }
 0x143   :  { %1094 = vst.msk [vmem:[%s2503_s3 + $0x70] sm:$0xff] %vm1079_vm1, %v1005_v13  ;;  %1138 = vst.msk [vmem:[%s2503_s3 + $0x1d0] sm:$0xff] %vm1079_vm1, %v1049_v14  ;;  %v628_v17 = vadd.f32 %v2058_v21, %v627_v15  ;;  %v848_v18 = vadd.f32 %v2058_v21, %v847_v16  ;;  %v629_v19 = vpop.f32.mrb[31].mxu0  ;;  %v849_v20 = vpop.f32.mrb[31].mxu1 }
 0x145   :  { %v1006_v22 = vmax.f32 %v628_v17, 0.0  ;;  %v1050_v23 = vmax.f32 %v848_v18, 0.0 }
 0x146   :  { %v632_v24 = vpop.f32.mrb[32].mxu0  ;;  %v852_v25 = vpop.f32.mrb[32].mxu1 }
 0x147   :  { %1095 = vst.msk [vmem:[%s2503_s3 + $0x78] sm:$0xff] %vm1079_vm1, %v1006_v22  ;;  %1139 = vst.msk [vmem:[%s2503_s3 + $0x1d8] sm:$0xff] %vm1079_vm1, %v1050_v23  ;;  %v633_v26 = vadd.f32 %v2058_v21, %v632_v24  ;;  %v853_v27 = vadd.f32 %v2058_v21, %v852_v25  ;;  %v634_v28 = vpop.f32.mrb[33].mxu0  ;;  %v854_v29 = vpop.f32.mrb[33].mxu1 }
 0x149   :  { %v1007_v30 = vmax.f32 %v633_v26, 0.0  ;;  %v1051_v31 = vmax.f32 %v853_v27, 0.0 }
 0x14a   :  { %v637_v32 = vpop.f32.mrb[34].mxu0  ;;  %v857_v33 = vpop.f32.mrb[34].mxu1 }
 0x14b   :  { %1096 = vst.msk [vmem:[%s2503_s3 + $0x80] sm:$0xff] %vm1079_vm1, %v1007_v30  ;;  %1140 = vst.msk [vmem:[%s2503_s3 + $0x1e0] sm:$0xff] %vm1079_vm1, %v1051_v31  ;;  %v638_v34 = vadd.f32 %v2058_v21, %v637_v32  ;;  %v858_v35 = vadd.f32 %v2058_v21, %v857_v33  ;;  %v639_v36 = vpop.f32.mrb[35].mxu0  ;;  %v859_v37 = vpop.f32.mrb[35].mxu1 }
 0x14d   :  { %v1008_v38 = vmax.f32 %v638_v34, 0.0  ;;  %v1052_v39 = vmax.f32 %v858_v35, 0.0 }
 0x14e   :  { %v642_v40 = vpop.f32.mrb[36].mxu0  ;;  %v862_v41 = vpop.f32.mrb[36].mxu1 }
 0x14f   :  { %1097 = vst.msk [vmem:[%s2503_s3 + $0x88] sm:$0xff] %vm1079_vm1, %v1008_v38  ;;  %1141 = vst.msk [vmem:[%s2503_s3 + $0x1e8] sm:$0xff] %vm1079_vm1, %v1052_v39  ;;  %v643_v42 = vadd.f32 %v2058_v21, %v642_v40  ;;  %v863_v43 = vadd.f32 %v2058_v21, %v862_v41  ;;  %v644_v44 = vpop.f32.mrb[37].mxu0  ;;  %v864_v45 = vpop.f32.mrb[37].mxu1 }
 0x151   :  { %v1009_v46 = vmax.f32 %v643_v42, 0.0  ;;  %v1053_v47 = vmax.f32 %v863_v43, 0.0 }
 0x152   :  { %v647_v48 = vpop.f32.mrb[38].mxu0  ;;  %v867_v49 = vpop.f32.mrb[38].mxu1 }
 0x153   :  { %1098 = vst.msk [vmem:[%s2503_s3 + $0x90] sm:$0xff] %vm1079_vm1, %v1009_v46  ;;  %1142 = vst.msk [vmem:[%s2503_s3 + $0x1f0] sm:$0xff] %vm1079_vm1, %v1053_v47  ;;  %v648_v50 = vadd.f32 %v2058_v21, %v647_v48  ;;  %v868_v51 = vadd.f32 %v2058_v21, %v867_v49  ;;  %v649_v52 = vpop.f32.mrb[39].mxu0  ;;  %v869_v53 = vpop.f32.mrb[39].mxu1 }
 0x155   :  { %v1010_v54 = vmax.f32 %v648_v50, 0.0  ;;  %v1054_v55 = vmax.f32 %v868_v51, 0.0 }
 0x156   :  { %v652_v56 = vpop.f32.mrb[40].mxu0  ;;  %v872_v57 = vpop.f32.mrb[40].mxu1 }
 0x157   :  { %1099 = vst.msk [vmem:[%s2503_s3 + $0x98] sm:$0xff] %vm1079_vm1, %v1010_v54  ;;  %1143 = vst.msk [vmem:[%s2503_s3 + $0x1f8] sm:$0xff] %vm1079_vm1, %v1054_v55  ;;  %v653_v58 = vadd.f32 %v2058_v21, %v652_v56  ;;  %v873_v59 = vadd.f32 %v2058_v21, %v872_v57  ;;  %v654_v60 = vpop.f32.mrb[41].mxu0  ;;  %v874_v61 = vpop.f32.mrb[41].mxu1 }
 0x159   :  { %v1011_v62 = vmax.f32 %v653_v58, 0.0  ;;  %v1055_v63 = vmax.f32 %v873_v59, 0.0 }
 0x15a   :  { %v657_v0 = vpop.f32.mrb[42].mxu0  ;;  %v877_v1 = vpop.f32.mrb[42].mxu1 }
 0x15b   :  { %1100 = vst.msk [vmem:[%s2503_s3 + $0xa0] sm:$0xff] %vm1079_vm1, %v1011_v62  ;;  %1144 = vst.msk [vmem:[%s2503_s3 + $0x200] sm:$0xff] %vm1079_vm1, %v1055_v63  ;;  %v658_v2 = vadd.f32 %v2058_v21, %v657_v0  ;;  %v878_v3 = vadd.f32 %v2058_v21, %v877_v1  ;;  %v659_v4 = vpop.f32.mrb[43].mxu0  ;;  %v879_v5 = vpop.f32.mrb[43].mxu1 }
 0x15d   :  { %v1012_v6 = vmax.f32 %v658_v2, 0.0  ;;  %v1056_v7 = vmax.f32 %v878_v3, 0.0 }
 0x15e   :  { %v662_v8 = vpop.f32.mrb[44].mxu0  ;;  %v882_v9 = vpop.f32.mrb[44].mxu1 }
 0x15f   :  { %1101 = vst.msk [vmem:[%s2503_s3 + $0xa8] sm:$0xff] %vm1079_vm1, %v1012_v6  ;;  %1145 = vst.msk [vmem:[%s2503_s3 + $0x208] sm:$0xff] %vm1079_vm1, %v1056_v7  ;;  %v663_v10 = vadd.f32 %v2058_v21, %v662_v8  ;;  %v883_v11 = vadd.f32 %v2058_v21, %v882_v9  ;;  %v664_v12 = vpop.f32.mrb[45].mxu0  ;;  %v884_v13 = vpop.f32.mrb[45].mxu1 }
 0x161   :  { %v1013_v14 = vmax.f32 %v663_v10, 0.0  ;;  %v1057_v15 = vmax.f32 %v883_v11, 0.0 }
 0x162   :  { %v667_v16 = vpop.f32.mrb[46].mxu0  ;;  %v887_v17 = vpop.f32.mrb[46].mxu1 }
 0x163   :  { %1102 = vst.msk [vmem:[%s2503_s3 + $0xb0] sm:$0xff] %vm1079_vm1, %v1013_v14  ;;  %1146 = vst.msk [vmem:[%s2503_s3 + $0x210] sm:$0xff] %vm1079_vm1, %v1057_v15  ;;  %v668_v18 = vadd.f32 %v2058_v21, %v667_v16  ;;  %v888_v19 = vadd.f32 %v2058_v21, %v887_v17  ;;  %v669_v20 = vpop.f32.mrb[47].mxu0  ;;  %v889_v22 = vpop.f32.mrb[47].mxu1 }
 0x165   :  { %v1014_v23 = vmax.f32 %v668_v18, 0.0  ;;  %v1058_v24 = vmax.f32 %v888_v19, 0.0 }
 0x166   :  { %v672_v25 = vpop.f32.mrb[48].mxu0  ;;  %v892_v26 = vpop.f32.mrb[48].mxu1 }
 0x167   :  { %1103 = vst.msk [vmem:[%s2503_s3 + $0xb8] sm:$0xff] %vm1079_vm1, %v1014_v23  ;;  %1147 = vst.msk [vmem:[%s2503_s3 + $0x218] sm:$0xff] %vm1079_vm1, %v1058_v24  ;;  %v673_v27 = vadd.f32 %v2058_v21, %v672_v25  ;;  %v893_v28 = vadd.f32 %v2058_v21, %v892_v26  ;;  %v674_v29 = vpop.f32.mrb[49].mxu0  ;;  %v894_v30 = vpop.f32.mrb[49].mxu1 }
 0x169   :  { %v1015_v31 = vmax.f32 %v673_v27, 0.0  ;;  %v1059_v32 = vmax.f32 %v893_v28, 0.0 }
 0x16a   :  { %v677_v33 = vpop.f32.mrb[50].mxu0  ;;  %v897_v34 = vpop.f32.mrb[50].mxu1 }
 0x16b   :  { %1104 = vst.msk [vmem:[%s2503_s3 + $0xc0] sm:$0xff] %vm1079_vm1, %v1015_v31  ;;  %1148 = vst.msk [vmem:[%s2503_s3 + $0x220] sm:$0xff] %vm1079_vm1, %v1059_v32  ;;  %v678_v35 = vadd.f32 %v2058_v21, %v677_v33  ;;  %v898_v36 = vadd.f32 %v2058_v21, %v897_v34  ;;  %v679_v37 = vpop.f32.mrb[51].mxu0  ;;  %v899_v38 = vpop.f32.mrb[51].mxu1 }
 0x16d   :  { %v1016_v39 = vmax.f32 %v678_v35, 0.0  ;;  %v1060_v40 = vmax.f32 %v898_v36, 0.0 }
 0x16e   :  { %v682_v41 = vpop.f32.mrb[52].mxu0  ;;  %v902_v42 = vpop.f32.mrb[52].mxu1 }
 0x16f   :  { %1105 = vst.msk [vmem:[%s2503_s3 + $0xc8] sm:$0xff] %vm1079_vm1, %v1016_v39  ;;  %1149 = vst.msk [vmem:[%s2503_s3 + $0x228] sm:$0xff] %vm1079_vm1, %v1060_v40  ;;  %v683_v43 = vadd.f32 %v2058_v21, %v682_v41  ;;  %v903_v44 = vadd.f32 %v2058_v21, %v902_v42  ;;  %v684_v45 = vpop.f32.mrb[53].mxu0  ;;  %v904_v46 = vpop.f32.mrb[53].mxu1 }
 0x171   :  { %v1017_v47 = vmax.f32 %v683_v43, 0.0  ;;  %v1061_v48 = vmax.f32 %v903_v44, 0.0 }
 0x172   :  { %v687_v49 = vpop.f32.mrb[54].mxu0  ;;  %v907_v50 = vpop.f32.mrb[54].mxu1 }
 0x173   :  { %1106 = vst.msk [vmem:[%s2503_s3 + $0xd0] sm:$0xff] %vm1079_vm1, %v1017_v47  ;;  %1150 = vst.msk [vmem:[%s2503_s3 + $0x230] sm:$0xff] %vm1079_vm1, %v1061_v48  ;;  %v688_v51 = vadd.f32 %v2058_v21, %v687_v49  ;;  %v908_v52 = vadd.f32 %v2058_v21, %v907_v50  ;;  %v689_v53 = vpop.f32.mrb[55].mxu0  ;;  %v909_v54 = vpop.f32.mrb[55].mxu1 }
 0x175   :  { %v1018_v55 = vmax.f32 %v688_v51, 0.0  ;;  %v1062_v56 = vmax.f32 %v908_v52, 0.0 }
 0x176   :  { %v692_v57 = vpop.f32.mrb[56].mxu0  ;;  %v912_v58 = vpop.f32.mrb[56].mxu1 }
 0x177   :  { %1107 = vst.msk [vmem:[%s2503_s3 + $0xd8] sm:$0xff] %vm1079_vm1, %v1018_v55  ;;  %1151 = vst.msk [vmem:[%s2503_s3 + $0x238] sm:$0xff] %vm1079_vm1, %v1062_v56  ;;  %v693_v59 = vadd.f32 %v2058_v21, %v692_v57  ;;  %v913_v60 = vadd.f32 %v2058_v21, %v912_v58  ;;  %v694_v61 = vpop.f32.mrb[57].mxu0  ;;  %v914_v62 = vpop.f32.mrb[57].mxu1 }
 0x179   :  { %v1019_v63 = vmax.f32 %v693_v59, 0.0  ;;  %v1063_v0 = vmax.f32 %v913_v60, 0.0 }
 0x17a   :  { %v697_v1 = vpop.f32.mrb[58].mxu0  ;;  %v917_v2 = vpop.f32.mrb[58].mxu1 }
 0x17b   :  { %1108 = vst.msk [vmem:[%s2503_s3 + $0xe0] sm:$0xff] %vm1079_vm1, %v1019_v63  ;;  %1152 = vst.msk [vmem:[%s2503_s3 + $0x240] sm:$0xff] %vm1079_vm1, %v1063_v0  ;;  %v698_v3 = vadd.f32 %v2058_v21, %v697_v1  ;;  %v918_v4 = vadd.f32 %v2058_v21, %v917_v2  ;;  %v699_v5 = vpop.f32.mrb[59].mxu0  ;;  %v919_v6 = vpop.f32.mrb[59].mxu1 }
 0x17d   :  { %v1020_v7 = vmax.f32 %v698_v3, 0.0  ;;  %v1064_v8 = vmax.f32 %v918_v4, 0.0 }
 0x17e   :  { %v702_v9 = vpop.f32.mrb[60].mxu0  ;;  %v922_v10 = vpop.f32.mrb[60].mxu1 }
 0x17f   :  { %1109 = vst.msk [vmem:[%s2503_s3 + $0xe8] sm:$0xff] %vm1079_vm1, %v1020_v7  ;;  %1153 = vst.msk [vmem:[%s2503_s3 + $0x248] sm:$0xff] %vm1079_vm1, %v1064_v8  ;;  %v703_v11 = vadd.f32 %v2058_v21, %v702_v9  ;;  %v923_v12 = vadd.f32 %v2058_v21, %v922_v10  ;;  %v704_v13 = vpop.f32.mrb[61].mxu0  ;;  %v924_v14 = vpop.f32.mrb[61].mxu1 }
 0x181   :  { %v1021_v15 = vmax.f32 %v703_v11, 0.0  ;;  %v1065_v16 = vmax.f32 %v923_v12, 0.0 }
 0x182   :  { %v707_v17 = vpop.f32.mrb[62].mxu0  ;;  %v927_v18 = vpop.f32.mrb[62].mxu1 }
 0x183   :  { %1110 = vst.msk [vmem:[%s2503_s3 + $0xf0] sm:$0xff] %vm1079_vm1, %v1021_v15  ;;  %1154 = vst.msk [vmem:[%s2503_s3 + $0x250] sm:$0xff] %vm1079_vm1, %v1065_v16  ;;  %v708_v19 = vadd.f32 %v2058_v21, %v707_v17  ;;  %v928_v20 = vadd.f32 %v2058_v21, %v927_v18  ;;  %v709_v22 = vpop.f32.mrb[63].mxu0  ;;  %v929_v23 = vpop.f32.mrb[63].mxu1 }
 0x185   :  { %v1022_v24 = vmax.f32 %v708_v19, 0.0  ;;  %v1066_v25 = vmax.f32 %v928_v20, 0.0 }
 0x186   :  { %v712_v26 = vpop.f32.mrb[64].mxu0  ;;  %v932_v27 = vpop.f32.mrb[64].mxu1 }
 0x187   :  { %1111 = vst.msk [vmem:[%s2503_s3 + $0xf8] sm:$0xff] %vm1079_vm1, %v1022_v24  ;;  %1155 = vst.msk [vmem:[%s2503_s3 + $0x258] sm:$0xff] %vm1079_vm1, %v1066_v25  ;;  %v713_v28 = vadd.f32 %v2058_v21, %v712_v26  ;;  %v933_v29 = vadd.f32 %v2058_v21, %v932_v27  ;;  %v714_v30 = vpop.f32.mrb[65].mxu0  ;;  %v934_v31 = vpop.f32.mrb[65].mxu1 }
 0x189   :  { %v1023_v32 = vmax.f32 %v713_v28, 0.0  ;;  %v1067_v33 = vmax.f32 %v933_v29, 0.0 }
 0x18a   :  { %v717_v34 = vpop.f32.mrb[66].mxu0  ;;  %v937_v35 = vpop.f32.mrb[66].mxu1 }
 0x18b   :  { %1112 = vst.msk [vmem:[%s2503_s3 + $0x100] sm:$0xff] %vm1079_vm1, %v1023_v32  ;;  %1156 = vst.msk [vmem:[%s2503_s3 + $0x260] sm:$0xff] %vm1079_vm1, %v1067_v33  ;;  %v718_v36 = vadd.f32 %v2058_v21, %v717_v34  ;;  %v938_v37 = vadd.f32 %v2058_v21, %v937_v35  ;;  %v719_v38 = vpop.f32.mrb[67].mxu0  ;;  %v939_v39 = vpop.f32.mrb[67].mxu1 }
 0x18d   :  { %v1024_v40 = vmax.f32 %v718_v36, 0.0  ;;  %v1068_v41 = vmax.f32 %v938_v37, 0.0 }
 0x18e   :  { %v722_v42 = vpop.f32.mrb[68].mxu0  ;;  %v942_v43 = vpop.f32.mrb[68].mxu1 }
 0x18f   :  { %1113 = vst.msk [vmem:[%s2503_s3 + $0x108] sm:$0xff] %vm1079_vm1, %v1024_v40  ;;  %1157 = vst.msk [vmem:[%s2503_s3 + $0x268] sm:$0xff] %vm1079_vm1, %v1068_v41  ;;  %v723_v44 = vadd.f32 %v2058_v21, %v722_v42  ;;  %v943_v45 = vadd.f32 %v2058_v21, %v942_v43  ;;  %v724_v46 = vpop.f32.mrb[69].mxu0  ;;  %v944_v47 = vpop.f32.mrb[69].mxu1 }
 0x191   :  { %v1025_v48 = vmax.f32 %v723_v44, 0.0  ;;  %v1069_v49 = vmax.f32 %v943_v45, 0.0 }
 0x192   :  { %v727_v50 = vpop.f32.mrb[70].mxu0  ;;  %v947_v51 = vpop.f32.mrb[70].mxu1 }
 0x193   :  { %1114 = vst.msk [vmem:[%s2503_s3 + $0x110] sm:$0xff] %vm1079_vm1, %v1025_v48  ;;  %1158 = vst.msk [vmem:[%s2503_s3 + $0x270] sm:$0xff] %vm1079_vm1, %v1069_v49  ;;  %v728_v52 = vadd.f32 %v2058_v21, %v727_v50  ;;  %v948_v53 = vadd.f32 %v2058_v21, %v947_v51  ;;  %v729_v54 = vpop.f32.mrb[71].mxu0  ;;  %v949_v55 = vpop.f32.mrb[71].mxu1 }
 0x195   :  { %v1026_v56 = vmax.f32 %v728_v52, 0.0  ;;  %v1070_v57 = vmax.f32 %v948_v53, 0.0 }
 0x196   :  { %v732_v58 = vpop.f32.mrb[72].mxu0  ;;  %v952_v59 = vpop.f32.mrb[72].mxu1 }
 0x197   :  { %1115 = vst.msk [vmem:[%s2503_s3 + $0x118] sm:$0xff] %vm1079_vm1, %v1026_v56  ;;  %1159 = vst.msk [vmem:[%s2503_s3 + $0x278] sm:$0xff] %vm1079_vm1, %v1070_v57  ;;  %v733_v60 = vadd.f32 %v2058_v21, %v732_v58  ;;  %v953_v61 = vadd.f32 %v2058_v21, %v952_v59  ;;  %v734_v62 = vpop.f32.mrb[73].mxu0  ;;  %v954_v63 = vpop.f32.mrb[73].mxu1 }
 0x199   :  { %v1027_v0 = vmax.f32 %v733_v60, 0.0  ;;  %v1071_v1 = vmax.f32 %v953_v61, 0.0 }
 0x19a   :  { %v737_v2 = vpop.f32.mrb[74].mxu0  ;;  %v957_v3 = vpop.f32.mrb[74].mxu1 }
 0x19b   :  { %1116 = vst.msk [vmem:[%s2503_s3 + $0x120] sm:$0xff] %vm1079_vm1, %v1027_v0  ;;  %1160 = vst.msk [vmem:[%s2503_s3 + $0x280] sm:$0xff] %vm1079_vm1, %v1071_v1  ;;  %v738_v4 = vadd.f32 %v2058_v21, %v737_v2  ;;  %v958_v5 = vadd.f32 %v2058_v21, %v957_v3  ;;  %v739_v6 = vpop.f32.mrb[75].mxu0  ;;  %v959_v7 = vpop.f32.mrb[75].mxu1 }
 0x19d   :  { %v1028_v8 = vmax.f32 %v738_v4, 0.0  ;;  %v1072_v9 = vmax.f32 %v958_v5, 0.0 }
 0x19e   :  { %v742_v10 = vpop.f32.mrb[76].mxu0  ;;  %v962_v11 = vpop.f32.mrb[76].mxu1 }
 0x19f   :  { %1117 = vst.msk [vmem:[%s2503_s3 + $0x128] sm:$0xff] %vm1079_vm1, %v1028_v8  ;;  %1161 = vst.msk [vmem:[%s2503_s3 + $0x288] sm:$0xff] %vm1079_vm1, %v1072_v9  ;;  %v743_v12 = vadd.f32 %v2058_v21, %v742_v10  ;;  %v963_v13 = vadd.f32 %v2058_v21, %v962_v11  ;;  %v744_v14 = vpop.f32.mrb[77].mxu0  ;;  %v964_v15 = vpop.f32.mrb[77].mxu1 }
 0x1a1   :  { %v1029_v16 = vmax.f32 %v743_v12, 0.0  ;;  %v1073_v17 = vmax.f32 %v963_v13, 0.0 }
 0x1a2   :  { %v747_v18 = vpop.f32.mrb[78].mxu0  ;;  %v967_v19 = vpop.f32.mrb[78].mxu1 }
 0x1a3   :  { %1118 = vst.msk [vmem:[%s2503_s3 + $0x130] sm:$0xff] %vm1079_vm1, %v1029_v16  ;;  %1162 = vst.msk [vmem:[%s2503_s3 + $0x290] sm:$0xff] %vm1079_vm1, %v1073_v17  ;;  %v748_v20 = vadd.f32 %v2058_v21, %v747_v18  ;;  %v968_v22 = vadd.f32 %v2058_v21, %v967_v19  ;;  %v749_v23 = vpop.f32.mrb[79].mxu0  ;;  %v969_v24 = vpop.f32.mrb[79].mxu1 }
 0x1a5   :  { %v1030_v25 = vmax.f32 %v748_v20, 0.0  ;;  %v1074_v26 = vmax.f32 %v968_v22, 0.0 }
 0x1a6   :  { %v752_v27 = vpop.f32.mrb[80].mxu0  ;;  %v972_v28 = vpop.f32.mrb[80].mxu1 }
 0x1a7   :  { %1119 = vst.msk [vmem:[%s2503_s3 + $0x138] sm:$0xff] %vm1079_vm1, %v1030_v25  ;;  %1163 = vst.msk [vmem:[%s2503_s3 + $0x298] sm:$0xff] %vm1079_vm1, %v1074_v26  ;;  %v753_v29 = vadd.f32 %v2058_v21, %v752_v27  ;;  %v973_v30 = vadd.f32 %v2058_v21, %v972_v28  ;;  %v754_v31 = vpop.f32.mrb[81].mxu0  ;;  %v974_v32 = vpop.f32.mrb[81].mxu1 }
 0x1a9   :  { %v1031_v33 = vmax.f32 %v753_v29, 0.0  ;;  %v1075_v34 = vmax.f32 %v973_v30, 0.0 }
 0x1aa   :  { %v757_v35 = vpop.f32.mrb[82].mxu0  ;;  %v977_v36 = vpop.f32.mrb[82].mxu1 }
 0x1ab   :  { %1120 = vst.msk [vmem:[%s2503_s3 + $0x140] sm:$0xff] %vm1079_vm1, %v1031_v33  ;;  %1164 = vst.msk [vmem:[%s2503_s3 + $0x2a0] sm:$0xff] %vm1079_vm1, %v1075_v34  ;;  %v758_v37 = vadd.f32 %v2058_v21, %v757_v35  ;;  %v978_v38 = vadd.f32 %v2058_v21, %v977_v36  ;;  %v759_v39 = vpop.f32.mrb[83].mxu0  ;;  %v979_v40 = vpop.f32.mrb[83].mxu1 }
 0x1ad   :  { %v1032_v41 = vmax.f32 %v758_v37, 0.0  ;;  %v1076_v42 = vmax.f32 %v978_v38, 0.0 }
 0x1ae   :  { %v762_v43 = vpop.f32.mrb[84].mxu0  ;;  %v982_v44 = vpop.f32.mrb[84].mxu1 }
 0x1af   :  { %1121 = vst.msk [vmem:[%s2503_s3 + $0x148] sm:$0xff] %vm1079_vm1, %v1032_v41  ;;  %1165 = vst.msk [vmem:[%s2503_s3 + $0x2a8] sm:$0xff] %vm1079_vm1, %v1076_v42  ;;  %v763_v45 = vadd.f32 %v2058_v21, %v762_v43  ;;  %v983_v46 = vadd.f32 %v2058_v21, %v982_v44  ;;  %v764_v47 = vpop.f32.mrb[85].mxu0  ;;  %v984_v48 = vpop.f32.mrb[85].mxu1 }
 0x1b1   :  { %v1033_v49 = vmax.f32 %v763_v45, 0.0  ;;  %v1077_v50 = vmax.f32 %v983_v46, 0.0 }
 0x1b2   :  { %v767_v51 = vpop.f32.mrb[86].mxu0  ;;  %v987_v52 = vpop.f32.mrb[86].mxu1 }
 0x1b3   :  { %1122 = vst.msk [vmem:[%s2503_s3 + $0x150] sm:$0xff] %vm1079_vm1, %v1033_v49  ;;  %1166 = vst.msk [vmem:[%s2503_s3 + $0x2b0] sm:$0xff] %vm1079_vm1, %v1077_v50  ;;  %v768_v53 = vadd.f32 %v2058_v21, %v767_v51  ;;  %v988_v54 = vadd.f32 %v2058_v21, %v987_v52  ;;  %v769_v55 = vpop.f32.mrb[87].mxu0  ;;  %v989_v56 = vpop.f32.mrb[87].mxu1 }
 0x1b5   :  { %v1034_v57 = vmax.f32 %v768_v53, 0.0  ;;  %v1078_v58 = vmax.f32 %v988_v54, 0.0 }
 0x1b7   :  { %1123 = vst.msk [vmem:[%s2503_s3 + $0x158] sm:$0xff] %vm1079_vm1, %v1034_v57  ;;  %1167 = vst.msk [vmem:[%s2503_s3 + $0x2b8] sm:$0xff] %vm1079_vm1, %v1078_v58 }

// kernel: soft_q_forward.5
= control target key start
LH: loop header
LB: loop body
LE: loop exit
PB: predicated region body
PF: predicated region fallthrough
CT: control target
= control target key end

     0   :  { %v643_v0 = vmov 0.0|0.0   ;;  %vm485_vm0 = vcmask 523264   ;;  %vm503_vm1 = vcmask 519168   ;;  %s1198_s1 = inlined_call_operand.vmem [shape: f32[512,64], index: 1, kind: input, shape index: {}]   ;;  %s1199_s0 = inlined_call_operand.vmem [shape: f32[140,512], index: 0, kind: input, shape index: {}]   ;;  %s1200_s2 = inlined_call_operand.vmem [shape: f32[1,64], index: 2, kind: input, shape index: {}]   ;;  %s1201_s3 = inlined_call_operand.vmem [shape: f32[140,64], index: 3, kind: output, shape index: {}]  }
   0x1   :  { %510 = vmatprep.subr.bf16.mxu1 %v643_v0  ;;  %v86_v1 = vld [vmem:[%s1198_s1] sm:$0xff]  ;;  %v87_v2 = vld [vmem:[%s1198_s1 + $0x8] sm:$0xff]  ;;  %558 = vmatprep.subr.bf16.mxu0 %v643_v0  ;;  %v88_v6 = vld [vmem:[%s1198_s1 + $0x10] sm:$0xff] }
   0x2   :  { %v118_v3 = vld [vmem:[%s1198_s1 + $0x100] sm:$0xff]  ;;  %v511_v4 = vpack.c.bf16 %v87_v2, %v86_v1  ;;  %v119_v5 = vld [vmem:[%s1198_s1 + $0x108] sm:$0xff]  ;;  %v89_v7 = vld [vmem:[%s1198_s1 + $0x18] sm:$0xff] }
   0x3   :  { %v559_v8 = vpack.c.bf16 %v119_v5, %v118_v3  ;;  %v120_v9 = vld [vmem:[%s1198_s1 + $0x110] sm:$0xff]  ;;  %v121_v10 = vld [vmem:[%s1198_s1 + $0x118] sm:$0xff]  ;;  %v514_v11 = vpack.c.bf16 %v89_v7, %v88_v6  ;;  %v90_v13 = vld [vmem:[%s1198_s1 + $0x20] sm:$0xff] }
   0x4   :  { %512 = vmatpush1.bf16.msra.mxu1 %v511_v4  ;;  %v562_v12 = vpack.c.bf16 %v121_v10, %v120_v9  ;;  %v91_v14 = vld [vmem:[%s1198_s1 + $0x28] sm:$0xff]  ;;  %v122_v15 = vld [vmem:[%s1198_s1 + $0x120] sm:$0xff]  ;;  %v92_v19 = vld [vmem:[%s1198_s1 + $0x30] sm:$0xff] }
   0x5   :  { %560 = vmatpush1.bf16.msra.mxu0 %v559_v8  ;;  %513 = vmatprep.subr.bf16.mxu1 %v643_v0  ;;  %v123_v16 = vld [vmem:[%s1198_s1 + $0x128] sm:$0xff]  ;;  %v517_v17 = vpack.c.bf16 %v91_v14, %v90_v13  ;;  %v93_v20 = vld [vmem:[%s1198_s1 + $0x38] sm:$0xff]  ;;  %v124_v21 = vld [vmem:[%s1198_s1 + $0x130] sm:$0xff] }
   0x6   :  { %561 = vmatprep.subr.bf16.mxu0 %v643_v0  ;;  %v565_v18 = vpack.c.bf16 %v123_v16, %v122_v15  ;;  %v125_v22 = vld [vmem:[%s1198_s1 + $0x138] sm:$0xff]  ;;  %v520_v23 = vpack.c.bf16 %v93_v20, %v92_v19  ;;  %v94_v25 = vld [vmem:[%s1198_s1 + $0x40] sm:$0xff]  ;;  %v95_v26 = vld [vmem:[%s1198_s1 + $0x48] sm:$0xff] }
   0x7   :  { %v568_v24 = vpack.c.bf16 %v125_v22, %v124_v21  ;;  %v126_v27 = vld [vmem:[%s1198_s1 + $0x140] sm:$0xff]  ;;  %v127_v28 = vld [vmem:[%s1198_s1 + $0x148] sm:$0xff]  ;;  %v523_v29 = vpack.c.bf16 %v95_v26, %v94_v25  ;;  %v96_v31 = vld [vmem:[%s1198_s1 + $0x50] sm:$0xff] }
   0x8   :  { %515 = vmatpush1.bf16.msra.mxu1 %v514_v11  ;;  %v571_v30 = vpack.c.bf16 %v127_v28, %v126_v27  ;;  %v97_v32 = vld [vmem:[%s1198_s1 + $0x58] sm:$0xff]  ;;  %v128_v33 = vld [vmem:[%s1198_s1 + $0x150] sm:$0xff]  ;;  %v98_v37 = vld [vmem:[%s1198_s1 + $0x60] sm:$0xff] }
   0x9   :  { %563 = vmatpush1.bf16.msra.mxu0 %v562_v12  ;;  %516 = vmatprep.subr.bf16.mxu1 %v643_v0  ;;  %v129_v34 = vld [vmem:[%s1198_s1 + $0x158] sm:$0xff]  ;;  %v526_v35 = vpack.c.bf16 %v97_v32, %v96_v31  ;;  %v99_v38 = vld [vmem:[%s1198_s1 + $0x68] sm:$0xff]  ;;  %v130_v39 = vld [vmem:[%s1198_s1 + $0x160] sm:$0xff] }
   0xa   :  { %564 = vmatprep.subr.bf16.mxu0 %v643_v0  ;;  %v574_v36 = vpack.c.bf16 %v129_v34, %v128_v33  ;;  %v131_v40 = vld [vmem:[%s1198_s1 + $0x168] sm:$0xff]  ;;  %v17_v42 = vld [vmem:[%s1199_s0 + $0x18] sm:$0xff]  ;;  %v529_v43 = vpack.c.bf16 %v99_v38, %v98_v37  ;;  %v100_v45 = vld [vmem:[%s1198_s1 + $0x70] sm:$0xff] }
   0xb   :  { %v15_v41 = vld [vmem:[%s1199_s0 + $0x8] sm:$0xff]  ;;  %376 = vmatprep.mubr.f32.mxu0 %v17_v42  ;;  %v577_v44 = vpack.c.bf16 %v131_v40, %v130_v39  ;;  %v101_v46 = vld [vmem:[%s1198_s1 + $0x78] sm:$0xff]  ;;  %v132_v47 = vld [vmem:[%s1198_s1 + $0x170] sm:$0xff] }
   0xc   :  { %518 = vmatpush1.bf16.msra.mxu1 %v517_v17  ;;  %221 = vmatprep.mubr.f32.mxu1 %v15_v41  ;;  %v133_v48 = vld [vmem:[%s1198_s1 + $0x178] sm:$0xff]  ;;  %v532_v49 = vpack.c.bf16 %v101_v46, %v100_v45  ;;  %v102_v51 = vld [vmem:[%s1198_s1 + $0x80] sm:$0xff]  ;;  %v103_v52 = vld [vmem:[%s1198_s1 + $0x88] sm:$0xff] }
   0xd   :  { %566 = vmatpush1.bf16.msra.mxu0 %v565_v18  ;;  %519 = vmatprep.subr.bf16.mxu1 %v643_v0  ;;  %v580_v50 = vpack.c.bf16 %v133_v48, %v132_v47  ;;  %v134_v53 = vld [vmem:[%s1198_s1 + $0x180] sm:$0xff]  ;;  %v135_v54 = vld [vmem:[%s1198_s1 + $0x188] sm:$0xff]  ;;  %v535_v55 = vpack.c.bf16 %v103_v52, %v102_v51  ;;  %v104_v57 = vld [vmem:[%s1198_s1 + $0x90] sm:$0xff] }
   0xe   :  { %567 = vmatprep.subr.bf16.mxu0 %v643_v0  ;;  %v583_v56 = vpack.c.bf16 %v135_v54, %v134_v53  ;;  %v105_v58 = vld [vmem:[%s1198_s1 + $0x98] sm:$0xff]  ;;  %v136_v59 = vld [vmem:[%s1198_s1 + $0x190] sm:$0xff]  ;;  %v106_v63 = vld [vmem:[%s1198_s1 + $0xa0] sm:$0xff] }
   0xf   :  { %v137_v60 = vld [vmem:[%s1198_s1 + $0x198] sm:$0xff]  ;;  %v538_v61 = vpack.c.bf16 %v105_v58, %v104_v57  ;;  %v107_v1 = vld [vmem:[%s1198_s1 + $0xa8] sm:$0xff]  ;;  %v138_v2 = vld [vmem:[%s1198_s1 + $0x1a0] sm:$0xff] }
  0x10   :  { %521 = vmatpush1.bf16.msra.mxu1 %v520_v23  ;;  %v586_v62 = vpack.c.bf16 %v137_v60, %v136_v59  ;;  %v139_v3 = vld [vmem:[%s1198_s1 + $0x1a8] sm:$0xff]  ;;  %v541_v4 = vpack.c.bf16 %v107_v1, %v106_v63  ;;  %v108_v6 = vld [vmem:[%s1198_s1 + $0xb0] sm:$0xff]  ;;  %v109_v7 = vld [vmem:[%s1198_s1 + $0xb8] sm:$0xff] }
  0x11   :  { %569 = vmatpush1.bf16.msra.mxu0 %v568_v24  ;;  %522 = vmatprep.subr.bf16.mxu1 %v643_v0  ;;  %v589_v5 = vpack.c.bf16 %v139_v3, %v138_v2  ;;  %v140_v8 = vld [vmem:[%s1198_s1 + $0x1b0] sm:$0xff]  ;;  %v141_v9 = vld [vmem:[%s1198_s1 + $0x1b8] sm:$0xff]  ;;  %v544_v10 = vpack.c.bf16 %v109_v7, %v108_v6  ;;  %v110_v12 = vld [vmem:[%s1198_s1 + $0xc0] sm:$0xff] }
  0x12   :  { %570 = vmatprep.subr.bf16.mxu0 %v643_v0  ;;  %v592_v11 = vpack.c.bf16 %v141_v9, %v140_v8  ;;  %v111_v13 = vld [vmem:[%s1198_s1 + $0xc8] sm:$0xff]  ;;  %v142_v14 = vld [vmem:[%s1198_s1 + $0x1c0] sm:$0xff]  ;;  %v112_v18 = vld [vmem:[%s1198_s1 + $0xd0] sm:$0xff] }
  0x13   :  { %v143_v15 = vld [vmem:[%s1198_s1 + $0x1c8] sm:$0xff]  ;;  %v547_v16 = vpack.c.bf16 %v111_v13, %v110_v12  ;;  %v113_v19 = vld [vmem:[%s1198_s1 + $0xd8] sm:$0xff]  ;;  %v144_v20 = vld [vmem:[%s1198_s1 + $0x1d0] sm:$0xff] }
  0x14   :  { %524 = vmatpush1.bf16.msra.mxu1 %v523_v29  ;;  %v595_v17 = vpack.c.bf16 %v143_v15, %v142_v14  ;;  %v145_v21 = vld [vmem:[%s1198_s1 + $0x1d8] sm:$0xff]  ;;  %v550_v22 = vpack.c.bf16 %v113_v19, %v112_v18  ;;  %v114_v24 = vld [vmem:[%s1198_s1 + $0xe0] sm:$0xff]  ;;  %v115_v25 = vld [vmem:[%s1198_s1 + $0xe8] sm:$0xff] }
  0x15   :  { %572 = vmatpush1.bf16.msra.mxu0 %v571_v30  ;;  %525 = vmatprep.subr.bf16.mxu1 %v643_v0  ;;  %v598_v23 = vpack.c.bf16 %v145_v21, %v144_v20  ;;  %v146_v26 = vld [vmem:[%s1198_s1 + $0x1e0] sm:$0xff]  ;;  %v147_v27 = vld [vmem:[%s1198_s1 + $0x1e8] sm:$0xff]  ;;  %v553_v28 = vpack.c.bf16 %v115_v25, %v114_v24  ;;  %v116_v30 = vld [vmem:[%s1198_s1 + $0xf0] sm:$0xff] }
  0x16   :  { %573 = vmatprep.subr.bf16.mxu0 %v643_v0  ;;  %v601_v29 = vpack.c.bf16 %v147_v27, %v146_v26  ;;  %v117_v31 = vld [vmem:[%s1198_s1 + $0xf8] sm:$0xff]  ;;  %v148_v32 = vld [vmem:[%s1198_s1 + $0x1f0] sm:$0xff]  ;;  %v19_v38 = vld [vmem:[%s1199_s0 + $0x28] sm:$0xff] }
  0x17   :  { %v149_v33 = vld [vmem:[%s1198_s1 + $0x1f8] sm:$0xff]  ;;  %v556_v34 = vpack.c.bf16 %v117_v31, %v116_v30  ;;  %v16_v37 = vld [vmem:[%s1199_s0 + $0x10] sm:$0xff]  ;;  %v23_v41 = vld [vmem:[%s1199_s0 + $0x48] sm:$0xff] }
  0x18   :  { %527 = vmatpush1.bf16.msra.mxu1 %v526_v35  ;;  %v604_v35 = vpack.c.bf16 %v149_v33, %v148_v32  ;;  %v21_v39 = vld [vmem:[%s1199_s0 + $0x38] sm:$0xff]  ;;  %v20_v40 = vld [vmem:[%s1199_s0 + $0x30] sm:$0xff]  ;;  %v27_v45 = vld [vmem:[%s1199_s0 + $0x68] sm:$0xff] }
  0x19   :  { %575 = vmatpush1.bf16.msra.mxu0 %v574_v36  ;;  %528 = vmatprep.subr.bf16.mxu1 %v643_v0  ;;  %v14_v36 = vld [vmem:[%s1199_s0] sm:$0xff]  ;;  %v25_v42 = vld [vmem:[%s1199_s0 + $0x58] sm:$0xff]  ;;  %v28_v48 = vld [vmem:[%s1199_s0 + $0x70] sm:$0xff] }
  0x1a   :  { %576 = vmatprep.subr.bf16.mxu0 %v643_v0  ;;  %v29_v46 = vld [vmem:[%s1199_s0 + $0x78] sm:$0xff]  ;;  %v26_v47 = vld [vmem:[%s1199_s0 + $0x60] sm:$0xff]  ;;  %v32_v52 = vld [vmem:[%s1199_s0 + $0x90] sm:$0xff] }
  0x1b   :  { %v30_v51 = vld [vmem:[%s1199_s0 + $0x80] sm:$0xff]  ;;  %v35_v53 = vld [vmem:[%s1199_s0 + $0xa8] sm:$0xff]  ;;  %v37_v54 = vld [vmem:[%s1199_s0 + $0xb8] sm:$0xff] }
  0x1c   :  { %530 = vmatpush1.bf16.msra.mxu1 %v529_v43  ;;  %v22_v43 = vld [vmem:[%s1199_s0 + $0x40] sm:$0xff]  ;;  %v39_v57 = vld [vmem:[%s1199_s0 + $0xc8] sm:$0xff]  ;;  %v41_v58 = vld [vmem:[%s1199_s0 + $0xd8] sm:$0xff] }
  0x1d   :  { %578 = vmatpush1.bf16.msra.mxu0 %v577_v44  ;;  %531 = vmatprep.subr.bf16.mxu1 %v643_v0  ;;  %v24_v44 = vld [vmem:[%s1199_s0 + $0x50] sm:$0xff]  ;;  %v38_v59 = vld [vmem:[%s1199_s0 + $0xc0] sm:$0xff]  ;;  %v47_v2 = vld [vmem:[%s1199_s0 + $0x108] sm:$0xff] }
  0x1e   :  { %579 = vmatprep.subr.bf16.mxu0 %v643_v0  ;;  %v40_v60 = vld [vmem:[%s1199_s0 + $0xd0] sm:$0xff]  ;;  %v42_v63 = vld [vmem:[%s1199_s0 + $0xe0] sm:$0xff]  ;;  %v49_v3 = vld [vmem:[%s1199_s0 + $0x118] sm:$0xff] }
  0x1f   :  { %v44_v1 = vld [vmem:[%s1199_s0 + $0xf0] sm:$0xff]  ;;  %v51_v6 = vld [vmem:[%s1199_s0 + $0x128] sm:$0xff]  ;;  %v53_v7 = vld [vmem:[%s1199_s0 + $0x138] sm:$0xff] }
  0x20   :  { %533 = vmatpush1.bf16.msra.mxu1 %v532_v49  ;;  %v31_v49 = vld [vmem:[%s1199_s0 + $0x88] sm:$0xff]  ;;  %v50_v8 = vld [vmem:[%s1199_s0 + $0x120] sm:$0xff]  ;;  %v52_v9 = vld [vmem:[%s1199_s0 + $0x130] sm:$0xff] }
  0x21   :  { %581 = vmatpush1.bf16.msra.mxu0 %v580_v50  ;;  %534 = vmatprep.subr.bf16.mxu1 %v643_v0  ;;  %v33_v50 = vld [vmem:[%s1199_s0 + $0x98] sm:$0xff]  ;;  %v54_v12 = vld [vmem:[%s1199_s0 + $0x140] sm:$0xff]  ;;  %v56_v13 = vld [vmem:[%s1199_s0 + $0x150] sm:$0xff] }
  0x22   :  { %582 = vmatprep.subr.bf16.mxu0 %v643_v0  ;;  %v59_v14 = vld [vmem:[%s1199_s0 + $0x168] sm:$0xff]  ;;  %v61_v15 = vld [vmem:[%s1199_s0 + $0x178] sm:$0xff]  ;;  %v62_v20 = vld [vmem:[%s1199_s0 + $0x180] sm:$0xff] }
  0x23   :  { %v63_v18 = vld [vmem:[%s1199_s0 + $0x188] sm:$0xff]  ;;  %v65_v19 = vld [vmem:[%s1199_s0 + $0x198] sm:$0xff]  ;;  %v64_v21 = vld [vmem:[%s1199_s0 + $0x190] sm:$0xff] }
  0x24   :  { %536 = vmatpush1.bf16.msra.mxu1 %v535_v55  ;;  %v34_v55 = vld [vmem:[%s1199_s0 + $0xa0] sm:$0xff]  ;;  %v68_v25 = vld [vmem:[%s1199_s0 + $0x1b0] sm:$0xff]  ;;  %v71_v26 = vld [vmem:[%s1199_s0 + $0x1c8] sm:$0xff] }
  0x25   :  { %584 = vmatpush1.bf16.msra.mxu0 %v583_v56  ;;  %537 = vmatprep.subr.bf16.mxu1 %v643_v0  ;;  %v36_v56 = vld [vmem:[%s1199_s0 + $0xb0] sm:$0xff]  ;;  %v66_v24 = vld [vmem:[%s1199_s0 + $0x1a0] sm:$0xff]  ;;  %v73_v27 = vld [vmem:[%s1199_s0 + $0x1d8] sm:$0xff] }
  0x26   :  { %585 = vmatprep.subr.bf16.mxu0 %v643_v0  ;;  %v75_v30 = vld [vmem:[%s1199_s0 + $0x1e8] sm:$0xff]  ;;  %v77_v31 = vld [vmem:[%s1199_s0 + $0x1f8] sm:$0xff]  ;;  %v74_v32 = vld [vmem:[%s1199_s0 + $0x1e0] sm:$0xff] }
  0x27   :  { %v76_v33 = vld [vmem:[%s1199_s0 + $0x1f0] sm:$0xff] }
  0x28   :  { %539 = vmatpush1.bf16.msra.mxu1 %v538_v61  ;;  %v43_v61 = vld [vmem:[%s1199_s0 + $0xe8] sm:$0xff] }
  0x29   :  { %587 = vmatpush1.bf16.msra.mxu0 %v586_v62  ;;  %540 = vmatprep.subr.bf16.mxu1 %v643_v0  ;;  %v45_v62 = vld [vmem:[%s1199_s0 + $0xf8] sm:$0xff] }
  0x2a   :  { %588 = vmatprep.subr.bf16.mxu0 %v643_v0 }
  0x2c   :  { %542 = vmatpush1.bf16.msra.mxu1 %v541_v4  ;;  %v46_v4 = vld [vmem:[%s1199_s0 + $0x100] sm:$0xff] }
  0x2d   :  { %590 = vmatpush1.bf16.msra.mxu0 %v589_v5  ;;  %543 = vmatprep.subr.bf16.mxu1 %v643_v0  ;;  %v48_v5 = vld [vmem:[%s1199_s0 + $0x110] sm:$0xff] }
  0x2e   :  { %591 = vmatprep.subr.bf16.mxu0 %v643_v0 }
  0x30   :  { %545 = vmatpush1.bf16.msra.mxu1 %v544_v10  ;;  %v55_v10 = vld [vmem:[%s1199_s0 + $0x148] sm:$0xff] }
  0x31   :  { %593 = vmatpush1.bf16.msra.mxu0 %v592_v11  ;;  %546 = vmatprep.subr.bf16.mxu1 %v643_v0  ;;  %v57_v11 = vld [vmem:[%s1199_s0 + $0x158] sm:$0xff] }
  0x32   :  { %594 = vmatprep.subr.bf16.mxu0 %v643_v0 }
  0x34   :  { %548 = vmatpush1.bf16.msra.mxu1 %v547_v16  ;;  %v58_v16 = vld [vmem:[%s1199_s0 + $0x160] sm:$0xff] }
  0x35   :  { %596 = vmatpush1.bf16.msra.mxu0 %v595_v17  ;;  %549 = vmatprep.subr.bf16.mxu1 %v643_v0  ;;  %v60_v17 = vld [vmem:[%s1199_s0 + $0x170] sm:$0xff] }
  0x36   :  { %597 = vmatprep.subr.bf16.mxu0 %v643_v0 }
  0x38   :  { %551 = vmatpush1.bf16.msra.mxu1 %v550_v22  ;;  %v67_v22 = vld [vmem:[%s1199_s0 + $0x1a8] sm:$0xff] }
  0x39   :  { %599 = vmatpush1.bf16.msra.mxu0 %v598_v23  ;;  %552 = vmatprep.subr.bf16.mxu1 %v643_v0  ;;  %v69_v23 = vld [vmem:[%s1199_s0 + $0x1b8] sm:$0xff] }
  0x3a   :  { %600 = vmatprep.subr.bf16.mxu0 %v643_v0 }
  0x3c   :  { %554 = vmatpush1.bf16.msra.mxu1 %v553_v28  ;;  %v70_v28 = vld [vmem:[%s1199_s0 + $0x1c0] sm:$0xff] }
  0x3d   :  { %602 = vmatpush1.bf16.msra.mxu0 %v601_v29  ;;  %555 = vmatprep.subr.bf16.mxu1 %v643_v0  ;;  %v72_v29 = vld [vmem:[%s1199_s0 + $0x1d0] sm:$0xff] }
  0x3e   :  { %603 = vmatprep.subr.bf16.mxu0 %v643_v0  ;;  %v18_v0 = vld [vmem:[%s1199_s0 + $0x20] sm:$0xff] }
  0x40   :  { %557 = vmatpush1.bf16.msra.mxu1 %v556_v34  ;;  %v79_v34 = vld [vmem:[%s1199_s0 + $0x208] sm:$0xff] }
  0x41   :  { %605 = vmatpush1.bf16.msra.mxu0 %v604_v35  ;;  %v81_v35 = vld [vmem:[%s1199_s0 + $0x218] sm:$0xff] }
  0x43   :  { %222 = vmatmul.mubr.f32.vlgmr.msra.gmra.mrb[0].mxu1 %v14_v36  ;;  %v78_v36 = vld [vmem:[%s1199_s0 + $0x200] sm:$0xff] }
  0x44   :  { %377 = vmatmul.mubr.f32.vlgmr.msra.gmra.mrb[0].mxu0 %v16_v37  ;;  %226 = vmatprep.mubr.f32.mxu1 %v19_v38  ;;  %v80_v37 = vld [vmem:[%s1199_s0 + $0x210] sm:$0xff]  ;;  %v83_v38 = vld [vmem:[%s1199_s0 + $0x228] sm:$0xf] }
  0x45   :  { %381 = vmatprep.mubr.f32.mxu0 %v21_v39  ;;  %v85_v39 = vld [vmem:[%s1199_s0 + $0x238] sm:$0xf] }
  0x47   :  { %227 = vmatmul.mubr.f32.gmra.mrb[2].mxu1 %v18_v0  ;;  %v82_v0 = vld [vmem:[%s1199_s0 + $0x220] sm:$0xf] }
  0x48   :  { %382 = vmatmul.mubr.f32.gmra.mrb[2].mxu0 %v20_v40  ;;  %231 = vmatprep.mubr.f32.mxu1 %v23_v41  ;;  %v84_v40 = vld [vmem:[%s1199_s0 + $0x230] sm:$0xf]  ;;  %v1107_v41 = vld [vmem:[%s1200_s2] ss:$0 sm:$0xff] }
  0x49   :  { %386 = vmatprep.mubr.f32.mxu0 %v25_v42 }
  0x4b   :  { %232 = vmatmul.mubr.f32.gmra.mrb[4].mxu1 %v22_v43 }
  0x4c   :  { %387 = vmatmul.mubr.f32.gmra.mrb[4].mxu0 %v24_v44  ;;  %236 = vmatprep.mubr.f32.mxu1 %v27_v45 }
  0x4d   :  { %391 = vmatprep.mubr.f32.mxu0 %v29_v46 }
  0x4f   :  { %237 = vmatmul.mubr.f32.gmra.mrb[6].mxu1 %v26_v47 }
  0x50   :  { %392 = vmatmul.mubr.f32.gmra.mrb[6].mxu0 %v28_v48  ;;  %241 = vmatprep.mubr.f32.mxu1 %v31_v49 }
  0x51   :  { %396 = vmatprep.mubr.f32.mxu0 %v33_v50 }
  0x53   :  { %242 = vmatmul.mubr.f32.gmra.mrb[8].mxu1 %v30_v51 }
  0x54   :  { %397 = vmatmul.mubr.f32.gmra.mrb[8].mxu0 %v32_v52  ;;  %246 = vmatprep.mubr.f32.mxu1 %v35_v53 }
  0x55   :  { %401 = vmatprep.mubr.f32.mxu0 %v37_v54 }
  0x57   :  { %247 = vmatmul.mubr.f32.gmra.mrb[10].mxu1 %v34_v55 }
  0x58   :  { %402 = vmatmul.mubr.f32.gmra.mrb[10].mxu0 %v36_v56  ;;  %251 = vmatprep.mubr.f32.mxu1 %v39_v57 }
  0x59   :  { %406 = vmatprep.mubr.f32.mxu0 %v41_v58 }
  0x5b   :  { %252 = vmatmul.mubr.f32.gmra.mrb[12].mxu1 %v38_v59 }
  0x5c   :  { %407 = vmatmul.mubr.f32.gmra.mrb[12].mxu0 %v40_v60  ;;  %256 = vmatprep.mubr.f32.mxu1 %v43_v61 }
  0x5d   :  { %411 = vmatprep.mubr.f32.mxu0 %v45_v62 }
  0x5f   :  { %257 = vmatmul.mubr.f32.gmra.mrb[14].mxu1 %v42_v63 }
  0x60   :  { %412 = vmatmul.mubr.f32.gmra.mrb[14].mxu0 %v44_v1  ;;  %261 = vmatprep.mubr.f32.mxu1 %v47_v2 }
  0x61   :  { %416 = vmatprep.mubr.f32.mxu0 %v49_v3 }
  0x63   :  { %262 = vmatmul.mubr.f32.gmra.mrb[16].mxu1 %v46_v4 }
  0x64   :  { %417 = vmatmul.mubr.f32.gmra.mrb[16].mxu0 %v48_v5  ;;  %266 = vmatprep.mubr.f32.mxu1 %v51_v6 }
  0x65   :  { %421 = vmatprep.mubr.f32.mxu0 %v53_v7 }
  0x67   :  { %267 = vmatmul.mubr.f32.gmra.mrb[18].mxu1 %v50_v8 }
  0x68   :  { %422 = vmatmul.mubr.f32.gmra.mrb[18].mxu0 %v52_v9  ;;  %271 = vmatprep.mubr.f32.mxu1 %v55_v10 }
  0x69   :  { %426 = vmatprep.mubr.f32.mxu0 %v57_v11 }
  0x6b   :  { %272 = vmatmul.mubr.f32.gmra.mrb[20].mxu1 %v54_v12 }
  0x6c   :  { %427 = vmatmul.mubr.f32.gmra.mrb[20].mxu0 %v56_v13  ;;  %276 = vmatprep.mubr.f32.mxu1 %v59_v14 }
  0x6d   :  { %431 = vmatprep.mubr.f32.mxu0 %v61_v15 }
  0x6f   :  { %277 = vmatmul.mubr.f32.gmra.mrb[22].mxu1 %v58_v16 }
  0x70   :  { %432 = vmatmul.mubr.f32.gmra.mrb[22].mxu0 %v60_v17  ;;  %281 = vmatprep.mubr.f32.mxu1 %v63_v18 }
  0x71   :  { %436 = vmatprep.mubr.f32.mxu0 %v65_v19 }
  0x73   :  { %282 = vmatmul.mubr.f32.gmra.mrb[24].mxu1 %v62_v20 }
  0x74   :  { %437 = vmatmul.mubr.f32.gmra.mrb[24].mxu0 %v64_v21  ;;  %286 = vmatprep.mubr.f32.mxu1 %v67_v22 }
  0x75   :  { %441 = vmatprep.mubr.f32.mxu0 %v69_v23 }
  0x77   :  { %287 = vmatmul.mubr.f32.gmra.mrb[26].mxu1 %v66_v24 }
  0x78   :  { %442 = vmatmul.mubr.f32.gmra.mrb[26].mxu0 %v68_v25  ;;  %291 = vmatprep.mubr.f32.mxu1 %v71_v26 }
  0x79   :  { %446 = vmatprep.mubr.f32.mxu0 %v73_v27 }
  0x7b   :  { %292 = vmatmul.mubr.f32.gmra.mrb[28].mxu1 %v70_v28 }
  0x7c   :  { %447 = vmatmul.mubr.f32.gmra.mrb[28].mxu0 %v72_v29  ;;  %296 = vmatprep.mubr.f32.mxu1 %v75_v30 }
  0x7d   :  { %451 = vmatprep.mubr.f32.mxu0 %v77_v31 }
  0x7f   :  { %297 = vmatmul.mubr.f32.gmra.mrb[30].mxu1 %v74_v32 }
  0x80   :  { %452 = vmatmul.mubr.f32.gmra.mrb[30].mxu0 %v76_v33  ;;  %301 = vmatprep.mubr.f32.mxu1 %v79_v34 }
  0x81   :  { %456 = vmatprep.mubr.f32.mxu0 %v81_v35 }
  0x83   :  { %302 = vmatmul.mubr.f32.gmra.mrb[32].mxu1 %v78_v36 }
  0x84   :  { %457 = vmatmul.mubr.f32.gmra.mrb[32].mxu0 %v80_v37  ;;  %306 = vmatprep.mubr.f32.mxu1 %v83_v38 }
  0x85   :  { %461 = vmatprep.mubr.f32.mxu0 %v85_v39 }
  0x87   :  { %307 = vmatmul.mubr.f32.gmra.mrb[34].mxu1 %v82_v0 }
  0x88   :  { %462 = vmatmul.mubr.f32.gmra.mrb[34].mxu0 %v84_v40 }
 0x116   :  { %v223_v42 = vpop.f32.mrb[0].mxu1 }
 0x117   :  { %v224_v43 = vadd.f32 %v1107_v41, %v223_v42  ;;  %v225_v44 = vpop.f32.mrb[1].mxu1  ;;  %v378_v45 = vpop.f32.mrb[0].mxu0 }
 0x118   :  { %v380_v46 = vpop.f32.mrb[1].mxu0 }
 0x119   :  { %v379_v47 = vadd.f32 %v378_v45, %v224_v43 }
 0x11a   :  { %v228_v48 = vpop.f32.mrb[2].mxu1 }
 0x11b   :  { %v467_v49 = vmax.f32 %v379_v47, 0.0  ;;  %v229_v50 = vadd.f32 %v1107_v41, %v228_v48  ;;  %v230_v51 = vpop.f32.mrb[3].mxu1  ;;  %v383_v52 = vpop.f32.mrb[2].mxu0 }
 0x11c   :  { %v385_v53 = vpop.f32.mrb[3].mxu0 }
 0x11d   :  { %486 = vst.msk [vmem:[%s1201_s3] sm:$0xff] %vm485_vm0, %v467_v49  ;;  %v384_v54 = vadd.f32 %v383_v52, %v229_v50 }
 0x11e   :  { %v233_v55 = vpop.f32.mrb[4].mxu1 }
 0x11f   :  { %v468_v56 = vmax.f32 %v384_v54, 0.0  ;;  %v234_v57 = vadd.f32 %v1107_v41, %v233_v55  ;;  %v235_v58 = vpop.f32.mrb[5].mxu1  ;;  %v388_v59 = vpop.f32.mrb[4].mxu0 }
 0x120   :  { %v390_v60 = vpop.f32.mrb[5].mxu0 }
 0x121   :  { %487 = vst.msk [vmem:[%s1201_s3 + $0x8] sm:$0xff] %vm485_vm0, %v468_v56  ;;  %v389_v61 = vadd.f32 %v388_v59, %v234_v57 }
 0x122   :  { %v238_v62 = vpop.f32.mrb[6].mxu1 }
 0x123   :  { %v469_v63 = vmax.f32 %v389_v61, 0.0  ;;  %v239_v1 = vadd.f32 %v1107_v41, %v238_v62  ;;  %v240_v2 = vpop.f32.mrb[7].mxu1  ;;  %v393_v3 = vpop.f32.mrb[6].mxu0 }
 0x124   :  { %v395_v4 = vpop.f32.mrb[7].mxu0 }
 0x125   :  { %488 = vst.msk [vmem:[%s1201_s3 + $0x10] sm:$0xff] %vm485_vm0, %v469_v63  ;;  %v394_v5 = vadd.f32 %v393_v3, %v239_v1 }
 0x126   :  { %v243_v6 = vpop.f32.mrb[8].mxu1 }
 0x127   :  { %v470_v7 = vmax.f32 %v394_v5, 0.0  ;;  %v244_v8 = vadd.f32 %v1107_v41, %v243_v6  ;;  %v245_v9 = vpop.f32.mrb[9].mxu1  ;;  %v398_v10 = vpop.f32.mrb[8].mxu0 }
 0x128   :  { %v400_v11 = vpop.f32.mrb[9].mxu0 }
 0x129   :  { %489 = vst.msk [vmem:[%s1201_s3 + $0x18] sm:$0xff] %vm485_vm0, %v470_v7  ;;  %v399_v12 = vadd.f32 %v398_v10, %v244_v8 }
 0x12a   :  { %v248_v13 = vpop.f32.mrb[10].mxu1 }
 0x12b   :  { %v471_v14 = vmax.f32 %v399_v12, 0.0  ;;  %v249_v15 = vadd.f32 %v1107_v41, %v248_v13  ;;  %v250_v16 = vpop.f32.mrb[11].mxu1  ;;  %v403_v17 = vpop.f32.mrb[10].mxu0 }
 0x12c   :  { %v405_v18 = vpop.f32.mrb[11].mxu0 }
 0x12d   :  { %490 = vst.msk [vmem:[%s1201_s3 + $0x20] sm:$0xff] %vm485_vm0, %v471_v14  ;;  %v404_v19 = vadd.f32 %v403_v17, %v249_v15 }
 0x12e   :  { %v253_v20 = vpop.f32.mrb[12].mxu1 }
 0x12f   :  { %v472_v21 = vmax.f32 %v404_v19, 0.0  ;;  %v254_v22 = vadd.f32 %v1107_v41, %v253_v20  ;;  %v255_v23 = vpop.f32.mrb[13].mxu1  ;;  %v408_v24 = vpop.f32.mrb[12].mxu0 }
 0x130   :  { %v410_v25 = vpop.f32.mrb[13].mxu0 }
 0x131   :  { %491 = vst.msk [vmem:[%s1201_s3 + $0x28] sm:$0xff] %vm485_vm0, %v472_v21  ;;  %v409_v26 = vadd.f32 %v408_v24, %v254_v22 }
 0x132   :  { %v258_v27 = vpop.f32.mrb[14].mxu1 }
 0x133   :  { %v473_v28 = vmax.f32 %v409_v26, 0.0  ;;  %v259_v29 = vadd.f32 %v1107_v41, %v258_v27  ;;  %v260_v30 = vpop.f32.mrb[15].mxu1  ;;  %v413_v31 = vpop.f32.mrb[14].mxu0 }
 0x134   :  { %v415_v32 = vpop.f32.mrb[15].mxu0 }
 0x135   :  { %492 = vst.msk [vmem:[%s1201_s3 + $0x30] sm:$0xff] %vm485_vm0, %v473_v28  ;;  %v414_v33 = vadd.f32 %v413_v31, %v259_v29 }
 0x136   :  { %v263_v34 = vpop.f32.mrb[16].mxu1 }
 0x137   :  { %v474_v35 = vmax.f32 %v414_v33, 0.0  ;;  %v264_v36 = vadd.f32 %v1107_v41, %v263_v34  ;;  %v265_v37 = vpop.f32.mrb[17].mxu1  ;;  %v418_v38 = vpop.f32.mrb[16].mxu0 }
 0x138   :  { %v420_v39 = vpop.f32.mrb[17].mxu0 }
 0x139   :  { %493 = vst.msk [vmem:[%s1201_s3 + $0x38] sm:$0xff] %vm485_vm0, %v474_v35  ;;  %v419_v0 = vadd.f32 %v418_v38, %v264_v36 }
 0x13a   :  { %v268_v40 = vpop.f32.mrb[18].mxu1 }
 0x13b   :  { %v475_v42 = vmax.f32 %v419_v0, 0.0  ;;  %v269_v43 = vadd.f32 %v1107_v41, %v268_v40  ;;  %v270_v44 = vpop.f32.mrb[19].mxu1  ;;  %v423_v45 = vpop.f32.mrb[18].mxu0 }
 0x13c   :  { %v425_v46 = vpop.f32.mrb[19].mxu0 }
 0x13d   :  { %494 = vst.msk [vmem:[%s1201_s3 + $0x40] sm:$0xff] %vm485_vm0, %v475_v42  ;;  %v424_v47 = vadd.f32 %v423_v45, %v269_v43 }
 0x13e   :  { %v273_v48 = vpop.f32.mrb[20].mxu1 }
 0x13f   :  { %v476_v49 = vmax.f32 %v424_v47, 0.0  ;;  %v274_v50 = vadd.f32 %v1107_v41, %v273_v48  ;;  %v275_v51 = vpop.f32.mrb[21].mxu1  ;;  %v428_v52 = vpop.f32.mrb[20].mxu0 }
 0x140   :  { %v430_v53 = vpop.f32.mrb[21].mxu0 }
 0x141   :  { %495 = vst.msk [vmem:[%s1201_s3 + $0x48] sm:$0xff] %vm485_vm0, %v476_v49  ;;  %v429_v54 = vadd.f32 %v428_v52, %v274_v50 }
 0x142   :  { %v278_v55 = vpop.f32.mrb[22].mxu1 }
 0x143   :  { %v477_v56 = vmax.f32 %v429_v54, 0.0  ;;  %v279_v57 = vadd.f32 %v1107_v41, %v278_v55  ;;  %v280_v58 = vpop.f32.mrb[23].mxu1  ;;  %v433_v59 = vpop.f32.mrb[22].mxu0 }
 0x144   :  { %v435_v60 = vpop.f32.mrb[23].mxu0 }
 0x145   :  { %496 = vst.msk [vmem:[%s1201_s3 + $0x50] sm:$0xff] %vm485_vm0, %v477_v56  ;;  %v434_v61 = vadd.f32 %v433_v59, %v279_v57 }
 0x146   :  { %v283_v62 = vpop.f32.mrb[24].mxu1 }
 0x147   :  { %v478_v63 = vmax.f32 %v434_v61, 0.0  ;;  %v284_v1 = vadd.f32 %v1107_v41, %v283_v62  ;;  %v285_v2 = vpop.f32.mrb[25].mxu1  ;;  %v438_v3 = vpop.f32.mrb[24].mxu0 }
 0x148   :  { %v440_v4 = vpop.f32.mrb[25].mxu0 }
 0x149   :  { %497 = vst.msk [vmem:[%s1201_s3 + $0x58] sm:$0xff] %vm485_vm0, %v478_v63  ;;  %v439_v5 = vadd.f32 %v438_v3, %v284_v1 }
 0x14a   :  { %v288_v6 = vpop.f32.mrb[26].mxu1 }
 0x14b   :  { %v479_v7 = vmax.f32 %v439_v5, 0.0  ;;  %v289_v8 = vadd.f32 %v1107_v41, %v288_v6  ;;  %v290_v9 = vpop.f32.mrb[27].mxu1  ;;  %v443_v10 = vpop.f32.mrb[26].mxu0 }
 0x14c   :  { %v445_v11 = vpop.f32.mrb[27].mxu0 }
 0x14d   :  { %498 = vst.msk [vmem:[%s1201_s3 + $0x60] sm:$0xff] %vm485_vm0, %v479_v7  ;;  %v444_v12 = vadd.f32 %v443_v10, %v289_v8 }
 0x14e   :  { %v293_v13 = vpop.f32.mrb[28].mxu1 }
 0x14f   :  { %v480_v14 = vmax.f32 %v444_v12, 0.0  ;;  %v294_v15 = vadd.f32 %v1107_v41, %v293_v13  ;;  %v295_v16 = vpop.f32.mrb[29].mxu1  ;;  %v448_v17 = vpop.f32.mrb[28].mxu0 }
 0x150   :  { %v450_v18 = vpop.f32.mrb[29].mxu0 }
 0x151   :  { %499 = vst.msk [vmem:[%s1201_s3 + $0x68] sm:$0xff] %vm485_vm0, %v480_v14  ;;  %v449_v19 = vadd.f32 %v448_v17, %v294_v15 }
 0x152   :  { %v298_v20 = vpop.f32.mrb[30].mxu1 }
 0x153   :  { %v481_v21 = vmax.f32 %v449_v19, 0.0  ;;  %v299_v22 = vadd.f32 %v1107_v41, %v298_v20  ;;  %v300_v23 = vpop.f32.mrb[31].mxu1  ;;  %v453_v24 = vpop.f32.mrb[30].mxu0 }
 0x154   :  { %v455_v25 = vpop.f32.mrb[31].mxu0 }
 0x155   :  { %500 = vst.msk [vmem:[%s1201_s3 + $0x70] sm:$0xff] %vm485_vm0, %v481_v21  ;;  %v454_v26 = vadd.f32 %v453_v24, %v299_v22 }
 0x156   :  { %v303_v27 = vpop.f32.mrb[32].mxu1 }
 0x157   :  { %v482_v28 = vmax.f32 %v454_v26, 0.0  ;;  %v304_v29 = vadd.f32 %v1107_v41, %v303_v27  ;;  %v305_v30 = vpop.f32.mrb[33].mxu1  ;;  %v458_v31 = vpop.f32.mrb[32].mxu0 }
 0x158   :  { %v460_v32 = vpop.f32.mrb[33].mxu0 }
 0x159   :  { %501 = vst.msk [vmem:[%s1201_s3 + $0x78] sm:$0xff] %vm485_vm0, %v482_v28  ;;  %v459_v33 = vadd.f32 %v458_v31, %v304_v29 }
 0x15a   :  { %v308_v34 = vpop.f32.mrb[34].mxu1 }
 0x15b   :  { %v483_v35 = vmax.f32 %v459_v33, 0.0  ;;  %v309_v36 = vadd.f32 %v1107_v41, %v308_v34  ;;  %v310_v37 = vpop.f32.mrb[35].mxu1  ;;  %v463_v38 = vpop.f32.mrb[34].mxu0 }
 0x15c   :  { %v465_v39 = vpop.f32.mrb[35].mxu0 }
 0x15d   :  { %502 = vst.msk [vmem:[%s1201_s3 + $0x80] sm:$0xff] %vm485_vm0, %v483_v35  ;;  %v464_v0 = vadd.f32 %v463_v38, %v309_v36 }
 0x15f   :  { %v484_v40 = vmax.f32 %v464_v0, 0.0 }
 0x161   :  { %504 = vst.msk [vmem:[%s1201_s3 + $0x88] sm:$0xf] %vm503_vm1, %v484_v40 }

// kernel: soft_q_forward.6
= control target key start
LH: loop header
LB: loop body
LE: loop exit
PB: predicated region body
PF: predicated region fallthrough
CT: control target
= control target key end

     0   :  { %vm143_vm0 = vcmask 523264   ;;  %s1275_s1 = inlined_call_operand.vmem [shape: f32[576,64], index: 1, kind: input, shape index: {}]   ;;  %s1276_s0 = inlined_call_operand.vmem [shape: f32[80,576], index: 0, kind: input, shape index: {}]   ;;  %s1277_s2 = inlined_call_operand.vmem [shape: f32[1,64], index: 2, kind: input, shape index: {}]   ;;  %s1278_s3 = inlined_call_operand.vmem [shape: f32[80,64], index: 3, kind: output, shape index: {}]  }
   0x1   :  { %v80_v0 = vld [vmem:[%s1275_s1 + $0x80] sm:$0xff]  ;;  %v81_v1 = vld [vmem:[%s1275_s1 + $0x88] sm:$0xff]  ;;  %v82_v11 = vld [vmem:[%s1275_s1 + $0x90] sm:$0xff] }
   0x2   :  { %v112_v2 = vld [vmem:[%s1275_s1 + $0x180] sm:$0xff]  ;;  %v727_v3 = vpack.c.bf16 %v81_v1, %v80_v0  ;;  %v113_v4 = vld [vmem:[%s1275_s1 + $0x188] sm:$0xff]  ;;  %v83_v13 = vld [vmem:[%s1275_s1 + $0x98] sm:$0xff] }
   0x3   :  { %v64_v5 = vld [vmem:[%s1275_s1] sm:$0xff]  ;;  %v65_v6 = vld [vmem:[%s1275_s1 + $0x8] sm:$0xff]  ;;  %v759_v7 = vpack.c.bf16 %v113_v4, %v112_v2  ;;  %v114_v14 = vld [vmem:[%s1275_s1 + $0x190] sm:$0xff]  ;;  %v731_v16 = vpack.c.bf16 %v83_v13, %v82_v11 }
   0x4   :  { %v729_v8 = vpack.c.bf16 %v65_v6, %v64_v5  ;;  %v96_v9 = vld [vmem:[%s1275_s1 + $0x100] sm:$0xff]  ;;  %v97_v10 = vld [vmem:[%s1275_s1 + $0x108] sm:$0xff]  ;;  %728 = vmatprep.subr.bf16.mxu0 %v727_v3  ;;  %v115_v15 = vld [vmem:[%s1275_s1 + $0x198] sm:$0xff] }
   0x5   :  { %v761_v12 = vpack.c.bf16 %v97_v10, %v96_v9  ;;  %760 = vmatprep.subr.bf16.mxu1 %v759_v7  ;;  %v763_v17 = vpack.c.bf16 %v115_v15, %v114_v14  ;;  %v66_v18 = vld [vmem:[%s1275_s1 + $0x10] sm:$0xff]  ;;  %v67_v19 = vld [vmem:[%s1275_s1 + $0x18] sm:$0xff]  ;;  %v84_v23 = vld [vmem:[%s1275_s1 + $0xa0] sm:$0xff] }
   0x6   :  { %730 = vmatpush3.bf16.msra.mxu0 %v729_v8  ;;  %v98_v20 = vld [vmem:[%s1275_s1 + $0x110] sm:$0xff]  ;;  %v733_v21 = vpack.c.bf16 %v67_v19, %v66_v18  ;;  %v99_v22 = vld [vmem:[%s1275_s1 + $0x118] sm:$0xff]  ;;  %v85_v24 = vld [vmem:[%s1275_s1 + $0xa8] sm:$0xff] }
   0x7   :  { %762 = vmatpush3.bf16.msra.mxu1 %v761_v12  ;;  %732 = vmatprep.subr.bf16.mxu0 %v731_v16  ;;  %v765_v25 = vpack.c.bf16 %v99_v22, %v98_v20  ;;  %v735_v26 = vpack.c.bf16 %v85_v24, %v84_v23  ;;  %v116_v27 = vld [vmem:[%s1275_s1 + $0x1a0] sm:$0xff]  ;;  %v117_v28 = vld [vmem:[%s1275_s1 + $0x1a8] sm:$0xff]  ;;  %v86_v35 = vld [vmem:[%s1275_s1 + $0xb0] sm:$0xff] }
   0x8   :  { %764 = vmatprep.subr.bf16.mxu1 %v763_v17  ;;  %v68_v29 = vld [vmem:[%s1275_s1 + $0x20] sm:$0xff]  ;;  %v767_v30 = vpack.c.bf16 %v117_v28, %v116_v27  ;;  %v69_v31 = vld [vmem:[%s1275_s1 + $0x28] sm:$0xff]  ;;  %v87_v36 = vld [vmem:[%s1275_s1 + $0xb8] sm:$0xff] }
   0x9   :  { %v100_v32 = vld [vmem:[%s1275_s1 + $0x120] sm:$0xff]  ;;  %v101_v33 = vld [vmem:[%s1275_s1 + $0x128] sm:$0xff]  ;;  %v737_v34 = vpack.c.bf16 %v69_v31, %v68_v29  ;;  %v118_v37 = vld [vmem:[%s1275_s1 + $0x1b0] sm:$0xff]  ;;  %v739_v39 = vpack.c.bf16 %v87_v36, %v86_v35 }
   0xa   :  { %734 = vmatpush3.bf16.msra.mxu0 %v733_v21  ;;  %v769_v38 = vpack.c.bf16 %v101_v33, %v100_v32  ;;  %v119_v40 = vld [vmem:[%s1275_s1 + $0x1b8] sm:$0xff]  ;;  %v70_v41 = vld [vmem:[%s1275_s1 + $0x30] sm:$0xff]  ;;  %v88_v46 = vld [vmem:[%s1275_s1 + $0xc0] sm:$0xff] }
   0xb   :  { %766 = vmatpush3.bf16.msra.mxu1 %v765_v25  ;;  %736 = vmatprep.subr.bf16.mxu0 %v735_v26  ;;  %v71_v42 = vld [vmem:[%s1275_s1 + $0x38] sm:$0xff]  ;;  %v771_v43 = vpack.c.bf16 %v119_v40, %v118_v37  ;;  %v102_v44 = vld [vmem:[%s1275_s1 + $0x130] sm:$0xff]  ;;  %v89_v47 = vld [vmem:[%s1275_s1 + $0xc8] sm:$0xff] }
   0xc   :  { %768 = vmatprep.subr.bf16.mxu1 %v767_v30  ;;  %v103_v45 = vld [vmem:[%s1275_s1 + $0x138] sm:$0xff]  ;;  %v120_v48 = vld [vmem:[%s1275_s1 + $0x1c0] sm:$0xff]  ;;  %v121_v49 = vld [vmem:[%s1275_s1 + $0x1c8] sm:$0xff]  ;;  %v741_v50 = vpack.c.bf16 %v71_v42, %v70_v41  ;;  %v743_v52 = vpack.c.bf16 %v89_v47, %v88_v46 }
   0xd   :  { %v773_v51 = vpack.c.bf16 %v103_v45, %v102_v44  ;;  %v72_v53 = vld [vmem:[%s1275_s1 + $0x40] sm:$0xff]  ;;  %v73_v54 = vld [vmem:[%s1275_s1 + $0x48] sm:$0xff]  ;;  %v775_v56 = vpack.c.bf16 %v121_v49, %v120_v48  ;;  %v90_v58 = vld [vmem:[%s1275_s1 + $0xd0] sm:$0xff] }
   0xe   :  { %738 = vmatpush3.bf16.msra.mxu0 %v737_v34  ;;  %v104_v55 = vld [vmem:[%s1275_s1 + $0x140] sm:$0xff]  ;;  %v105_v57 = vld [vmem:[%s1275_s1 + $0x148] sm:$0xff]  ;;  %v91_v59 = vld [vmem:[%s1275_s1 + $0xd8] sm:$0xff]  ;;  %v745_v62 = vpack.c.bf16 %v73_v54, %v72_v53 }
   0xf   :  { %770 = vmatpush3.bf16.msra.mxu1 %v769_v38  ;;  %740 = vmatprep.subr.bf16.mxu0 %v739_v39  ;;  %v122_v60 = vld [vmem:[%s1275_s1 + $0x1d0] sm:$0xff]  ;;  %v123_v61 = vld [vmem:[%s1275_s1 + $0x1d8] sm:$0xff]  ;;  %v777_v63 = vpack.c.bf16 %v105_v57, %v104_v55  ;;  %v747_v0 = vpack.c.bf16 %v91_v59, %v90_v58  ;;  %v92_v6 = vld [vmem:[%s1275_s1 + $0xe0] sm:$0xff] }
  0x10   :  { %772 = vmatprep.subr.bf16.mxu1 %v771_v43  ;;  %v74_v1 = vld [vmem:[%s1275_s1 + $0x50] sm:$0xff]  ;;  %v75_v2 = vld [vmem:[%s1275_s1 + $0x58] sm:$0xff]  ;;  %v779_v4 = vpack.c.bf16 %v123_v61, %v122_v60  ;;  %v93_v7 = vld [vmem:[%s1275_s1 + $0xe8] sm:$0xff] }
  0x11   :  { %v106_v3 = vld [vmem:[%s1275_s1 + $0x150] sm:$0xff]  ;;  %v107_v5 = vld [vmem:[%s1275_s1 + $0x158] sm:$0xff]  ;;  %v124_v8 = vld [vmem:[%s1275_s1 + $0x1e0] sm:$0xff]  ;;  %v749_v10 = vpack.c.bf16 %v75_v2, %v74_v1  ;;  %v751_v14 = vpack.c.bf16 %v93_v7, %v92_v6 }
  0x12   :  { %742 = vmatpush3.bf16.msra.mxu0 %v741_v50  ;;  %v125_v9 = vld [vmem:[%s1275_s1 + $0x1e8] sm:$0xff]  ;;  %v76_v11 = vld [vmem:[%s1275_s1 + $0x60] sm:$0xff]  ;;  %v781_v13 = vpack.c.bf16 %v107_v5, %v106_v3  ;;  %v17_v17 = vld [vmem:[%s1276_s0 + $0x18] sm:$0xff] }
  0x13   :  { %774 = vmatpush3.bf16.msra.mxu1 %v773_v51  ;;  %744 = vmatprep.subr.bf16.mxu0 %v743_v52  ;;  %v77_v12 = vld [vmem:[%s1275_s1 + $0x68] sm:$0xff]  ;;  %v108_v15 = vld [vmem:[%s1275_s1 + $0x160] sm:$0xff]  ;;  %v783_v18 = vpack.c.bf16 %v125_v9, %v124_v8  ;;  %v94_v20 = vld [vmem:[%s1275_s1 + $0xf0] sm:$0xff] }
  0x14   :  { %776 = vmatprep.subr.bf16.mxu1 %v775_v56  ;;  %v15_v16 = vld [vmem:[%s1276_s0 + $0x8] sm:$0xff]  ;;  %v95_v21 = vld [vmem:[%s1275_s1 + $0xf8] sm:$0xff]  ;;  %v126_v22 = vld [vmem:[%s1275_s1 + $0x1f0] sm:$0xff]  ;;  %353 = vmatprep.mubr.f32.mxu1 %v17_v17  ;;  %v753_v24 = vpack.c.bf16 %v77_v12, %v76_v11 }
  0x15   :  { %v109_v19 = vld [vmem:[%s1275_s1 + $0x168] sm:$0xff]  ;;  %238 = vmatprep.mubr.f32.mxu0 %v15_v16  ;;  %v127_v23 = vld [vmem:[%s1275_s1 + $0x1f8] sm:$0xff]  ;;  %v755_v26 = vpack.c.bf16 %v95_v21, %v94_v20  ;;  %v78_v27 = vld [vmem:[%s1275_s1 + $0x70] sm:$0xff] }
  0x16   :  { %746 = vmatpush3.bf16.msra.mxu0 %v745_v62  ;;  %v785_v25 = vpack.c.bf16 %v109_v19, %v108_v15  ;;  %v79_v28 = vld [vmem:[%s1275_s1 + $0x78] sm:$0xff]  ;;  %v110_v29 = vld [vmem:[%s1275_s1 + $0x170] sm:$0xff]  ;;  %v787_v30 = vpack.c.bf16 %v127_v23, %v126_v22  ;;  %v128_v32 = vld [vmem:[%s1275_s1 + $0x200] sm:$0xff] }
  0x17   :  { %778 = vmatpush3.bf16.msra.mxu1 %v777_v63  ;;  %748 = vmatprep.subr.bf16.mxu0 %v747_v0  ;;  %v111_v31 = vld [vmem:[%s1275_s1 + $0x178] sm:$0xff]  ;;  %v129_v33 = vld [vmem:[%s1275_s1 + $0x208] sm:$0xff]  ;;  %v757_v34 = vpack.c.bf16 %v79_v28, %v78_v27  ;;  %v130_v37 = vld [vmem:[%s1275_s1 + $0x210] sm:$0xff] }
  0x18   :  { %780 = vmatprep.subr.bf16.mxu1 %v779_v4  ;;  %v789_v35 = vpack.c.bf16 %v111_v31, %v110_v29  ;;  %v791_v36 = vpack.c.bf16 %v129_v33, %v128_v32  ;;  %v131_v38 = vld [vmem:[%s1275_s1 + $0x218] sm:$0xff]  ;;  %v14_v39 = vld [vmem:[%s1276_s0] sm:$0xff]  ;;  %v16_v40 = vld [vmem:[%s1276_s0 + $0x10] sm:$0xff] }
  0x19   :  { %v20_v41 = vld [vmem:[%s1276_s0 + $0x30] sm:$0xff]  ;;  %v22_v42 = vld [vmem:[%s1276_s0 + $0x40] sm:$0xff]  ;;  %v795_v43 = vpack.c.bf16 %v131_v38, %v130_v37  ;;  %v133_v45 = vld [vmem:[%s1275_s1 + $0x228] sm:$0xff] }
  0x1a   :  { %750 = vmatpush3.bf16.msra.mxu0 %v749_v10  ;;  %v132_v44 = vld [vmem:[%s1275_s1 + $0x220] sm:$0xff]  ;;  %v19_v46 = vld [vmem:[%s1276_s0 + $0x28] sm:$0xff]  ;;  %v21_v47 = vld [vmem:[%s1276_s0 + $0x38] sm:$0xff] }
  0x1b   :  { %782 = vmatpush3.bf16.msra.mxu1 %v781_v13  ;;  %752 = vmatprep.subr.bf16.mxu0 %v751_v14  ;;  %v25_v48 = vld [vmem:[%s1276_s0 + $0x58] sm:$0xff]  ;;  %v27_v49 = vld [vmem:[%s1276_s0 + $0x68] sm:$0xff]  ;;  %v799_v50 = vpack.c.bf16 %v133_v45, %v132_v44  ;;  %v134_v51 = vld [vmem:[%s1275_s1 + $0x230] sm:$0xff] }
  0x1c   :  { %784 = vmatprep.subr.bf16.mxu1 %v783_v18  ;;  %v135_v52 = vld [vmem:[%s1275_s1 + $0x238] sm:$0xff]  ;;  %v24_v53 = vld [vmem:[%s1276_s0 + $0x50] sm:$0xff]  ;;  %v26_v54 = vld [vmem:[%s1276_s0 + $0x60] sm:$0xff] }
  0x1d   :  { %v30_v55 = vld [vmem:[%s1276_s0 + $0x80] sm:$0xff]  ;;  %v32_v56 = vld [vmem:[%s1276_s0 + $0x90] sm:$0xff]  ;;  %v803_v57 = vpack.c.bf16 %v135_v52, %v134_v51  ;;  %v29_v58 = vld [vmem:[%s1276_s0 + $0x78] sm:$0xff] }
  0x1e   :  { %754 = vmatpush3.bf16.msra.mxu0 %v753_v24  ;;  %v31_v59 = vld [vmem:[%s1276_s0 + $0x88] sm:$0xff]  ;;  %v37_v61 = vld [vmem:[%s1276_s0 + $0xb8] sm:$0xff]  ;;  %v34_v62 = vld [vmem:[%s1276_s0 + $0xa0] sm:$0xff] }
  0x1f   :  { %786 = vmatpush3.bf16.msra.mxu1 %v785_v25  ;;  %756 = vmatprep.subr.bf16.mxu0 %v755_v26  ;;  %v35_v60 = vld [vmem:[%s1276_s0 + $0xa8] sm:$0xff]  ;;  %v36_v63 = vld [vmem:[%s1276_s0 + $0xb0] sm:$0xff]  ;;  %v42_v1 = vld [vmem:[%s1276_s0 + $0xe0] sm:$0xff] }
  0x20   :  { %788 = vmatprep.subr.bf16.mxu1 %v787_v30  ;;  %v40_v0 = vld [vmem:[%s1276_s0 + $0xd0] sm:$0xff]  ;;  %v39_v2 = vld [vmem:[%s1276_s0 + $0xc8] sm:$0xff]  ;;  %v41_v3 = vld [vmem:[%s1276_s0 + $0xd8] sm:$0xff] }
  0x21   :  { %v45_v4 = vld [vmem:[%s1276_s0 + $0xf8] sm:$0xff]  ;;  %v47_v5 = vld [vmem:[%s1276_s0 + $0x108] sm:$0xff]  ;;  %v44_v6 = vld [vmem:[%s1276_s0 + $0xf0] sm:$0xff] }
  0x22   :  { %758 = vmatpush3.bf16.msra.mxu0 %v757_v34  ;;  %v46_v7 = vld [vmem:[%s1276_s0 + $0x100] sm:$0xff]  ;;  %v52_v9 = vld [vmem:[%s1276_s0 + $0x130] sm:$0xff]  ;;  %v49_v10 = vld [vmem:[%s1276_s0 + $0x118] sm:$0xff] }
  0x23   :  { %790 = vmatpush3.bf16.msra.mxu1 %v789_v35  ;;  %792 = vmatprep.subr.bf16.mxu0 %v791_v36  ;;  %v50_v8 = vld [vmem:[%s1276_s0 + $0x120] sm:$0xff]  ;;  %v51_v11 = vld [vmem:[%s1276_s0 + $0x128] sm:$0xff]  ;;  %v57_v13 = vld [vmem:[%s1276_s0 + $0x158] sm:$0xff] }
  0x24   :  { %807 = vmatprep.subr.bf16.mxu1 %v791_v36  ;;  %v55_v12 = vld [vmem:[%s1276_s0 + $0x148] sm:$0xff]  ;;  %v54_v14 = vld [vmem:[%s1276_s0 + $0x140] sm:$0xff]  ;;  %v56_v15 = vld [vmem:[%s1276_s0 + $0x150] sm:$0xff] }
  0x25   :  { %239 = vmatmul.mubr.f32.vlgmr.msra.gmra.mrb[0].mxu0 %v14_v39  ;;  %v60_v16 = vld [vmem:[%s1276_s0 + $0x170] sm:$0xff]  ;;  %v62_v17 = vld [vmem:[%s1276_s0 + $0x180] sm:$0xff]  ;;  %v59_v18 = vld [vmem:[%s1276_s0 + $0x168] sm:$0xff] }
  0x26   :  { %354 = vmatmul.mubr.f32.vlgmr.msra.gmra.mrb[0].mxu1 %v16_v40  ;;  %794 = vmatpush3.bf16.msra.mxu0 %v791_v36  ;;  %v61_v19 = vld [vmem:[%s1276_s0 + $0x178] sm:$0xff]  ;;  %v18_v20 = vld [vmem:[%s1276_s0 + $0x20] sm:$0xff]  ;;  %v48_v21 = vld [vmem:[%s1276_s0 + $0x110] sm:$0xff] }
  0x27   :  { %243 = vmatprep.mubr.f32.mxu0 %v20_v41  ;;  %358 = vmatprep.mubr.f32.mxu1 %v22_v42  ;;  %v23_v22 = vld [vmem:[%s1276_s0 + $0x48] sm:$0xff]  ;;  %v53_v23 = vld [vmem:[%s1276_s0 + $0x138] sm:$0xff]  ;;  %v28_v24 = vld [vmem:[%s1276_s0 + $0x70] sm:$0xff] }
  0x28   :  { %811 = vmatpush3.bf16.msra.mxu1 %v791_v36  ;;  %796 = vmatprep.subr.bf16.mxu0 %v795_v43  ;;  %v58_v25 = vld [vmem:[%s1276_s0 + $0x160] sm:$0xff]  ;;  %v33_v26 = vld [vmem:[%s1276_s0 + $0x98] sm:$0xff]  ;;  %v63_v27 = vld [vmem:[%s1276_s0 + $0x188] sm:$0xff] }
  0x29   :  { %244 = vmatmul.mubr.f32.gmra.mrb[2].mxu0 %v19_v46  ;;  %808 = vmatprep.subr.bf16.mxu1 %v795_v43  ;;  %v38_v28 = vld [vmem:[%s1276_s0 + $0xc0] sm:$0xff]  ;;  %v43_v29 = vld [vmem:[%s1276_s0 + $0xe8] sm:$0xff] }
  0x2a   :  { %359 = vmatmul.mubr.f32.gmra.mrb[2].mxu1 %v21_v47  ;;  %248 = vmatprep.mubr.f32.mxu0 %v25_v48  ;;  %v1214_v31 = vld [vmem:[%s1277_s2] ss:$0 sm:$0xff] }
  0x2b   :  { %363 = vmatprep.mubr.f32.mxu1 %v27_v49  ;;  %798 = vmatpush3.bf16.msra.mxu0 %v795_v43 }
  0x2c   :  { %812 = vmatpush3.bf16.msra.mxu1 %v795_v43  ;;  %800 = vmatprep.subr.bf16.mxu0 %v799_v50 }
  0x2d   :  { %249 = vmatmul.mubr.f32.gmra.mrb[4].mxu0 %v24_v53  ;;  %809 = vmatprep.subr.bf16.mxu1 %v799_v50 }
  0x2e   :  { %364 = vmatmul.mubr.f32.gmra.mrb[4].mxu1 %v26_v54  ;;  %253 = vmatprep.mubr.f32.mxu0 %v30_v55 }
  0x2f   :  { %368 = vmatprep.mubr.f32.mxu1 %v32_v56  ;;  %802 = vmatpush3.bf16.msra.mxu0 %v799_v50 }
  0x30   :  { %813 = vmatpush3.bf16.msra.mxu1 %v799_v50  ;;  %804 = vmatprep.subr.bf16.mxu0 %v803_v57 }
  0x31   :  { %254 = vmatmul.mubr.f32.gmra.mrb[6].mxu0 %v29_v58  ;;  %810 = vmatprep.subr.bf16.mxu1 %v803_v57 }
  0x32   :  { %369 = vmatmul.mubr.f32.gmra.mrb[6].mxu1 %v31_v59  ;;  %258 = vmatprep.mubr.f32.mxu0 %v35_v60 }
  0x33   :  { %373 = vmatprep.mubr.f32.mxu1 %v37_v61  ;;  %806 = vmatpush3.bf16.msra.mxu0 %v803_v57 }
  0x34   :  { %814 = vmatpush3.bf16.msra.mxu1 %v803_v57 }
  0x35   :  { %259 = vmatmul.mubr.f32.gmra.mrb[8].mxu0 %v34_v62 }
  0x36   :  { %374 = vmatmul.mubr.f32.gmra.mrb[8].mxu1 %v36_v63  ;;  %263 = vmatprep.mubr.f32.mxu0 %v40_v0 }
  0x37   :  { %378 = vmatprep.mubr.f32.mxu1 %v42_v1 }
  0x39   :  { %264 = vmatmul.mubr.f32.gmra.mrb[10].mxu0 %v39_v2 }
  0x3a   :  { %379 = vmatmul.mubr.f32.gmra.mrb[10].mxu1 %v41_v3  ;;  %268 = vmatprep.mubr.f32.mxu0 %v45_v4 }
  0x3b   :  { %383 = vmatprep.mubr.f32.mxu1 %v47_v5 }
  0x3d   :  { %269 = vmatmul.mubr.f32.gmra.mrb[12].mxu0 %v44_v6 }
  0x3e   :  { %384 = vmatmul.mubr.f32.gmra.mrb[12].mxu1 %v46_v7  ;;  %273 = vmatprep.mubr.f32.mxu0 %v50_v8 }
  0x3f   :  { %388 = vmatprep.mubr.f32.mxu1 %v52_v9 }
  0x41   :  { %274 = vmatmul.mubr.f32.gmra.mrb[14].mxu0 %v49_v10 }
  0x42   :  { %389 = vmatmul.mubr.f32.gmra.mrb[14].mxu1 %v51_v11  ;;  %278 = vmatprep.mubr.f32.mxu0 %v55_v12 }
  0x43   :  { %393 = vmatprep.mubr.f32.mxu1 %v57_v13 }
  0x45   :  { %279 = vmatmul.mubr.f32.gmra.mrb[16].mxu0 %v54_v14 }
  0x46   :  { %394 = vmatmul.mubr.f32.gmra.mrb[16].mxu1 %v56_v15  ;;  %283 = vmatprep.mubr.f32.mxu0 %v60_v16 }
  0x47   :  { %398 = vmatprep.mubr.f32.mxu1 %v62_v17 }
  0x49   :  { %284 = vmatmul.mubr.f32.gmra.mrb[18].mxu0 %v59_v18 }
  0x4a   :  { %399 = vmatmul.mubr.f32.gmra.mrb[18].mxu1 %v61_v19  ;;  %712 = vmatprep.mubr.msk.f32.mxu0 %vm143_vm0, %v18_v20 }
  0x4b   :  { %721 = vmatprep.mubr.msk.f32.mxu1 %vm143_vm0, %v48_v21 }
  0x4d   :  { %713 = vmatmul.mubr.msk.f32.vlgmr.msra.gmra.mrb[20].mxu0 %vm143_vm0, %v23_v22 }
  0x4e   :  { %722 = vmatmul.mubr.msk.f32.vlgmr.msra.gmra.mrb[20].mxu1 %vm143_vm0, %v53_v23  ;;  %715 = vmatprep.mubr.msk.f32.mxu0 %vm143_vm0, %v28_v24 }
  0x4f   :  { %724 = vmatprep.mubr.msk.f32.mxu1 %vm143_vm0, %v58_v25 }
  0x51   :  { %716 = vmatmul.mubr.msk.f32.gmra.mrb[22].mxu0 %vm143_vm0, %v33_v26 }
  0x52   :  { %725 = vmatmul.mubr.msk.f32.gmra.mrb[22].mxu1 %vm143_vm0, %v63_v27  ;;  %718 = vmatprep.mubr.msk.f32.mxu0 %vm143_vm0, %v38_v28 }
  0x55   :  { %719 = vmatmul.mubr.msk.f32.gmra.mrb[24].mxu0 %vm143_vm0, %v43_v29 }
  0xf8   :  { %v586_v30 = vpop.f32.mrb[0].mxu0 }
  0xf9   :  { %v587_v32 = vpop.f32.mrb[1].mxu0  ;;  %v648_v33 = vpop.f32.mrb[0].mxu1 }
  0xfa   :  { %v588_v34 = vadd.f32 %v587_v32, %v586_v30  ;;  %v649_v35 = vpop.f32.mrb[1].mxu1 }
  0xfb   :  { %v650_v36 = vadd.f32 %v649_v35, %v648_v33 }
  0xfc   :  { %v241_v37 = vadd.f32 %v588_v34, %v1214_v31  ;;  %v589_v38 = vpop.f32.mrb[2].mxu0 }
  0xfd   :  { %v590_v39 = vpop.f32.mrb[3].mxu0  ;;  %v651_v40 = vpop.f32.mrb[2].mxu1 }
  0xfe   :  { %v591_v41 = vadd.f32 %v590_v39, %v589_v38  ;;  %v652_v42 = vpop.f32.mrb[3].mxu1  ;;  %v1217_v43 = vadd.f32 %v650_v36, %v241_v37 }
  0xff   :  { %v653_v44 = vadd.f32 %v652_v42, %v651_v40 }
 0x100   :  { %v246_v45 = vadd.f32 %v591_v41, %v1214_v31  ;;  %v592_v46 = vpop.f32.mrb[4].mxu0 }
 0x101   :  { %v593_v47 = vpop.f32.mrb[5].mxu0  ;;  %v654_v48 = vpop.f32.mrb[4].mxu1 }
 0x102   :  { %v594_v49 = vadd.f32 %v593_v47, %v592_v46  ;;  %v655_v50 = vpop.f32.mrb[5].mxu1  ;;  %v361_v51 = vadd.f32 %v653_v44, %v246_v45 }
 0x103   :  { %v656_v52 = vadd.f32 %v655_v50, %v654_v48 }
 0x104   :  { %v251_v53 = vadd.f32 %v594_v49, %v1214_v31  ;;  %v595_v54 = vpop.f32.mrb[6].mxu0 }
 0x105   :  { %v596_v55 = vpop.f32.mrb[7].mxu0  ;;  %v657_v56 = vpop.f32.mrb[6].mxu1 }
 0x106   :  { %v597_v57 = vadd.f32 %v596_v55, %v595_v54  ;;  %v658_v58 = vpop.f32.mrb[7].mxu1  ;;  %v1221_v59 = vadd.f32 %v656_v52, %v251_v53 }
 0x107   :  { %v659_v60 = vadd.f32 %v658_v58, %v657_v56 }
 0x108   :  { %v256_v61 = vadd.f32 %v597_v57, %v1214_v31  ;;  %v598_v62 = vpop.f32.mrb[8].mxu0 }
 0x109   :  { %v599_v63 = vpop.f32.mrb[9].mxu0  ;;  %v660_v0 = vpop.f32.mrb[8].mxu1 }
 0x10a   :  { %v600_v1 = vadd.f32 %v599_v63, %v598_v62  ;;  %v661_v2 = vpop.f32.mrb[9].mxu1  ;;  %v371_v3 = vadd.f32 %v659_v60, %v256_v61 }
 0x10b   :  { %v662_v4 = vadd.f32 %v661_v2, %v660_v0 }
 0x10c   :  { %v261_v5 = vadd.f32 %v600_v1, %v1214_v31  ;;  %v601_v6 = vpop.f32.mrb[10].mxu0 }
 0x10d   :  { %v602_v7 = vpop.f32.mrb[11].mxu0  ;;  %v663_v8 = vpop.f32.mrb[10].mxu1 }
 0x10e   :  { %v603_v9 = vadd.f32 %v602_v7, %v601_v6  ;;  %v664_v10 = vpop.f32.mrb[11].mxu1  ;;  %v1225_v11 = vadd.f32 %v662_v4, %v261_v5 }
 0x10f   :  { %v665_v12 = vadd.f32 %v664_v10, %v663_v8 }
 0x110   :  { %v266_v13 = vadd.f32 %v603_v9, %v1214_v31  ;;  %v604_v14 = vpop.f32.mrb[12].mxu0 }
 0x111   :  { %v605_v15 = vpop.f32.mrb[13].mxu0  ;;  %v666_v16 = vpop.f32.mrb[12].mxu1 }
 0x112   :  { %v606_v17 = vadd.f32 %v605_v15, %v604_v14  ;;  %v667_v18 = vpop.f32.mrb[13].mxu1  ;;  %v381_v19 = vadd.f32 %v665_v12, %v266_v13 }
 0x113   :  { %v668_v20 = vadd.f32 %v667_v18, %v666_v16 }
 0x114   :  { %v271_v21 = vadd.f32 %v606_v17, %v1214_v31  ;;  %v607_v22 = vpop.f32.mrb[14].mxu0 }
 0x115   :  { %v608_v23 = vpop.f32.mrb[15].mxu0  ;;  %v669_v24 = vpop.f32.mrb[14].mxu1 }
 0x116   :  { %v609_v25 = vadd.f32 %v608_v23, %v607_v22  ;;  %v670_v26 = vpop.f32.mrb[15].mxu1  ;;  %v386_v27 = vadd.f32 %v668_v20, %v271_v21 }
 0x117   :  { %v671_v28 = vadd.f32 %v670_v26, %v669_v24 }
 0x118   :  { %v276_v29 = vadd.f32 %v609_v25, %v1214_v31  ;;  %v610_v30 = vpop.f32.mrb[16].mxu0 }
 0x119   :  { %v611_v32 = vpop.f32.mrb[17].mxu0  ;;  %v672_v33 = vpop.f32.mrb[16].mxu1 }
 0x11a   :  { %v612_v34 = vadd.f32 %v611_v32, %v610_v30  ;;  %v673_v35 = vpop.f32.mrb[17].mxu1  ;;  %v391_v36 = vadd.f32 %v671_v28, %v276_v29 }
 0x11b   :  { %v674_v37 = vadd.f32 %v673_v35, %v672_v33 }
 0x11c   :  { %v281_v38 = vadd.f32 %v612_v34, %v1214_v31  ;;  %v613_v39 = vpop.f32.mrb[18].mxu0 }
 0x11d   :  { %v614_v40 = vpop.f32.mrb[19].mxu0  ;;  %v675_v41 = vpop.f32.mrb[18].mxu1 }
 0x11e   :  { %v615_v42 = vadd.f32 %v614_v40, %v613_v39  ;;  %v676_v44 = vpop.f32.mrb[19].mxu1  ;;  %v396_v45 = vadd.f32 %v674_v37, %v281_v38 }
 0x11f   :  { %v677_v46 = vadd.f32 %v676_v44, %v675_v41 }
 0x120   :  { %v286_v47 = vadd.f32 %v615_v42, %v1214_v31  ;;  %v714_v48 = vpop.f32.mrb[20].mxu0 }
 0x121   :  { %v476_v49 = vadd.f32 %v714_v48, %v361_v51  ;;  %v723_v50 = vpop.f32.mrb[20].mxu1  ;;  %v470_v52 = vpop.f32.mrb[21].mxu0 }
 0x122   :  { %v506_v53 = vadd.f32 %v723_v50, %v391_v36  ;;  %v471_v54 = vadd.f32 %v470_v52, %v1217_v43  ;;  %v500_v55 = vpop.f32.mrb[21].mxu1  ;;  %v401_v56 = vadd.f32 %v677_v46, %v286_v47 }
 0x123   :  { %v520_v57 = vmax.f32 %v476_v49, 0.0  ;;  %v501_v58 = vadd.f32 %v500_v55, %v386_v27 }
 0x124   :  { %v526_v60 = vmax.f32 %v506_v53, 0.0  ;;  %v519_v61 = vmax.f32 %v471_v54, 0.0  ;;  %v717_v62 = vpop.f32.mrb[22].mxu0 }
 0x125   :  { %530 = vst.msk [vmem:[%s1278_s3 + $0x8] sm:$0xff] %vm143_vm0, %v520_v57  ;;  %v525_v31 = vmax.f32 %v501_v58, 0.0  ;;  %v486_v63 = vadd.f32 %v717_v62, %v371_v3  ;;  %v726_v51 = vpop.f32.mrb[22].mxu1  ;;  %v480_v0 = vpop.f32.mrb[23].mxu0 }
 0x126   :  { %536 = vst.msk [vmem:[%s1278_s3 + $0x38] sm:$0xff] %vm143_vm0, %v526_v60  ;;  %529 = vst.msk [vmem:[%s1278_s3] sm:$0xff] %vm143_vm0, %v519_v61  ;;  %v516_v43 = vadd.f32 %v726_v51, %v401_v56  ;;  %v481_v1 = vadd.f32 %v480_v0, %v1221_v59  ;;  %v510_v2 = vpop.f32.mrb[23].mxu1 }
 0x127   :  { %535 = vst.msk [vmem:[%s1278_s3 + $0x30] sm:$0xff] %vm143_vm0, %v525_v31  ;;  %v522_v3 = vmax.f32 %v486_v63, 0.0  ;;  %v511_v4 = vadd.f32 %v510_v2, %v396_v45 }
 0x128   :  { %v528_v5 = vmax.f32 %v516_v43, 0.0  ;;  %v521_v6 = vmax.f32 %v481_v1, 0.0  ;;  %v720_v7 = vpop.f32.mrb[24].mxu0 }
 0x129   :  { %532 = vst.msk [vmem:[%s1278_s3 + $0x18] sm:$0xff] %vm143_vm0, %v522_v3  ;;  %v527_v8 = vmax.f32 %v511_v4, 0.0  ;;  %v496_v9 = vadd.f32 %v720_v7, %v381_v19  ;;  %v490_v10 = vpop.f32.mrb[25].mxu0 }
 0x12a   :  { %538 = vst.msk [vmem:[%s1278_s3 + $0x48] sm:$0xff] %vm143_vm0, %v528_v5  ;;  %531 = vst.msk [vmem:[%s1278_s3 + $0x10] sm:$0xff] %vm143_vm0, %v521_v6  ;;  %v491_v59 = vadd.f32 %v490_v10, %v1225_v11 }
 0x12b   :  { %537 = vst.msk [vmem:[%s1278_s3 + $0x40] sm:$0xff] %vm143_vm0, %v527_v8  ;;  %v524_v12 = vmax.f32 %v496_v9, 0.0 }
 0x12c   :  { %v523_v13 = vmax.f32 %v491_v59, 0.0 }
 0x12d   :  { %534 = vst.msk [vmem:[%s1278_s3 + $0x28] sm:$0xff] %vm143_vm0, %v524_v12 }
 0x12e   :  { %533 = vst.msk [vmem:[%s1278_s3 + $0x20] sm:$0xff] %vm143_vm0, %v523_v13 }

// kernel: soft_q_forward.7
= control target key start
LH: loop header
LB: loop body
LE: loop exit
PB: predicated region body
PF: predicated region fallthrough
CT: control target
= control target key end

     0   :  { %v7021_v36 = vmov 1983009808   ;;  %v36_v38 = vlaneseq  ;;  %s9195_s0 = inlined_call_operand.vmem [shape: f32[2,2560], index: 0, kind: input, shape index: {}]   ;;  %s9196_s1 = inlined_call_operand.vmem [shape: bf16[2560,512], index: 1, kind: input, shape index: {}]   ;;  %s9197_s2 = inlined_call_operand.vmem [shape: f32[1,512], index: 2, kind: input, shape index: {}]   ;;  %s9198_s3 = inlined_call_operand.vmem [shape: bf16[512,128], index: 3, kind: input, shape index: {}]   ;;  %s9199_s4 = inlined_call_operand.vmem [shape: f32[1,128], index: 4, kind: input, shape index: {}]   ;;  %s9200_s5 = inlined_call_operand.hbm [shape: f32[2,128], index: 5, kind: output, shape index: {}]  }
   0x1   :  { %v6000_v0 = vld [vmem:[%s9196_s1 + $0x4] ss:$16 sps:$4 sm:$0xff]   ;;  %v6002_v1 = vld [vmem:[%s9196_s1 + $0xc] ss:$16 sps:$4 sm:$0xff]   ;;  %v6004_v2 = vld [vmem:[%s9196_s1] ss:$16 sps:$4 sm:$0xff]   ;;  %v34_v37 = vunpack.c.l.s4 %v7021_v36 }
   0x2   :  { %4019 = vmatprep.subr.bf16.mxu0 %v6000_v0  ;;  %v6005_v3 = vld [vmem:[%s9196_s1 + $0x8] ss:$16 sps:$4 sm:$0xff]   ;;  %4429 = vmatprep.subr.bf16.mxu1 %v6002_v1  ;;  %v6006_v4 = vld [vmem:[%s9196_s1 + $0x24] ss:$16 sps:$4 sm:$0xff]   ;;  %v6008_v5 = vld [vmem:[%s9196_s1 + $0x2c] ss:$16 sps:$4 sm:$0xff]  }
   0x3   :  { %4020 = vmatpush1.bf16.msra.mxu0 %v6004_v2  ;;  %4430 = vmatpush1.bf16.msra.mxu1 %v6005_v3  ;;  %v6010_v6 = vld [vmem:[%s9196_s1 + $0x20] ss:$16 sps:$4 sm:$0xff]   ;;  %v6011_v7 = vld [vmem:[%s9196_s1 + $0x28] ss:$16 sps:$4 sm:$0xff]   ;;  %v6012_v8 = vld [vmem:[%s9196_s1 + $0x44] ss:$16 sps:$4 sm:$0xff]   ;;  %v35_v42 = vunpack.c.0.s8 %v34_v37 }
   0x4   :  { %4021 = vmatprep.subr.bf16.mxu0 %v6006_v4  ;;  %4431 = vmatprep.subr.bf16.mxu1 %v6008_v5  ;;  %v6014_v9 = vld [vmem:[%s9196_s1 + $0x4c] ss:$16 sps:$4 sm:$0xff]   ;;  %v6016_v10 = vld [vmem:[%s9196_s1 + $0x40] ss:$16 sps:$4 sm:$0xff]   ;;  %v6017_v11 = vld [vmem:[%s9196_s1 + $0x48] ss:$16 sps:$4 sm:$0xff]  }
   0x5   :  { %v6018_v12 = vld [vmem:[%s9196_s1 + $0x64] ss:$16 sps:$4 sm:$0xff]   ;;  %v6020_v13 = vld [vmem:[%s9196_s1 + $0x6c] ss:$16 sps:$4 sm:$0xff]   ;;  %v6022_v14 = vld [vmem:[%s9196_s1 + $0x60] ss:$16 sps:$4 sm:$0xff]  }
   0x6   :  { %v6023_v15 = vld [vmem:[%s9196_s1 + $0x68] ss:$16 sps:$4 sm:$0xff]   ;;  %v6024_v16 = vld [vmem:[%s9196_s1 + $0x84] ss:$16 sps:$4 sm:$0xff]   ;;  %v6026_v17 = vld [vmem:[%s9196_s1 + $0x8c] ss:$16 sps:$4 sm:$0xff]  }
   0x7   :  { %4022 = vmatpush1.bf16.msra.mxu0 %v6010_v6  ;;  %4432 = vmatpush1.bf16.msra.mxu1 %v6011_v7  ;;  %v6028_v18 = vld [vmem:[%s9196_s1 + $0x80] ss:$16 sps:$4 sm:$0xff]   ;;  %v6029_v19 = vld [vmem:[%s9196_s1 + $0x88] ss:$16 sps:$4 sm:$0xff]   ;;  %v6030_v20 = vld [vmem:[%s9196_s1 + $0xa4] ss:$16 sps:$4 sm:$0xff]  }
   0x8   :  { %4023 = vmatprep.subr.bf16.mxu0 %v6012_v8  ;;  %4433 = vmatprep.subr.bf16.mxu1 %v6014_v9  ;;  %v6032_v21 = vld [vmem:[%s9196_s1 + $0xac] ss:$16 sps:$4 sm:$0xff]   ;;  %v6034_v22 = vld [vmem:[%s9196_s1 + $0xa0] ss:$16 sps:$4 sm:$0xff]   ;;  %v6035_v23 = vld [vmem:[%s9196_s1 + $0xa8] ss:$16 sps:$4 sm:$0xff]  }
   0x9   :  { %v6036_v24 = vld [vmem:[%s9196_s1 + $0xc4] ss:$16 sps:$4 sm:$0xff]   ;;  %v6038_v25 = vld [vmem:[%s9196_s1 + $0xcc] ss:$16 sps:$4 sm:$0xff]   ;;  %v6040_v26 = vld [vmem:[%s9196_s1 + $0xc0] ss:$16 sps:$4 sm:$0xff]  }
   0xa   :  { %v6041_v27 = vld [vmem:[%s9196_s1 + $0xc8] ss:$16 sps:$4 sm:$0xff]   ;;  %v6042_v28 = vld [vmem:[%s9196_s1 + $0xe4] ss:$16 sps:$4 sm:$0xff]   ;;  %v6044_v29 = vld [vmem:[%s9196_s1 + $0xec] ss:$16 sps:$4 sm:$0xff]  }
   0xb   :  { %4024 = vmatpush1.bf16.msra.mxu0 %v6016_v10  ;;  %4434 = vmatpush1.bf16.msra.mxu1 %v6017_v11  ;;  %v6046_v30 = vld [vmem:[%s9196_s1 + $0xe0] ss:$16 sps:$4 sm:$0xff]   ;;  %v6047_v31 = vld [vmem:[%s9196_s1 + $0xe8] ss:$16 sps:$4 sm:$0xff]   ;;  %v6048_v32 = vld [vmem:[%s9196_s1 + $0x104] ss:$16 sps:$4 sm:$0xff]  }
   0xc   :  { %4025 = vmatprep.subr.bf16.mxu0 %v6018_v12  ;;  %4435 = vmatprep.subr.bf16.mxu1 %v6020_v13  ;;  %v6050_v33 = vld [vmem:[%s9196_s1 + $0x10c] ss:$16 sps:$4 sm:$0xff]   ;;  %v6052_v34 = vld [vmem:[%s9196_s1 + $0x100] ss:$16 sps:$4 sm:$0xff]   ;;  %v6053_v35 = vld [vmem:[%s9196_s1 + $0x108] ss:$16 sps:$4 sm:$0xff]  }
   0xd   :  { %v6054_v39 = vld [vmem:[%s9196_s1 + $0x124] ss:$16 sps:$4 sm:$0xff]   ;;  %v6056_v40 = vld [vmem:[%s9196_s1 + $0x12c] ss:$16 sps:$4 sm:$0xff]   ;;  %v6058_v41 = vld [vmem:[%s9196_s1 + $0x120] ss:$16 sps:$4 sm:$0xff]  }
   0xe   :  { %v7170_v43 = vshrl.u32 %v36_v38, 7  ;;  %v6059_v44 = vld [vmem:[%s9196_s1 + $0x128] ss:$16 sps:$4 sm:$0xff]   ;;  %v6060_v45 = vld [vmem:[%s9196_s1 + $0x144] ss:$16 sps:$4 sm:$0xff]  }
   0xf   :  { %4026 = vmatpush1.bf16.msra.mxu0 %v6022_v14  ;;  %4436 = vmatpush1.bf16.msra.mxu1 %v6023_v15  ;;  %v6062_v46 = vld [vmem:[%s9196_s1 + $0x14c] ss:$16 sps:$4 sm:$0xff]   ;;  %v6064_v47 = vld [vmem:[%s9196_s1 + $0x140] ss:$16 sps:$4 sm:$0xff]   ;;  %v6065_v48 = vld [vmem:[%s9196_s1 + $0x148] ss:$16 sps:$4 sm:$0xff]  }
  0x10   :  { %4027 = vmatprep.subr.bf16.mxu0 %v6024_v16  ;;  %4437 = vmatprep.subr.bf16.mxu1 %v6026_v17  ;;  %v7188_v49 = vsub.s32 %v35_v42, %v7170_v43  ;;  %v6066_v50 = vld [vmem:[%s9196_s1 + $0x164] ss:$16 sps:$4 sm:$0xff]   ;;  %v6068_v51 = vld [vmem:[%s9196_s1 + $0x16c] ss:$16 sps:$4 sm:$0xff]   ;;  %v6070_v53 = vld [vmem:[%s9196_s1 + $0x160] ss:$16 sps:$4 sm:$0xff]  }
  0x11   :  { %v22_v52 = vld [vmem:[%s9195_s0] sm:$0xff]  ;;  %v6071_v55 = vld [vmem:[%s9196_s1 + $0x168] ss:$16 sps:$4 sm:$0xff]   ;;  %v6074_v57 = vld [vmem:[%s9196_s1 + $0x18c] ss:$16 sps:$4 sm:$0xff]  }
  0x12   :  { %v39_v54 = vrot.slane %v22_v52, %v7188_v49  ;;  %v6072_v56 = vld [vmem:[%s9196_s1 + $0x184] ss:$16 sps:$4 sm:$0xff]   ;;  %v6076_v59 = vld [vmem:[%s9196_s1 + $0x180] ss:$16 sps:$4 sm:$0xff]   ;;  %v6077_v61 = vld [vmem:[%s9196_s1 + $0x188] ss:$16 sps:$4 sm:$0xff]   ;;  %v32_v4 = vcombine.high %v22_v52, %v22_v52 }
  0x13   :  { %4028 = vmatpush1.bf16.msra.mxu0 %v6028_v18  ;;  %4438 = vmatpush1.bf16.msra.mxu1 %v6029_v19  ;;  %v6078_v62 = vld [vmem:[%s9196_s1 + $0x1a4] ss:$16 sps:$4 sm:$0xff]   ;;  %v6080_v63 = vld [vmem:[%s9196_s1 + $0x1ac] ss:$16 sps:$4 sm:$0xff]   ;;  %v6082_v0 = vld [vmem:[%s9196_s1 + $0x1a0] ss:$16 sps:$4 sm:$0xff]  }
  0x14   :  { %4029 = vmatprep.subr.bf16.mxu0 %v6030_v20  ;;  %4439 = vmatprep.subr.bf16.mxu1 %v6032_v21  ;;  %v47_v58 = vcombine.high %v39_v54, %v39_v54  ;;  %v6083_v1 = vld [vmem:[%s9196_s1 + $0x1a8] ss:$16 sps:$4 sm:$0xff]   ;;  %v6084_v2 = vld [vmem:[%s9196_s1 + $0x1c4] ss:$16 sps:$4 sm:$0xff]   ;;  %v6086_v3 = vld [vmem:[%s9196_s1 + $0x1cc] ss:$16 sps:$4 sm:$0xff]   ;;  %v7249_v9 = vrot.slane %v32_v4, %v7188_v49  ;;  %v137_v16 = vpack.c.bf16 %v39_v54, %v39_v54 }
  0x15   :  { %v6088_v5 = vld [vmem:[%s9196_s1 + $0x1c0] ss:$16 sps:$4 sm:$0xff]   ;;  %v6089_v6 = vld [vmem:[%s9196_s1 + $0x1c8] ss:$16 sps:$4 sm:$0xff]   ;;  %v6090_v7 = vld [vmem:[%s9196_s1 + $0x1e4] ss:$16 sps:$4 sm:$0xff]  }
  0x16   :  { %v138_v60 = vpack.c.bf16 %v47_v58, %v47_v58  ;;  %v6092_v8 = vld [vmem:[%s9196_s1 + $0x1ec] ss:$16 sps:$4 sm:$0xff]   ;;  %v6094_v10 = vld [vmem:[%s9196_s1 + $0x1e0] ss:$16 sps:$4 sm:$0xff]   ;;  %v6095_v11 = vld [vmem:[%s9196_s1 + $0x1e8] ss:$16 sps:$4 sm:$0xff]   ;;  %v48_v14 = vcombine.high %v7249_v9, %v7249_v9 }
  0x17   :  { %4030 = vmatpush1.bf16.msra.mxu0 %v6034_v22  ;;  %4440 = vmatpush1.bf16.msra.mxu1 %v6035_v23  ;;  %v6099_v12 = vld [vmem:[%s9196_s1 + $0x204] ss:$16 sps:$4 sm:$0xff]   ;;  %v6102_v13 = vld [vmem:[%s9196_s1 + $0x20c] ss:$16 sps:$4 sm:$0xff]   ;;  %v6097_v15 = vld [vmem:[%s9196_s1 + $0x200] ss:$16 sps:$4 sm:$0xff]  }
  0x18   :  { %4031 = vmatprep.subr.bf16.mxu0 %v6036_v24  ;;  %4441 = vmatprep.subr.bf16.mxu1 %v6038_v25  ;;  %v6100_v17 = vld [vmem:[%s9196_s1 + $0x208] ss:$16 sps:$4 sm:$0xff]   ;;  %v6105_v18 = vld [vmem:[%s9196_s1 + $0x224] ss:$16 sps:$4 sm:$0xff]   ;;  %v6108_v19 = vld [vmem:[%s9196_s1 + $0x22c] ss:$16 sps:$4 sm:$0xff]   ;;  %v140_v20 = vpack.c.bf16 %v48_v14, %v48_v14 }
  0x19   :  { %4051 = vmatprep.mubr.bf16.mxu0 %v138_v60  ;;  %4461 = vmatprep.mubr.bf16.mxu1 %v138_v60  ;;  %v6103_v21 = vld [vmem:[%s9196_s1 + $0x220] ss:$16 sps:$4 sm:$0xff]   ;;  %v6106_v22 = vld [vmem:[%s9196_s1 + $0x228] ss:$16 sps:$4 sm:$0xff]   ;;  %v6111_v23 = vld [vmem:[%s9196_s1 + $0x244] ss:$16 sps:$4 sm:$0xff]  }
  0x1a   :  { %v6114_v24 = vld [vmem:[%s9196_s1 + $0x24c] ss:$16 sps:$4 sm:$0xff]   ;;  %v6109_v25 = vld [vmem:[%s9196_s1 + $0x240] ss:$16 sps:$4 sm:$0xff]   ;;  %v6130_v38 = vld [vmem:[%s9196_s1 + $0x2a8] ss:$16 sps:$4 sm:$0xff]  }
  0x1b   :  { %4032 = vmatpush1.bf16.msra.mxu0 %v6040_v26  ;;  %4442 = vmatpush1.bf16.msra.mxu1 %v6041_v27  ;;  %v6112_v26 = vld [vmem:[%s9196_s1 + $0x248] ss:$16 sps:$4 sm:$0xff]   ;;  %v6117_v27 = vld [vmem:[%s9196_s1 + $0x264] ss:$16 sps:$4 sm:$0xff]   ;;  %v6132_v36 = vld [vmem:[%s9196_s1 + $0x2ac] ss:$16 sps:$4 sm:$0xff]  }
  0x1c   :  { %4033 = vmatprep.subr.bf16.mxu0 %v6042_v28  ;;  %4443 = vmatprep.subr.bf16.mxu1 %v6044_v29  ;;  %v6120_v28 = vld [vmem:[%s9196_s1 + $0x26c] ss:$16 sps:$4 sm:$0xff]   ;;  %v6115_v29 = vld [vmem:[%s9196_s1 + $0x260] ss:$16 sps:$4 sm:$0xff]   ;;  %v6136_v42 = vld [vmem:[%s9196_s1 + $0x2c8] ss:$16 sps:$4 sm:$0xff]  }
  0x1d   :  { %v6127_v37 = vld [vmem:[%s9196_s1 + $0x2a0] ss:$16 sps:$4 sm:$0xff]   ;;  %v6148_v52 = vld [vmem:[%s9196_s1 + $0x308] ss:$16 sps:$4 sm:$0xff]   ;;  %v6156_v54 = vld [vmem:[%s9196_s1 + $0x32c] ss:$16 sps:$4 sm:$0xff]  }
  0x1e   :  { %v6162_v58 = vld [vmem:[%s9196_s1 + $0x34c] ss:$16 sps:$4 sm:$0xff]   ;;  %v6160_v60 = vld [vmem:[%s9196_s1 + $0x348] ss:$16 sps:$4 sm:$0xff]   ;;  %v6189_v14 = vld [vmem:[%s9196_s1 + $0x3e4] ss:$16 sps:$4 sm:$0xff]  }
  0x1f   :  { %4034 = vmatpush1.bf16.msra.mxu0 %v6046_v30  ;;  %4444 = vmatpush1.bf16.msra.mxu1 %v6047_v31  ;;  %v6118_v30 = vld [vmem:[%s9196_s1 + $0x268] ss:$16 sps:$4 sm:$0xff]   ;;  %v6123_v31 = vld [vmem:[%s9196_s1 + $0x284] ss:$16 sps:$4 sm:$0xff]  }
  0x20   :  { %4035 = vmatprep.subr.bf16.mxu0 %v6048_v32  ;;  %4445 = vmatprep.subr.bf16.mxu1 %v6050_v33  ;;  %v6126_v32 = vld [vmem:[%s9196_s1 + $0x28c] ss:$16 sps:$4 sm:$0xff]   ;;  %v6121_v33 = vld [vmem:[%s9196_s1 + $0x280] ss:$16 sps:$4 sm:$0xff]   ;;  %v6172_v4 = vld [vmem:[%s9196_s1 + $0x388] ss:$16 sps:$4 sm:$0xff]  }
  0x23   :  { %4036 = vmatpush1.bf16.msra.mxu0 %v6052_v34  ;;  %4446 = vmatpush1.bf16.msra.mxu1 %v6053_v35  ;;  %v6124_v34 = vld [vmem:[%s9196_s1 + $0x288] ss:$16 sps:$4 sm:$0xff]   ;;  %v6129_v35 = vld [vmem:[%s9196_s1 + $0x2a4] ss:$16 sps:$4 sm:$0xff]  }
  0x24   :  { %4037 = vmatprep.subr.bf16.mxu0 %v6054_v39  ;;  %4447 = vmatprep.subr.bf16.mxu1 %v6056_v40  ;;  %v6135_v39 = vld [vmem:[%s9196_s1 + $0x2c4] ss:$16 sps:$4 sm:$0xff]   ;;  %v6138_v40 = vld [vmem:[%s9196_s1 + $0x2cc] ss:$16 sps:$4 sm:$0xff]  }
  0x27   :  { %4038 = vmatpush1.bf16.msra.mxu0 %v6058_v41  ;;  %4448 = vmatpush1.bf16.msra.mxu1 %v6059_v44  ;;  %v6133_v41 = vld [vmem:[%s9196_s1 + $0x2c0] ss:$16 sps:$4 sm:$0xff]   ;;  %v6141_v44 = vld [vmem:[%s9196_s1 + $0x2e4] ss:$16 sps:$4 sm:$0xff]  }
  0x28   :  { %4039 = vmatprep.subr.bf16.mxu0 %v6060_v45  ;;  %4449 = vmatprep.subr.bf16.mxu1 %v6062_v46  ;;  %v6144_v45 = vld [vmem:[%s9196_s1 + $0x2ec] ss:$16 sps:$4 sm:$0xff]   ;;  %v6139_v46 = vld [vmem:[%s9196_s1 + $0x2e0] ss:$16 sps:$4 sm:$0xff]  }
  0x2b   :  { %4040 = vmatpush1.bf16.msra.mxu0 %v6064_v47  ;;  %4450 = vmatpush1.bf16.msra.mxu1 %v6065_v48  ;;  %v6142_v47 = vld [vmem:[%s9196_s1 + $0x2e8] ss:$16 sps:$4 sm:$0xff]   ;;  %v6147_v48 = vld [vmem:[%s9196_s1 + $0x304] ss:$16 sps:$4 sm:$0xff]  }
  0x2c   :  { %4041 = vmatprep.subr.bf16.mxu0 %v6066_v50  ;;  %4451 = vmatprep.subr.bf16.mxu1 %v6068_v51  ;;  %v6150_v50 = vld [vmem:[%s9196_s1 + $0x30c] ss:$16 sps:$4 sm:$0xff]   ;;  %v6145_v51 = vld [vmem:[%s9196_s1 + $0x300] ss:$16 sps:$4 sm:$0xff]  }
  0x2f   :  { %4042 = vmatpush1.bf16.msra.mxu0 %v6070_v53  ;;  %4452 = vmatpush1.bf16.msra.mxu1 %v6071_v55  ;;  %v6153_v53 = vld [vmem:[%s9196_s1 + $0x324] ss:$16 sps:$4 sm:$0xff]   ;;  %v6151_v55 = vld [vmem:[%s9196_s1 + $0x320] ss:$16 sps:$4 sm:$0xff]  }
  0x30   :  { %4043 = vmatprep.subr.bf16.mxu0 %v6072_v56  ;;  %4453 = vmatprep.subr.bf16.mxu1 %v6074_v57  ;;  %v6154_v56 = vld [vmem:[%s9196_s1 + $0x328] ss:$16 sps:$4 sm:$0xff]   ;;  %v6159_v57 = vld [vmem:[%s9196_s1 + $0x344] ss:$16 sps:$4 sm:$0xff]  }
  0x33   :  { %4044 = vmatpush1.bf16.msra.mxu0 %v6076_v59  ;;  %4454 = vmatpush1.bf16.msra.mxu1 %v6077_v61  ;;  %v6157_v59 = vld [vmem:[%s9196_s1 + $0x340] ss:$16 sps:$4 sm:$0xff]   ;;  %v6165_v61 = vld [vmem:[%s9196_s1 + $0x364] ss:$16 sps:$4 sm:$0xff]  }
  0x34   :  { %4045 = vmatprep.subr.bf16.mxu0 %v6078_v62  ;;  %4455 = vmatprep.subr.bf16.mxu1 %v6080_v63  ;;  %v6168_v62 = vld [vmem:[%s9196_s1 + $0x36c] ss:$16 sps:$4 sm:$0xff]   ;;  %v6163_v63 = vld [vmem:[%s9196_s1 + $0x360] ss:$16 sps:$4 sm:$0xff]  }
  0x37   :  { %4046 = vmatpush1.bf16.msra.mxu0 %v6082_v0  ;;  %4456 = vmatpush1.bf16.msra.mxu1 %v6083_v1  ;;  %v6166_v0 = vld [vmem:[%s9196_s1 + $0x368] ss:$16 sps:$4 sm:$0xff]   ;;  %v6171_v1 = vld [vmem:[%s9196_s1 + $0x384] ss:$16 sps:$4 sm:$0xff]  }
  0x38   :  { %4047 = vmatprep.subr.bf16.mxu0 %v6084_v2  ;;  %4457 = vmatprep.subr.bf16.mxu1 %v6086_v3  ;;  %v6174_v2 = vld [vmem:[%s9196_s1 + $0x38c] ss:$16 sps:$4 sm:$0xff]   ;;  %v6169_v3 = vld [vmem:[%s9196_s1 + $0x380] ss:$16 sps:$4 sm:$0xff]  }
  0x3b   :  { %4048 = vmatpush1.bf16.msra.mxu0 %v6088_v5  ;;  %4458 = vmatpush1.bf16.msra.mxu1 %v6089_v6  ;;  %v6177_v5 = vld [vmem:[%s9196_s1 + $0x3a4] ss:$16 sps:$4 sm:$0xff]   ;;  %v6180_v6 = vld [vmem:[%s9196_s1 + $0x3ac] ss:$16 sps:$4 sm:$0xff]  }
  0x3c   :  { %4049 = vmatprep.subr.bf16.mxu0 %v6090_v7  ;;  %4459 = vmatprep.subr.bf16.mxu1 %v6092_v8  ;;  %v6175_v7 = vld [vmem:[%s9196_s1 + $0x3a0] ss:$16 sps:$4 sm:$0xff]   ;;  %v6178_v8 = vld [vmem:[%s9196_s1 + $0x3a8] ss:$16 sps:$4 sm:$0xff]  }
  0x3f   :  { %4050 = vmatpush1.bf16.msra.mxu0 %v6094_v10  ;;  %4460 = vmatpush1.bf16.msra.mxu1 %v6095_v11  ;;  %v6183_v10 = vld [vmem:[%s9196_s1 + $0x3c4] ss:$16 sps:$4 sm:$0xff]   ;;  %v6186_v11 = vld [vmem:[%s9196_s1 + $0x3cc] ss:$16 sps:$4 sm:$0xff]  }
  0x40   :  { %4060 = vmatprep.subr.bf16.mxu0 %v6099_v12  ;;  %4470 = vmatprep.subr.bf16.mxu1 %v6102_v13  ;;  %v6181_v12 = vld [vmem:[%s9196_s1 + $0x3c0] ss:$16 sps:$4 sm:$0xff]   ;;  %v6184_v13 = vld [vmem:[%s9196_s1 + $0x3c8] ss:$16 sps:$4 sm:$0xff]  }
  0x42   :  { %4052 = vmatmul.mubr.bf16.vlgmr.msra.gmra.mrb[0].mxu0 %v137_v16  ;;  %4462 = vmatmul.mubr.bf16.vlgmr.msra.gmra.mrb[0].mxu1 %v137_v16  ;;  %v6187_v16 = vld [vmem:[%s9196_s1 + $0x3e0] ss:$16 sps:$4 sm:$0xff]  }
  0x43   :  { %4061 = vmatpush1.bf16.msra.mxu0 %v6097_v15  ;;  %4471 = vmatpush1.bf16.msra.mxu1 %v6100_v17  ;;  %v6192_v15 = vld [vmem:[%s9196_s1 + $0x3ec] ss:$16 sps:$4 sm:$0xff]   ;;  %v6190_v17 = vld [vmem:[%s9196_s1 + $0x3e8] ss:$16 sps:$4 sm:$0xff]  }
  0x44   :  { %4062 = vmatprep.subr.bf16.mxu0 %v6105_v18  ;;  %4472 = vmatprep.subr.bf16.mxu1 %v6108_v19  ;;  %v6195_v18 = vld [vmem:[%s9196_s1 + $0x404] ss:$16 sps:$4 sm:$0xff]   ;;  %v6198_v19 = vld [vmem:[%s9196_s1 + $0x40c] ss:$16 sps:$4 sm:$0xff]  }
  0x45   :  { %4092 = vmatprep.mubr.bf16.mxu0 %v140_v20  ;;  %4502 = vmatprep.mubr.bf16.mxu1 %v140_v20  ;;  %v6193_v20 = vld [vmem:[%s9196_s1 + $0x400] ss:$16 sps:$4 sm:$0xff]  }
  0x47   :  { %4063 = vmatpush1.bf16.msra.mxu0 %v6103_v21  ;;  %4473 = vmatpush1.bf16.msra.mxu1 %v6106_v22  ;;  %v139_v21 = vpack.c.bf16 %v7249_v9, %v7249_v9  ;;  %v6196_v22 = vld [vmem:[%s9196_s1 + $0x408] ss:$16 sps:$4 sm:$0xff]   ;;  %v6204_v9 = vld [vmem:[%s9196_s1 + $0x42c] ss:$16 sps:$4 sm:$0xff]  }
  0x48   :  { %4064 = vmatprep.subr.bf16.mxu0 %v6111_v23  ;;  %4474 = vmatprep.subr.bf16.mxu1 %v6114_v24  ;;  %v7468_v23 = vld [vmem:[%s9195_s0 + $0x8] sm:$0xff]  ;;  %v6201_v24 = vld [vmem:[%s9196_s1 + $0x424] ss:$16 sps:$4 sm:$0xff]  }
  0x4b   :  { %4065 = vmatpush1.bf16.msra.mxu0 %v6109_v25  ;;  %4475 = vmatpush1.bf16.msra.mxu1 %v6112_v26  ;;  %v7478_v25 = vrot.slane %v7468_v23, %v7188_v49 }
  0x4c   :  { %4066 = vmatprep.subr.bf16.mxu0 %v6117_v27  ;;  %4476 = vmatprep.subr.bf16.mxu1 %v6120_v28  ;;  %v6199_v27 = vld [vmem:[%s9196_s1 + $0x420] ss:$16 sps:$4 sm:$0xff]   ;;  %v6202_v28 = vld [vmem:[%s9196_s1 + $0x428] ss:$16 sps:$4 sm:$0xff]  }
  0x4d   :  { %v64_v26 = vcombine.high %v7478_v25, %v7478_v25 }
  0x4f   :  { %4067 = vmatpush1.bf16.msra.mxu0 %v6115_v29  ;;  %4477 = vmatpush1.bf16.msra.mxu1 %v6118_v30  ;;  %v6207_v29 = vld [vmem:[%s9196_s1 + $0x444] ss:$16 sps:$4 sm:$0xff]   ;;  %v6210_v30 = vld [vmem:[%s9196_s1 + $0x44c] ss:$16 sps:$4 sm:$0xff]  }
  0x50   :  { %4068 = vmatprep.subr.bf16.mxu0 %v6123_v31  ;;  %4478 = vmatprep.subr.bf16.mxu1 %v6126_v32  ;;  %v142_v31 = vpack.c.bf16 %v64_v26, %v64_v26  ;;  %v6205_v32 = vld [vmem:[%s9196_s1 + $0x440] ss:$16 sps:$4 sm:$0xff]   ;;  %v6286_v26 = vld [vmem:[%s9196_s1 + $0x5e8] ss:$16 sps:$4 sm:$0xff]  }
  0x53   :  { %4069 = vmatpush1.bf16.msra.mxu0 %v6121_v33  ;;  %4479 = vmatpush1.bf16.msra.mxu1 %v6124_v34  ;;  %v6208_v33 = vld [vmem:[%s9196_s1 + $0x448] ss:$16 sps:$4 sm:$0xff]   ;;  %v6213_v34 = vld [vmem:[%s9196_s1 + $0x464] ss:$16 sps:$4 sm:$0xff]  }
  0x54   :  { %4070 = vmatprep.subr.bf16.mxu0 %v6129_v35  ;;  %4480 = vmatprep.subr.bf16.mxu1 %v6132_v36  ;;  %v6216_v35 = vld [vmem:[%s9196_s1 + $0x46c] ss:$16 sps:$4 sm:$0xff]   ;;  %v6211_v36 = vld [vmem:[%s9196_s1 + $0x460] ss:$16 sps:$4 sm:$0xff]  }
  0x57   :  { %4071 = vmatpush1.bf16.msra.mxu0 %v6127_v37  ;;  %4481 = vmatpush1.bf16.msra.mxu1 %v6130_v38  ;;  %v6214_v37 = vld [vmem:[%s9196_s1 + $0x468] ss:$16 sps:$4 sm:$0xff]   ;;  %v6219_v38 = vld [vmem:[%s9196_s1 + $0x484] ss:$16 sps:$4 sm:$0xff]  }
  0x58   :  { %4072 = vmatprep.subr.bf16.mxu0 %v6135_v39  ;;  %4482 = vmatprep.subr.bf16.mxu1 %v6138_v40  ;;  %v6222_v39 = vld [vmem:[%s9196_s1 + $0x48c] ss:$16 sps:$4 sm:$0xff]   ;;  %v6217_v40 = vld [vmem:[%s9196_s1 + $0x480] ss:$16 sps:$4 sm:$0xff]  }
  0x5b   :  { %4073 = vmatpush1.bf16.msra.mxu0 %v6133_v41  ;;  %4483 = vmatpush1.bf16.msra.mxu1 %v6136_v42  ;;  %v6220_v41 = vld [vmem:[%s9196_s1 + $0x488] ss:$16 sps:$4 sm:$0xff]   ;;  %v6225_v42 = vld [vmem:[%s9196_s1 + $0x4a4] ss:$16 sps:$4 sm:$0xff]  }
  0x5c   :  { %4074 = vmatprep.subr.bf16.mxu0 %v6141_v44  ;;  %4484 = vmatprep.subr.bf16.mxu1 %v6144_v45  ;;  %v6228_v44 = vld [vmem:[%s9196_s1 + $0x4ac] ss:$16 sps:$4 sm:$0xff]   ;;  %v6223_v45 = vld [vmem:[%s9196_s1 + $0x4a0] ss:$16 sps:$4 sm:$0xff]  }
  0x5f   :  { %4075 = vmatpush1.bf16.msra.mxu0 %v6139_v46  ;;  %4485 = vmatpush1.bf16.msra.mxu1 %v6142_v47  ;;  %v6226_v46 = vld [vmem:[%s9196_s1 + $0x4a8] ss:$16 sps:$4 sm:$0xff]   ;;  %v6231_v47 = vld [vmem:[%s9196_s1 + $0x4c4] ss:$16 sps:$4 sm:$0xff]  }
  0x60   :  { %4076 = vmatprep.subr.bf16.mxu0 %v6147_v48  ;;  %4486 = vmatprep.subr.bf16.mxu1 %v6150_v50  ;;  %v6234_v48 = vld [vmem:[%s9196_s1 + $0x4cc] ss:$16 sps:$4 sm:$0xff]   ;;  %v6229_v50 = vld [vmem:[%s9196_s1 + $0x4c0] ss:$16 sps:$4 sm:$0xff]  }
  0x63   :  { %4077 = vmatpush1.bf16.msra.mxu0 %v6145_v51  ;;  %4487 = vmatpush1.bf16.msra.mxu1 %v6148_v52  ;;  %v6232_v51 = vld [vmem:[%s9196_s1 + $0x4c8] ss:$16 sps:$4 sm:$0xff]   ;;  %v6237_v52 = vld [vmem:[%s9196_s1 + $0x4e4] ss:$16 sps:$4 sm:$0xff]  }
  0x64   :  { %4078 = vmatprep.subr.bf16.mxu0 %v6153_v53  ;;  %4488 = vmatprep.subr.bf16.mxu1 %v6156_v54  ;;  %v6240_v53 = vld [vmem:[%s9196_s1 + $0x4ec] ss:$16 sps:$4 sm:$0xff]   ;;  %v6235_v54 = vld [vmem:[%s9196_s1 + $0x4e0] ss:$16 sps:$4 sm:$0xff]  }
  0x67   :  { %4079 = vmatpush1.bf16.msra.mxu0 %v6151_v55  ;;  %4489 = vmatpush1.bf16.msra.mxu1 %v6154_v56  ;;  %v6238_v55 = vld [vmem:[%s9196_s1 + $0x4e8] ss:$16 sps:$4 sm:$0xff]   ;;  %v6243_v56 = vld [vmem:[%s9196_s1 + $0x504] ss:$16 sps:$4 sm:$0xff]  }
  0x68   :  { %4080 = vmatprep.subr.bf16.mxu0 %v6159_v57  ;;  %4490 = vmatprep.subr.bf16.mxu1 %v6162_v58  ;;  %v6246_v57 = vld [vmem:[%s9196_s1 + $0x50c] ss:$16 sps:$4 sm:$0xff]   ;;  %v6241_v58 = vld [vmem:[%s9196_s1 + $0x500] ss:$16 sps:$4 sm:$0xff]  }
  0x6b   :  { %4081 = vmatpush1.bf16.msra.mxu0 %v6157_v59  ;;  %4491 = vmatpush1.bf16.msra.mxu1 %v6160_v60  ;;  %v6244_v59 = vld [vmem:[%s9196_s1 + $0x508] ss:$16 sps:$4 sm:$0xff]   ;;  %v6249_v60 = vld [vmem:[%s9196_s1 + $0x524] ss:$16 sps:$4 sm:$0xff]  }
  0x6c   :  { %4082 = vmatprep.subr.bf16.mxu0 %v6165_v61  ;;  %4492 = vmatprep.subr.bf16.mxu1 %v6168_v62  ;;  %v6252_v61 = vld [vmem:[%s9196_s1 + $0x52c] ss:$16 sps:$4 sm:$0xff]   ;;  %v6247_v62 = vld [vmem:[%s9196_s1 + $0x520] ss:$16 sps:$4 sm:$0xff]  }
  0x6f   :  { %4083 = vmatpush1.bf16.msra.mxu0 %v6163_v63  ;;  %4493 = vmatpush1.bf16.msra.mxu1 %v6166_v0  ;;  %v6250_v63 = vld [vmem:[%s9196_s1 + $0x528] ss:$16 sps:$4 sm:$0xff]   ;;  %v6255_v0 = vld [vmem:[%s9196_s1 + $0x544] ss:$16 sps:$4 sm:$0xff]  }
  0x70   :  { %4084 = vmatprep.subr.bf16.mxu0 %v6171_v1  ;;  %4494 = vmatprep.subr.bf16.mxu1 %v6174_v2  ;;  %v6258_v1 = vld [vmem:[%s9196_s1 + $0x54c] ss:$16 sps:$4 sm:$0xff]   ;;  %v6253_v2 = vld [vmem:[%s9196_s1 + $0x540] ss:$16 sps:$4 sm:$0xff]  }
  0x73   :  { %4085 = vmatpush1.bf16.msra.mxu0 %v6169_v3  ;;  %4495 = vmatpush1.bf16.msra.mxu1 %v6172_v4  ;;  %v6256_v3 = vld [vmem:[%s9196_s1 + $0x548] ss:$16 sps:$4 sm:$0xff]   ;;  %v6261_v4 = vld [vmem:[%s9196_s1 + $0x564] ss:$16 sps:$4 sm:$0xff]  }
  0x74   :  { %4086 = vmatprep.subr.bf16.mxu0 %v6177_v5  ;;  %4496 = vmatprep.subr.bf16.mxu1 %v6180_v6  ;;  %v6264_v5 = vld [vmem:[%s9196_s1 + $0x56c] ss:$16 sps:$4 sm:$0xff]   ;;  %v6259_v6 = vld [vmem:[%s9196_s1 + $0x560] ss:$16 sps:$4 sm:$0xff]  }
  0x77   :  { %4087 = vmatpush1.bf16.msra.mxu0 %v6175_v7  ;;  %4497 = vmatpush1.bf16.msra.mxu1 %v6178_v8  ;;  %v6262_v7 = vld [vmem:[%s9196_s1 + $0x568] ss:$16 sps:$4 sm:$0xff]   ;;  %v6267_v8 = vld [vmem:[%s9196_s1 + $0x584] ss:$16 sps:$4 sm:$0xff]  }
  0x78   :  { %4088 = vmatprep.subr.bf16.mxu0 %v6183_v10  ;;  %4498 = vmatprep.subr.bf16.mxu1 %v6186_v11  ;;  %v6270_v10 = vld [vmem:[%s9196_s1 + $0x58c] ss:$16 sps:$4 sm:$0xff]   ;;  %v6265_v11 = vld [vmem:[%s9196_s1 + $0x580] ss:$16 sps:$4 sm:$0xff]  }
  0x7b   :  { %4089 = vmatpush1.bf16.msra.mxu0 %v6181_v12  ;;  %4499 = vmatpush1.bf16.msra.mxu1 %v6184_v13  ;;  %v6268_v12 = vld [vmem:[%s9196_s1 + $0x588] ss:$16 sps:$4 sm:$0xff]   ;;  %v6273_v13 = vld [vmem:[%s9196_s1 + $0x5a4] ss:$16 sps:$4 sm:$0xff]  }
  0x7c   :  { %4090 = vmatprep.subr.bf16.mxu0 %v6189_v14  ;;  %4500 = vmatprep.subr.bf16.mxu1 %v6192_v15  ;;  %v6276_v14 = vld [vmem:[%s9196_s1 + $0x5ac] ss:$16 sps:$4 sm:$0xff]   ;;  %v6271_v15 = vld [vmem:[%s9196_s1 + $0x5a0] ss:$16 sps:$4 sm:$0xff]  }
  0x7f   :  { %4091 = vmatpush1.bf16.msra.mxu0 %v6187_v16  ;;  %4501 = vmatpush1.bf16.msra.mxu1 %v6190_v17  ;;  %v6274_v16 = vld [vmem:[%s9196_s1 + $0x5a8] ss:$16 sps:$4 sm:$0xff]   ;;  %v6279_v17 = vld [vmem:[%s9196_s1 + $0x5c4] ss:$16 sps:$4 sm:$0xff]  }
  0x80   :  { %4101 = vmatprep.subr.bf16.mxu0 %v6195_v18  ;;  %4511 = vmatprep.subr.bf16.mxu1 %v6198_v19  ;;  %v6282_v18 = vld [vmem:[%s9196_s1 + $0x5cc] ss:$16 sps:$4 sm:$0xff]   ;;  %v49_v19 = vcombine.high %v7468_v23, %v7468_v23 }
  0x81   :  { %v6288_v23 = vld [vmem:[%s9196_s1 + $0x5ec] ss:$16 sps:$4 sm:$0xff]  }
  0x82   :  { %4093 = vmatmul.mubr.bf16.vlgmr.msra.gmra.mrb[0].mxu0 %v139_v21  ;;  %4503 = vmatmul.mubr.bf16.vlgmr.msra.gmra.mrb[0].mxu1 %v139_v21  ;;  %v6280_v21 = vld [vmem:[%s9196_s1 + $0x5c8] ss:$16 sps:$4 sm:$0xff]  }
  0x83   :  { %4102 = vmatpush1.bf16.msra.mxu0 %v6193_v20  ;;  %4512 = vmatpush1.bf16.msra.mxu1 %v6196_v22  ;;  %v6277_v20 = vld [vmem:[%s9196_s1 + $0x5c0] ss:$16 sps:$4 sm:$0xff]   ;;  %v6285_v22 = vld [vmem:[%s9196_s1 + $0x5e4] ss:$16 sps:$4 sm:$0xff]  }
  0x84   :  { %4103 = vmatprep.subr.bf16.mxu0 %v6201_v24  ;;  %4513 = vmatprep.subr.bf16.mxu1 %v6204_v9  ;;  %v7653_v24 = vrot.slane %v49_v19, %v7188_v49  ;;  %v6283_v9 = vld [vmem:[%s9196_s1 + $0x5e0] ss:$16 sps:$4 sm:$0xff]   ;;  %v6364_v19 = vld [vmem:[%s9196_s1 + $0x788] ss:$16 sps:$4 sm:$0xff]  }
  0x85   :  { %4133 = vmatprep.mubr.bf16.mxu0 %v142_v31  ;;  %4543 = vmatprep.mubr.bf16.mxu1 %v142_v31  ;;  %v6289_v31 = vld [vmem:[%s9196_s1 + $0x600] ss:$16 sps:$4 sm:$0xff]  }
  0x87   :  { %4104 = vmatpush1.bf16.msra.mxu0 %v6199_v27  ;;  %4514 = vmatpush1.bf16.msra.mxu1 %v6202_v28  ;;  %v6291_v27 = vld [vmem:[%s9196_s1 + $0x604] ss:$16 sps:$4 sm:$0xff]   ;;  %v6294_v28 = vld [vmem:[%s9196_s1 + $0x60c] ss:$16 sps:$4 sm:$0xff]  }
  0x88   :  { %4105 = vmatprep.subr.bf16.mxu0 %v6207_v29  ;;  %4515 = vmatprep.subr.bf16.mxu1 %v6210_v30  ;;  %v65_v29 = vcombine.high %v7653_v24, %v7653_v24  ;;  %v141_v30 = vpack.c.bf16 %v7478_v25, %v7478_v25  ;;  %v6300_v25 = vld [vmem:[%s9196_s1 + $0x62c] ss:$16 sps:$4 sm:$0xff]  }
  0x8b   :  { %4106 = vmatpush1.bf16.msra.mxu0 %v6205_v32  ;;  %4516 = vmatpush1.bf16.msra.mxu1 %v6208_v33  ;;  %v6292_v32 = vld [vmem:[%s9196_s1 + $0x608] ss:$16 sps:$4 sm:$0xff]   ;;  %v6297_v33 = vld [vmem:[%s9196_s1 + $0x624] ss:$16 sps:$4 sm:$0xff]  }
  0x8c   :  { %4107 = vmatprep.subr.bf16.mxu0 %v6213_v34  ;;  %4517 = vmatprep.subr.bf16.mxu1 %v6216_v35  ;;  %v144_v34 = vpack.c.bf16 %v65_v29, %v65_v29  ;;  %v6295_v35 = vld [vmem:[%s9196_s1 + $0x620] ss:$16 sps:$4 sm:$0xff]   ;;  %v6376_v29 = vld [vmem:[%s9196_s1 + $0x7c8] ss:$16 sps:$4 sm:$0xff]  }
  0x8f   :  { %4108 = vmatpush1.bf16.msra.mxu0 %v6211_v36  ;;  %4518 = vmatpush1.bf16.msra.mxu1 %v6214_v37  ;;  %v6298_v36 = vld [vmem:[%s9196_s1 + $0x628] ss:$16 sps:$4 sm:$0xff]   ;;  %v6303_v37 = vld [vmem:[%s9196_s1 + $0x644] ss:$16 sps:$4 sm:$0xff]  }
  0x90   :  { %4109 = vmatprep.subr.bf16.mxu0 %v6219_v38  ;;  %4519 = vmatprep.subr.bf16.mxu1 %v6222_v39  ;;  %v6306_v38 = vld [vmem:[%s9196_s1 + $0x64c] ss:$16 sps:$4 sm:$0xff]   ;;  %v6301_v39 = vld [vmem:[%s9196_s1 + $0x640] ss:$16 sps:$4 sm:$0xff]  }
  0x93   :  { %4110 = vmatpush1.bf16.msra.mxu0 %v6217_v40  ;;  %4520 = vmatpush1.bf16.msra.mxu1 %v6220_v41  ;;  %v6304_v40 = vld [vmem:[%s9196_s1 + $0x648] ss:$16 sps:$4 sm:$0xff]   ;;  %v6309_v41 = vld [vmem:[%s9196_s1 + $0x664] ss:$16 sps:$4 sm:$0xff]  }
  0x94   :  { %4111 = vmatprep.subr.bf16.mxu0 %v6225_v42  ;;  %4521 = vmatprep.subr.bf16.mxu1 %v6228_v44  ;;  %v6312_v42 = vld [vmem:[%s9196_s1 + $0x66c] ss:$16 sps:$4 sm:$0xff]   ;;  %v6307_v44 = vld [vmem:[%s9196_s1 + $0x660] ss:$16 sps:$4 sm:$0xff]  }
  0x97   :  { %4112 = vmatpush1.bf16.msra.mxu0 %v6223_v45  ;;  %4522 = vmatpush1.bf16.msra.mxu1 %v6226_v46  ;;  %v6310_v45 = vld [vmem:[%s9196_s1 + $0x668] ss:$16 sps:$4 sm:$0xff]   ;;  %v6315_v46 = vld [vmem:[%s9196_s1 + $0x684] ss:$16 sps:$4 sm:$0xff]  }
  0x98   :  { %4113 = vmatprep.subr.bf16.mxu0 %v6231_v47  ;;  %4523 = vmatprep.subr.bf16.mxu1 %v6234_v48  ;;  %v6318_v47 = vld [vmem:[%s9196_s1 + $0x68c] ss:$16 sps:$4 sm:$0xff]   ;;  %v6313_v48 = vld [vmem:[%s9196_s1 + $0x680] ss:$16 sps:$4 sm:$0xff]  }
  0x9b   :  { %4114 = vmatpush1.bf16.msra.mxu0 %v6229_v50  ;;  %4524 = vmatpush1.bf16.msra.mxu1 %v6232_v51  ;;  %v6316_v50 = vld [vmem:[%s9196_s1 + $0x688] ss:$16 sps:$4 sm:$0xff]   ;;  %v6321_v51 = vld [vmem:[%s9196_s1 + $0x6a4] ss:$16 sps:$4 sm:$0xff]  }
  0x9c   :  { %4115 = vmatprep.subr.bf16.mxu0 %v6237_v52  ;;  %4525 = vmatprep.subr.bf16.mxu1 %v6240_v53  ;;  %v6324_v52 = vld [vmem:[%s9196_s1 + $0x6ac] ss:$16 sps:$4 sm:$0xff]   ;;  %v6319_v53 = vld [vmem:[%s9196_s1 + $0x6a0] ss:$16 sps:$4 sm:$0xff]  }
  0x9f   :  { %4116 = vmatpush1.bf16.msra.mxu0 %v6235_v54  ;;  %4526 = vmatpush1.bf16.msra.mxu1 %v6238_v55  ;;  %v6322_v54 = vld [vmem:[%s9196_s1 + $0x6a8] ss:$16 sps:$4 sm:$0xff]   ;;  %v6327_v55 = vld [vmem:[%s9196_s1 + $0x6c4] ss:$16 sps:$4 sm:$0xff]  }
  0xa0   :  { %4117 = vmatprep.subr.bf16.mxu0 %v6243_v56  ;;  %4527 = vmatprep.subr.bf16.mxu1 %v6246_v57  ;;  %v6330_v56 = vld [vmem:[%s9196_s1 + $0x6cc] ss:$16 sps:$4 sm:$0xff]   ;;  %v6325_v57 = vld [vmem:[%s9196_s1 + $0x6c0] ss:$16 sps:$4 sm:$0xff]  }
  0xa3   :  { %4118 = vmatpush1.bf16.msra.mxu0 %v6241_v58  ;;  %4528 = vmatpush1.bf16.msra.mxu1 %v6244_v59  ;;  %v6328_v58 = vld [vmem:[%s9196_s1 + $0x6c8] ss:$16 sps:$4 sm:$0xff]   ;;  %v6333_v59 = vld [vmem:[%s9196_s1 + $0x6e4] ss:$16 sps:$4 sm:$0xff]  }
  0xa4   :  { %4119 = vmatprep.subr.bf16.mxu0 %v6249_v60  ;;  %4529 = vmatprep.subr.bf16.mxu1 %v6252_v61  ;;  %v6336_v60 = vld [vmem:[%s9196_s1 + $0x6ec] ss:$16 sps:$4 sm:$0xff]   ;;  %v6331_v61 = vld [vmem:[%s9196_s1 + $0x6e0] ss:$16 sps:$4 sm:$0xff]  }
  0xa7   :  { %4120 = vmatpush1.bf16.msra.mxu0 %v6247_v62  ;;  %4530 = vmatpush1.bf16.msra.mxu1 %v6250_v63  ;;  %v6334_v62 = vld [vmem:[%s9196_s1 + $0x6e8] ss:$16 sps:$4 sm:$0xff]   ;;  %v6339_v63 = vld [vmem:[%s9196_s1 + $0x704] ss:$16 sps:$4 sm:$0xff]  }
  0xa8   :  { %4121 = vmatprep.subr.bf16.mxu0 %v6255_v0  ;;  %4531 = vmatprep.subr.bf16.mxu1 %v6258_v1  ;;  %v6342_v0 = vld [vmem:[%s9196_s1 + $0x70c] ss:$16 sps:$4 sm:$0xff]   ;;  %v6337_v1 = vld [vmem:[%s9196_s1 + $0x700] ss:$16 sps:$4 sm:$0xff]  }
  0xab   :  { %4122 = vmatpush1.bf16.msra.mxu0 %v6253_v2  ;;  %4532 = vmatpush1.bf16.msra.mxu1 %v6256_v3  ;;  %v6340_v2 = vld [vmem:[%s9196_s1 + $0x708] ss:$16 sps:$4 sm:$0xff]   ;;  %v6345_v3 = vld [vmem:[%s9196_s1 + $0x724] ss:$16 sps:$4 sm:$0xff]  }
  0xac   :  { %4123 = vmatprep.subr.bf16.mxu0 %v6261_v4  ;;  %4533 = vmatprep.subr.bf16.mxu1 %v6264_v5  ;;  %v6348_v4 = vld [vmem:[%s9196_s1 + $0x72c] ss:$16 sps:$4 sm:$0xff]   ;;  %v6343_v5 = vld [vmem:[%s9196_s1 + $0x720] ss:$16 sps:$4 sm:$0xff]  }
  0xaf   :  { %4124 = vmatpush1.bf16.msra.mxu0 %v6259_v6  ;;  %4534 = vmatpush1.bf16.msra.mxu1 %v6262_v7  ;;  %v6346_v6 = vld [vmem:[%s9196_s1 + $0x728] ss:$16 sps:$4 sm:$0xff]   ;;  %v6351_v7 = vld [vmem:[%s9196_s1 + $0x744] ss:$16 sps:$4 sm:$0xff]  }
  0xb0   :  { %4125 = vmatprep.subr.bf16.mxu0 %v6267_v8  ;;  %4535 = vmatprep.subr.bf16.mxu1 %v6270_v10  ;;  %v6354_v8 = vld [vmem:[%s9196_s1 + $0x74c] ss:$16 sps:$4 sm:$0xff]   ;;  %v6349_v10 = vld [vmem:[%s9196_s1 + $0x740] ss:$16 sps:$4 sm:$0xff]  }
  0xb3   :  { %4126 = vmatpush1.bf16.msra.mxu0 %v6265_v11  ;;  %4536 = vmatpush1.bf16.msra.mxu1 %v6268_v12  ;;  %v6352_v11 = vld [vmem:[%s9196_s1 + $0x748] ss:$16 sps:$4 sm:$0xff]   ;;  %v6357_v12 = vld [vmem:[%s9196_s1 + $0x764] ss:$16 sps:$4 sm:$0xff]  }
  0xb4   :  { %4127 = vmatprep.subr.bf16.mxu0 %v6273_v13  ;;  %4537 = vmatprep.subr.bf16.mxu1 %v6276_v14  ;;  %v6360_v13 = vld [vmem:[%s9196_s1 + $0x76c] ss:$16 sps:$4 sm:$0xff]   ;;  %v6355_v14 = vld [vmem:[%s9196_s1 + $0x760] ss:$16 sps:$4 sm:$0xff]  }
  0xb7   :  { %4128 = vmatpush1.bf16.msra.mxu0 %v6271_v15  ;;  %4538 = vmatpush1.bf16.msra.mxu1 %v6274_v16  ;;  %v6358_v15 = vld [vmem:[%s9196_s1 + $0x768] ss:$16 sps:$4 sm:$0xff]   ;;  %v6363_v16 = vld [vmem:[%s9196_s1 + $0x784] ss:$16 sps:$4 sm:$0xff]  }
  0xb8   :  { %4129 = vmatprep.subr.bf16.mxu0 %v6279_v17  ;;  %4539 = vmatprep.subr.bf16.mxu1 %v6282_v18  ;;  %v6366_v17 = vld [vmem:[%s9196_s1 + $0x78c] ss:$16 sps:$4 sm:$0xff]   ;;  %v6361_v18 = vld [vmem:[%s9196_s1 + $0x780] ss:$16 sps:$4 sm:$0xff]  }
  0xbb   :  { %4130 = vmatpush1.bf16.msra.mxu0 %v6277_v20  ;;  %4540 = vmatpush1.bf16.msra.mxu1 %v6280_v21  ;;  %v6369_v20 = vld [vmem:[%s9196_s1 + $0x7a4] ss:$16 sps:$4 sm:$0xff]   ;;  %v6372_v21 = vld [vmem:[%s9196_s1 + $0x7ac] ss:$16 sps:$4 sm:$0xff]  }
  0xbc   :  { %4131 = vmatprep.subr.bf16.mxu0 %v6285_v22  ;;  %4541 = vmatprep.subr.bf16.mxu1 %v6288_v23  ;;  %v6367_v22 = vld [vmem:[%s9196_s1 + $0x7a0] ss:$16 sps:$4 sm:$0xff]   ;;  %v6370_v23 = vld [vmem:[%s9196_s1 + $0x7a8] ss:$16 sps:$4 sm:$0xff]  }
  0xbf   :  { %4132 = vmatpush1.bf16.msra.mxu0 %v6283_v9  ;;  %4542 = vmatpush1.bf16.msra.mxu1 %v6286_v26  ;;  %v6375_v9 = vld [vmem:[%s9196_s1 + $0x7c4] ss:$16 sps:$4 sm:$0xff]   ;;  %v6378_v26 = vld [vmem:[%s9196_s1 + $0x7cc] ss:$16 sps:$4 sm:$0xff]  }
  0xc0   :  { %4142 = vmatprep.subr.bf16.mxu0 %v6291_v27  ;;  %4552 = vmatprep.subr.bf16.mxu1 %v6294_v28  ;;  %v6373_v27 = vld [vmem:[%s9196_s1 + $0x7c0] ss:$16 sps:$4 sm:$0xff]  }
  0xc1   :  { %v7845_v28 = vld [vmem:[%s9195_s0 + $0x10] sm:$0xff] }
  0xc2   :  { %4134 = vmatmul.mubr.bf16.vlgmr.msra.gmra.mrb[0].mxu0 %v141_v30  ;;  %4544 = vmatmul.mubr.bf16.vlgmr.msra.gmra.mrb[0].mxu1 %v141_v30  ;;  %v6381_v30 = vld [vmem:[%s9196_s1 + $0x7e4] ss:$16 sps:$4 sm:$0xff]  }
  0xc3   :  { %4143 = vmatpush1.bf16.msra.mxu0 %v6289_v31  ;;  %4553 = vmatpush1.bf16.msra.mxu1 %v6292_v32  ;;  %v6384_v31 = vld [vmem:[%s9196_s1 + $0x7ec] ss:$16 sps:$4 sm:$0xff]   ;;  %v7858_v32 = vrot.slane %v7845_v28, %v7188_v49 }
  0xc4   :  { %4144 = vmatprep.subr.bf16.mxu0 %v6297_v33  ;;  %4554 = vmatprep.subr.bf16.mxu1 %v6300_v25  ;;  %v6379_v33 = vld [vmem:[%s9196_s1 + $0x7e0] ss:$16 sps:$4 sm:$0xff]   ;;  %v6382_v25 = vld [vmem:[%s9196_s1 + $0x7e8] ss:$16 sps:$4 sm:$0xff]  }
  0xc5   :  { %4174 = vmatprep.mubr.bf16.mxu0 %v144_v34  ;;  %4584 = vmatprep.mubr.bf16.mxu1 %v144_v34  ;;  %v6388_v34 = vld [vmem:[%s9196_s1 + $0x804] ss:$16 sps:$4 sm:$0xff]  }
  0xc7   :  { %4145 = vmatpush1.bf16.msra.mxu0 %v6295_v35  ;;  %4555 = vmatpush1.bf16.msra.mxu1 %v6298_v36  ;;  %v6391_v35 = vld [vmem:[%s9196_s1 + $0x80c] ss:$16 sps:$4 sm:$0xff]   ;;  %v81_v36 = vcombine.high %v7858_v32, %v7858_v32 }
  0xc8   :  { %4146 = vmatprep.subr.bf16.mxu0 %v6303_v37  ;;  %4556 = vmatprep.subr.bf16.mxu1 %v6306_v38  ;;  %v6386_v37 = vld [vmem:[%s9196_s1 + $0x800] ss:$16 sps:$4 sm:$0xff]   ;;  %v143_v38 = vpack.c.bf16 %v7653_v24, %v7653_v24 }
  0xc9   :  { %v6392_v24 = vld [vmem:[%s9196_s1 + $0x820] ss:$16 sps:$4 sm:$0xff]  }
  0xcb   :  { %4147 = vmatpush1.bf16.msra.mxu0 %v6301_v39  ;;  %4557 = vmatpush1.bf16.msra.mxu1 %v6304_v40  ;;  %v6389_v39 = vld [vmem:[%s9196_s1 + $0x808] ss:$16 sps:$4 sm:$0xff]   ;;  %v6394_v40 = vld [vmem:[%s9196_s1 + $0x824] ss:$16 sps:$4 sm:$0xff]  }
  0xcc   :  { %4148 = vmatprep.subr.bf16.mxu0 %v6309_v41  ;;  %4558 = vmatprep.subr.bf16.mxu1 %v6312_v42  ;;  %v6397_v41 = vld [vmem:[%s9196_s1 + $0x82c] ss:$16 sps:$4 sm:$0xff]   ;;  %v146_v42 = vpack.c.bf16 %v81_v36, %v81_v36  ;;  %v6470_v36 = vld [vmem:[%s9196_s1 + $0x9c0] ss:$16 sps:$4 sm:$0xff]  }
  0xcf   :  { %4149 = vmatpush1.bf16.msra.mxu0 %v6307_v44  ;;  %4559 = vmatpush1.bf16.msra.mxu1 %v6310_v45  ;;  %v6395_v44 = vld [vmem:[%s9196_s1 + $0x828] ss:$16 sps:$4 sm:$0xff]   ;;  %v6400_v45 = vld [vmem:[%s9196_s1 + $0x844] ss:$16 sps:$4 sm:$0xff]  }
  0xd0   :  { %4150 = vmatprep.subr.bf16.mxu0 %v6315_v46  ;;  %4560 = vmatprep.subr.bf16.mxu1 %v6318_v47  ;;  %v6403_v46 = vld [vmem:[%s9196_s1 + $0x84c] ss:$16 sps:$4 sm:$0xff]   ;;  %v6398_v47 = vld [vmem:[%s9196_s1 + $0x840] ss:$16 sps:$4 sm:$0xff]  }
  0xd3   :  { %4151 = vmatpush1.bf16.msra.mxu0 %v6313_v48  ;;  %4561 = vmatpush1.bf16.msra.mxu1 %v6316_v50  ;;  %v6401_v48 = vld [vmem:[%s9196_s1 + $0x848] ss:$16 sps:$4 sm:$0xff]   ;;  %v6406_v50 = vld [vmem:[%s9196_s1 + $0x864] ss:$16 sps:$4 sm:$0xff]  }
  0xd4   :  { %4152 = vmatprep.subr.bf16.mxu0 %v6321_v51  ;;  %4562 = vmatprep.subr.bf16.mxu1 %v6324_v52  ;;  %v6409_v51 = vld [vmem:[%s9196_s1 + $0x86c] ss:$16 sps:$4 sm:$0xff]   ;;  %v6404_v52 = vld [vmem:[%s9196_s1 + $0x860] ss:$16 sps:$4 sm:$0xff]  }
  0xd7   :  { %4153 = vmatpush1.bf16.msra.mxu0 %v6319_v53  ;;  %4563 = vmatpush1.bf16.msra.mxu1 %v6322_v54  ;;  %v6407_v53 = vld [vmem:[%s9196_s1 + $0x868] ss:$16 sps:$4 sm:$0xff]   ;;  %v6412_v54 = vld [vmem:[%s9196_s1 + $0x884] ss:$16 sps:$4 sm:$0xff]  }
  0xd8   :  { %4154 = vmatprep.subr.bf16.mxu0 %v6327_v55  ;;  %4564 = vmatprep.subr.bf16.mxu1 %v6330_v56  ;;  %v6415_v55 = vld [vmem:[%s9196_s1 + $0x88c] ss:$16 sps:$4 sm:$0xff]   ;;  %v6410_v56 = vld [vmem:[%s9196_s1 + $0x880] ss:$16 sps:$4 sm:$0xff]  }
  0xdb   :  { %4155 = vmatpush1.bf16.msra.mxu0 %v6325_v57  ;;  %4565 = vmatpush1.bf16.msra.mxu1 %v6328_v58  ;;  %v6413_v57 = vld [vmem:[%s9196_s1 + $0x888] ss:$16 sps:$4 sm:$0xff]   ;;  %v6418_v58 = vld [vmem:[%s9196_s1 + $0x8a4] ss:$16 sps:$4 sm:$0xff]  }
  0xdc   :  { %4156 = vmatprep.subr.bf16.mxu0 %v6333_v59  ;;  %4566 = vmatprep.subr.bf16.mxu1 %v6336_v60  ;;  %v6421_v59 = vld [vmem:[%s9196_s1 + $0x8ac] ss:$16 sps:$4 sm:$0xff]   ;;  %v6416_v60 = vld [vmem:[%s9196_s1 + $0x8a0] ss:$16 sps:$4 sm:$0xff]  }
  0xdf   :  { %4157 = vmatpush1.bf16.msra.mxu0 %v6331_v61  ;;  %4567 = vmatpush1.bf16.msra.mxu1 %v6334_v62  ;;  %v6419_v61 = vld [vmem:[%s9196_s1 + $0x8a8] ss:$16 sps:$4 sm:$0xff]   ;;  %v6424_v62 = vld [vmem:[%s9196_s1 + $0x8c4] ss:$16 sps:$4 sm:$0xff]  }
  0xe0   :  { %4158 = vmatprep.subr.bf16.mxu0 %v6339_v63  ;;  %4568 = vmatprep.subr.bf16.mxu1 %v6342_v0  ;;  %v6427_v63 = vld [vmem:[%s9196_s1 + $0x8cc] ss:$16 sps:$4 sm:$0xff]   ;;  %v6422_v0 = vld [vmem:[%s9196_s1 + $0x8c0] ss:$16 sps:$4 sm:$0xff]  }
  0xe3   :  { %4159 = vmatpush1.bf16.msra.mxu0 %v6337_v1  ;;  %4569 = vmatpush1.bf16.msra.mxu1 %v6340_v2  ;;  %v6425_v1 = vld [vmem:[%s9196_s1 + $0x8c8] ss:$16 sps:$4 sm:$0xff]   ;;  %v6430_v2 = vld [vmem:[%s9196_s1 + $0x8e4] ss:$16 sps:$4 sm:$0xff]  }
  0xe4   :  { %4160 = vmatprep.subr.bf16.mxu0 %v6345_v3  ;;  %4570 = vmatprep.subr.bf16.mxu1 %v6348_v4  ;;  %v6433_v3 = vld [vmem:[%s9196_s1 + $0x8ec] ss:$16 sps:$4 sm:$0xff]   ;;  %v6428_v4 = vld [vmem:[%s9196_s1 + $0x8e0] ss:$16 sps:$4 sm:$0xff]  }
  0xe7   :  { %4161 = vmatpush1.bf16.msra.mxu0 %v6343_v5  ;;  %4571 = vmatpush1.bf16.msra.mxu1 %v6346_v6  ;;  %v6431_v5 = vld [vmem:[%s9196_s1 + $0x8e8] ss:$16 sps:$4 sm:$0xff]   ;;  %v6436_v6 = vld [vmem:[%s9196_s1 + $0x904] ss:$16 sps:$4 sm:$0xff]  }
  0xe8   :  { %4162 = vmatprep.subr.bf16.mxu0 %v6351_v7  ;;  %4572 = vmatprep.subr.bf16.mxu1 %v6354_v8  ;;  %v6439_v7 = vld [vmem:[%s9196_s1 + $0x90c] ss:$16 sps:$4 sm:$0xff]   ;;  %v6434_v8 = vld [vmem:[%s9196_s1 + $0x900] ss:$16 sps:$4 sm:$0xff]  }
  0xeb   :  { %4163 = vmatpush1.bf16.msra.mxu0 %v6349_v10  ;;  %4573 = vmatpush1.bf16.msra.mxu1 %v6352_v11  ;;  %v6437_v10 = vld [vmem:[%s9196_s1 + $0x908] ss:$16 sps:$4 sm:$0xff]   ;;  %v6442_v11 = vld [vmem:[%s9196_s1 + $0x924] ss:$16 sps:$4 sm:$0xff]  }
  0xec   :  { %4164 = vmatprep.subr.bf16.mxu0 %v6357_v12  ;;  %4574 = vmatprep.subr.bf16.mxu1 %v6360_v13  ;;  %v6445_v12 = vld [vmem:[%s9196_s1 + $0x92c] ss:$16 sps:$4 sm:$0xff]   ;;  %v6440_v13 = vld [vmem:[%s9196_s1 + $0x920] ss:$16 sps:$4 sm:$0xff]  }
  0xef   :  { %4165 = vmatpush1.bf16.msra.mxu0 %v6355_v14  ;;  %4575 = vmatpush1.bf16.msra.mxu1 %v6358_v15  ;;  %v6443_v14 = vld [vmem:[%s9196_s1 + $0x928] ss:$16 sps:$4 sm:$0xff]   ;;  %v6448_v15 = vld [vmem:[%s9196_s1 + $0x944] ss:$16 sps:$4 sm:$0xff]  }
  0xf0   :  { %4166 = vmatprep.subr.bf16.mxu0 %v6363_v16  ;;  %4576 = vmatprep.subr.bf16.mxu1 %v6366_v17  ;;  %v6451_v16 = vld [vmem:[%s9196_s1 + $0x94c] ss:$16 sps:$4 sm:$0xff]   ;;  %v6446_v17 = vld [vmem:[%s9196_s1 + $0x940] ss:$16 sps:$4 sm:$0xff]  }
  0xf3   :  { %4167 = vmatpush1.bf16.msra.mxu0 %v6361_v18  ;;  %4577 = vmatpush1.bf16.msra.mxu1 %v6364_v19  ;;  %v6449_v18 = vld [vmem:[%s9196_s1 + $0x948] ss:$16 sps:$4 sm:$0xff]   ;;  %v6454_v19 = vld [vmem:[%s9196_s1 + $0x964] ss:$16 sps:$4 sm:$0xff]  }
  0xf4   :  { %4168 = vmatprep.subr.bf16.mxu0 %v6369_v20  ;;  %4578 = vmatprep.subr.bf16.mxu1 %v6372_v21  ;;  %v6457_v20 = vld [vmem:[%s9196_s1 + $0x96c] ss:$16 sps:$4 sm:$0xff]   ;;  %v6452_v21 = vld [vmem:[%s9196_s1 + $0x960] ss:$16 sps:$4 sm:$0xff]  }
  0xf7   :  { %4169 = vmatpush1.bf16.msra.mxu0 %v6367_v22  ;;  %4579 = vmatpush1.bf16.msra.mxu1 %v6370_v23  ;;  %v6455_v22 = vld [vmem:[%s9196_s1 + $0x968] ss:$16 sps:$4 sm:$0xff]   ;;  %v6460_v23 = vld [vmem:[%s9196_s1 + $0x984] ss:$16 sps:$4 sm:$0xff]  }
  0xf8   :  { %4170 = vmatprep.subr.bf16.mxu0 %v6375_v9  ;;  %4580 = vmatprep.subr.bf16.mxu1 %v6378_v26  ;;  %v6463_v9 = vld [vmem:[%s9196_s1 + $0x98c] ss:$16 sps:$4 sm:$0xff]   ;;  %v6458_v26 = vld [vmem:[%s9196_s1 + $0x980] ss:$16 sps:$4 sm:$0xff]  }
  0xfb   :  { %4171 = vmatpush1.bf16.msra.mxu0 %v6373_v27  ;;  %4581 = vmatpush1.bf16.msra.mxu1 %v6376_v29  ;;  %v6461_v27 = vld [vmem:[%s9196_s1 + $0x988] ss:$16 sps:$4 sm:$0xff]   ;;  %v6466_v29 = vld [vmem:[%s9196_s1 + $0x9a4] ss:$16 sps:$4 sm:$0xff]  }
  0xfc   :  { %4172 = vmatprep.subr.bf16.mxu0 %v6381_v30  ;;  %4582 = vmatprep.subr.bf16.mxu1 %v6384_v31  ;;  %v6469_v30 = vld [vmem:[%s9196_s1 + $0x9ac] ss:$16 sps:$4 sm:$0xff]   ;;  %v6464_v31 = vld [vmem:[%s9196_s1 + $0x9a0] ss:$16 sps:$4 sm:$0xff]  }
  0xff   :  { %4173 = vmatpush1.bf16.msra.mxu0 %v6379_v33  ;;  %4583 = vmatpush1.bf16.msra.mxu1 %v6382_v25  ;;  %v6467_v33 = vld [vmem:[%s9196_s1 + $0x9a8] ss:$16 sps:$4 sm:$0xff]   ;;  %v6472_v25 = vld [vmem:[%s9196_s1 + $0x9c4] ss:$16 sps:$4 sm:$0xff]  }
 0x100   :  { %4183 = vmatprep.subr.bf16.mxu0 %v6388_v34  ;;  %4593 = vmatprep.subr.bf16.mxu1 %v6391_v35  ;;  %v6475_v34 = vld [vmem:[%s9196_s1 + $0x9cc] ss:$16 sps:$4 sm:$0xff]   ;;  %v66_v35 = vcombine.high %v7845_v28, %v7845_v28 }
 0x101   :  { %v6481_v28 = vld [vmem:[%s9196_s1 + $0x9ec] ss:$16 sps:$4 sm:$0xff]  }
 0x102   :  { %4175 = vmatmul.mubr.bf16.vlgmr.msra.gmra.mrb[0].mxu0 %v143_v38  ;;  %4585 = vmatmul.mubr.bf16.vlgmr.msra.gmra.mrb[0].mxu1 %v143_v38  ;;  %v6478_v38 = vld [vmem:[%s9196_s1 + $0x9e4] ss:$16 sps:$4 sm:$0xff]  }
 0x103   :  { %4184 = vmatpush1.bf16.msra.mxu0 %v6386_v37  ;;  %4594 = vmatpush1.bf16.msra.mxu1 %v6389_v39  ;;  %v6473_v37 = vld [vmem:[%s9196_s1 + $0x9c8] ss:$16 sps:$4 sm:$0xff]   ;;  %v8059_v39 = vrot.slane %v66_v35, %v7188_v49 }
 0x104   :  { %4185 = vmatprep.subr.bf16.mxu0 %v6394_v40  ;;  %4595 = vmatprep.subr.bf16.mxu1 %v6397_v41  ;;  %v6476_v40 = vld [vmem:[%s9196_s1 + $0x9e0] ss:$16 sps:$4 sm:$0xff]   ;;  %v6479_v41 = vld [vmem:[%s9196_s1 + $0x9e8] ss:$16 sps:$4 sm:$0xff]  }
 0x105   :  { %4215 = vmatprep.mubr.bf16.mxu0 %v146_v42  ;;  %4625 = vmatprep.mubr.bf16.mxu1 %v146_v42  ;;  %v6484_v42 = vld [vmem:[%s9196_s1 + $0xa04] ss:$16 sps:$4 sm:$0xff]   ;;  %v6557_v35 = vld [vmem:[%s9196_s1 + $0xb88] ss:$16 sps:$4 sm:$0xff]  }
 0x107   :  { %4186 = vmatpush1.bf16.msra.mxu0 %v6392_v24  ;;  %4596 = vmatpush1.bf16.msra.mxu1 %v6395_v44  ;;  %v6487_v24 = vld [vmem:[%s9196_s1 + $0xa0c] ss:$16 sps:$4 sm:$0xff]   ;;  %v82_v44 = vcombine.high %v8059_v39, %v8059_v39 }
 0x108   :  { %4187 = vmatprep.subr.bf16.mxu0 %v6400_v45  ;;  %4597 = vmatprep.subr.bf16.mxu1 %v6403_v46  ;;  %v145_v45 = vpack.c.bf16 %v7858_v32, %v7858_v32  ;;  %v6482_v46 = vld [vmem:[%s9196_s1 + $0xa00] ss:$16 sps:$4 sm:$0xff]   ;;  %v6493_v32 = vld [vmem:[%s9196_s1 + $0xa2c] ss:$16 sps:$4 sm:$0xff]  }
 0x10b   :  { %4188 = vmatpush1.bf16.msra.mxu0 %v6398_v47  ;;  %4598 = vmatpush1.bf16.msra.mxu1 %v6401_v48  ;;  %v6485_v47 = vld [vmem:[%s9196_s1 + $0xa08] ss:$16 sps:$4 sm:$0xff]   ;;  %v6490_v48 = vld [vmem:[%s9196_s1 + $0xa24] ss:$16 sps:$4 sm:$0xff]  }
 0x10c   :  { %4189 = vmatprep.subr.bf16.mxu0 %v6406_v50  ;;  %4599 = vmatprep.subr.bf16.mxu1 %v6409_v51  ;;  %v148_v50 = vpack.c.bf16 %v82_v44, %v82_v44  ;;  %v6488_v51 = vld [vmem:[%s9196_s1 + $0xa20] ss:$16 sps:$4 sm:$0xff]   ;;  %v6569_v44 = vld [vmem:[%s9196_s1 + $0xbc8] ss:$16 sps:$4 sm:$0xff]  }
 0x10f   :  { %4190 = vmatpush1.bf16.msra.mxu0 %v6404_v52  ;;  %4600 = vmatpush1.bf16.msra.mxu1 %v6407_v53  ;;  %v6491_v52 = vld [vmem:[%s9196_s1 + $0xa28] ss:$16 sps:$4 sm:$0xff]   ;;  %v6496_v53 = vld [vmem:[%s9196_s1 + $0xa44] ss:$16 sps:$4 sm:$0xff]  }
 0x110   :  { %4191 = vmatprep.subr.bf16.mxu0 %v6412_v54  ;;  %4601 = vmatprep.subr.bf16.mxu1 %v6415_v55  ;;  %v6499_v54 = vld [vmem:[%s9196_s1 + $0xa4c] ss:$16 sps:$4 sm:$0xff]   ;;  %v6494_v55 = vld [vmem:[%s9196_s1 + $0xa40] ss:$16 sps:$4 sm:$0xff]  }
 0x113   :  { %4192 = vmatpush1.bf16.msra.mxu0 %v6410_v56  ;;  %4602 = vmatpush1.bf16.msra.mxu1 %v6413_v57  ;;  %v6497_v56 = vld [vmem:[%s9196_s1 + $0xa48] ss:$16 sps:$4 sm:$0xff]   ;;  %v6502_v57 = vld [vmem:[%s9196_s1 + $0xa64] ss:$16 sps:$4 sm:$0xff]  }
 0x114   :  { %4193 = vmatprep.subr.bf16.mxu0 %v6418_v58  ;;  %4603 = vmatprep.subr.bf16.mxu1 %v6421_v59  ;;  %v6505_v58 = vld [vmem:[%s9196_s1 + $0xa6c] ss:$16 sps:$4 sm:$0xff]   ;;  %v6500_v59 = vld [vmem:[%s9196_s1 + $0xa60] ss:$16 sps:$4 sm:$0xff]  }
 0x117   :  { %4194 = vmatpush1.bf16.msra.mxu0 %v6416_v60  ;;  %4604 = vmatpush1.bf16.msra.mxu1 %v6419_v61  ;;  %v6503_v60 = vld [vmem:[%s9196_s1 + $0xa68] ss:$16 sps:$4 sm:$0xff]   ;;  %v6508_v61 = vld [vmem:[%s9196_s1 + $0xa84] ss:$16 sps:$4 sm:$0xff]  }
 0x118   :  { %4195 = vmatprep.subr.bf16.mxu0 %v6424_v62  ;;  %4605 = vmatprep.subr.bf16.mxu1 %v6427_v63  ;;  %v6511_v62 = vld [vmem:[%s9196_s1 + $0xa8c] ss:$16 sps:$4 sm:$0xff]   ;;  %v6506_v63 = vld [vmem:[%s9196_s1 + $0xa80] ss:$16 sps:$4 sm:$0xff]  }
 0x11b   :  { %4196 = vmatpush1.bf16.msra.mxu0 %v6422_v0  ;;  %4606 = vmatpush1.bf16.msra.mxu1 %v6425_v1  ;;  %v6509_v0 = vld [vmem:[%s9196_s1 + $0xa88] ss:$16 sps:$4 sm:$0xff]   ;;  %v6514_v1 = vld [vmem:[%s9196_s1 + $0xaa4] ss:$16 sps:$4 sm:$0xff]  }
 0x11c   :  { %4197 = vmatprep.subr.bf16.mxu0 %v6430_v2  ;;  %4607 = vmatprep.subr.bf16.mxu1 %v6433_v3  ;;  %v6517_v2 = vld [vmem:[%s9196_s1 + $0xaac] ss:$16 sps:$4 sm:$0xff]   ;;  %v6512_v3 = vld [vmem:[%s9196_s1 + $0xaa0] ss:$16 sps:$4 sm:$0xff]  }
 0x11f   :  { %4198 = vmatpush1.bf16.msra.mxu0 %v6428_v4  ;;  %4608 = vmatpush1.bf16.msra.mxu1 %v6431_v5  ;;  %v6515_v4 = vld [vmem:[%s9196_s1 + $0xaa8] ss:$16 sps:$4 sm:$0xff]   ;;  %v6520_v5 = vld [vmem:[%s9196_s1 + $0xac4] ss:$16 sps:$4 sm:$0xff]  }
 0x120   :  { %4199 = vmatprep.subr.bf16.mxu0 %v6436_v6  ;;  %4609 = vmatprep.subr.bf16.mxu1 %v6439_v7  ;;  %v6523_v6 = vld [vmem:[%s9196_s1 + $0xacc] ss:$16 sps:$4 sm:$0xff]   ;;  %v6518_v7 = vld [vmem:[%s9196_s1 + $0xac0] ss:$16 sps:$4 sm:$0xff]  }
 0x123   :  { %4200 = vmatpush1.bf16.msra.mxu0 %v6434_v8  ;;  %4610 = vmatpush1.bf16.msra.mxu1 %v6437_v10  ;;  %v6521_v8 = vld [vmem:[%s9196_s1 + $0xac8] ss:$16 sps:$4 sm:$0xff]   ;;  %v6526_v10 = vld [vmem:[%s9196_s1 + $0xae4] ss:$16 sps:$4 sm:$0xff]  }
 0x124   :  { %4201 = vmatprep.subr.bf16.mxu0 %v6442_v11  ;;  %4611 = vmatprep.subr.bf16.mxu1 %v6445_v12  ;;  %v6529_v11 = vld [vmem:[%s9196_s1 + $0xaec] ss:$16 sps:$4 sm:$0xff]   ;;  %v6524_v12 = vld [vmem:[%s9196_s1 + $0xae0] ss:$16 sps:$4 sm:$0xff]  }
 0x127   :  { %4202 = vmatpush1.bf16.msra.mxu0 %v6440_v13  ;;  %4612 = vmatpush1.bf16.msra.mxu1 %v6443_v14  ;;  %v6527_v13 = vld [vmem:[%s9196_s1 + $0xae8] ss:$16 sps:$4 sm:$0xff]   ;;  %v6532_v14 = vld [vmem:[%s9196_s1 + $0xb04] ss:$16 sps:$4 sm:$0xff]  }
 0x128   :  { %4203 = vmatprep.subr.bf16.mxu0 %v6448_v15  ;;  %4613 = vmatprep.subr.bf16.mxu1 %v6451_v16  ;;  %v6535_v15 = vld [vmem:[%s9196_s1 + $0xb0c] ss:$16 sps:$4 sm:$0xff]   ;;  %v6530_v16 = vld [vmem:[%s9196_s1 + $0xb00] ss:$16 sps:$4 sm:$0xff]  }
 0x12b   :  { %4204 = vmatpush1.bf16.msra.mxu0 %v6446_v17  ;;  %4614 = vmatpush1.bf16.msra.mxu1 %v6449_v18  ;;  %v6533_v17 = vld [vmem:[%s9196_s1 + $0xb08] ss:$16 sps:$4 sm:$0xff]   ;;  %v6538_v18 = vld [vmem:[%s9196_s1 + $0xb24] ss:$16 sps:$4 sm:$0xff]  }
 0x12c   :  { %4205 = vmatprep.subr.bf16.mxu0 %v6454_v19  ;;  %4615 = vmatprep.subr.bf16.mxu1 %v6457_v20  ;;  %v6541_v19 = vld [vmem:[%s9196_s1 + $0xb2c] ss:$16 sps:$4 sm:$0xff]   ;;  %v6536_v20 = vld [vmem:[%s9196_s1 + $0xb20] ss:$16 sps:$4 sm:$0xff]  }
 0x12f   :  { %4206 = vmatpush1.bf16.msra.mxu0 %v6452_v21  ;;  %4616 = vmatpush1.bf16.msra.mxu1 %v6455_v22  ;;  %v6539_v21 = vld [vmem:[%s9196_s1 + $0xb28] ss:$16 sps:$4 sm:$0xff]   ;;  %v6544_v22 = vld [vmem:[%s9196_s1 + $0xb44] ss:$16 sps:$4 sm:$0xff]  }
 0x130   :  { %4207 = vmatprep.subr.bf16.mxu0 %v6460_v23  ;;  %4617 = vmatprep.subr.bf16.mxu1 %v6463_v9  ;;  %v6547_v23 = vld [vmem:[%s9196_s1 + $0xb4c] ss:$16 sps:$4 sm:$0xff]   ;;  %v6542_v9 = vld [vmem:[%s9196_s1 + $0xb40] ss:$16 sps:$4 sm:$0xff]  }
 0x133   :  { %4208 = vmatpush1.bf16.msra.mxu0 %v6458_v26  ;;  %4618 = vmatpush1.bf16.msra.mxu1 %v6461_v27  ;;  %v6545_v26 = vld [vmem:[%s9196_s1 + $0xb48] ss:$16 sps:$4 sm:$0xff]   ;;  %v6550_v27 = vld [vmem:[%s9196_s1 + $0xb64] ss:$16 sps:$4 sm:$0xff]  }
 0x134   :  { %4209 = vmatprep.subr.bf16.mxu0 %v6466_v29  ;;  %4619 = vmatprep.subr.bf16.mxu1 %v6469_v30  ;;  %v6553_v29 = vld [vmem:[%s9196_s1 + $0xb6c] ss:$16 sps:$4 sm:$0xff]   ;;  %v6548_v30 = vld [vmem:[%s9196_s1 + $0xb60] ss:$16 sps:$4 sm:$0xff]  }
 0x137   :  { %4210 = vmatpush1.bf16.msra.mxu0 %v6464_v31  ;;  %4620 = vmatpush1.bf16.msra.mxu1 %v6467_v33  ;;  %v6551_v31 = vld [vmem:[%s9196_s1 + $0xb68] ss:$16 sps:$4 sm:$0xff]   ;;  %v6556_v33 = vld [vmem:[%s9196_s1 + $0xb84] ss:$16 sps:$4 sm:$0xff]  }
 0x138   :  { %4211 = vmatprep.subr.bf16.mxu0 %v6472_v25  ;;  %4621 = vmatprep.subr.bf16.mxu1 %v6475_v34  ;;  %v6559_v25 = vld [vmem:[%s9196_s1 + $0xb8c] ss:$16 sps:$4 sm:$0xff]   ;;  %v6554_v34 = vld [vmem:[%s9196_s1 + $0xb80] ss:$16 sps:$4 sm:$0xff]  }
 0x13b   :  { %4212 = vmatpush1.bf16.msra.mxu0 %v6470_v36  ;;  %4622 = vmatpush1.bf16.msra.mxu1 %v6473_v37  ;;  %v6562_v36 = vld [vmem:[%s9196_s1 + $0xba4] ss:$16 sps:$4 sm:$0xff]   ;;  %v6565_v37 = vld [vmem:[%s9196_s1 + $0xbac] ss:$16 sps:$4 sm:$0xff]  }
 0x13c   :  { %4213 = vmatprep.subr.bf16.mxu0 %v6478_v38  ;;  %4623 = vmatprep.subr.bf16.mxu1 %v6481_v28  ;;  %v6560_v38 = vld [vmem:[%s9196_s1 + $0xba0] ss:$16 sps:$4 sm:$0xff]   ;;  %v6563_v28 = vld [vmem:[%s9196_s1 + $0xba8] ss:$16 sps:$4 sm:$0xff]  }
 0x13f   :  { %4214 = vmatpush1.bf16.msra.mxu0 %v6476_v40  ;;  %4624 = vmatpush1.bf16.msra.mxu1 %v6479_v41  ;;  %v6568_v40 = vld [vmem:[%s9196_s1 + $0xbc4] ss:$16 sps:$4 sm:$0xff]   ;;  %v6571_v41 = vld [vmem:[%s9196_s1 + $0xbcc] ss:$16 sps:$4 sm:$0xff]  }
 0x140   :  { %4224 = vmatprep.subr.bf16.mxu0 %v6484_v42  ;;  %4634 = vmatprep.subr.bf16.mxu1 %v6487_v24  ;;  %v8248_v42 = vld [vmem:[%s9195_s0 + $0x18] sm:$0xff]  ;;  %v6566_v24 = vld [vmem:[%s9196_s1 + $0xbc0] ss:$16 sps:$4 sm:$0xff]  }
 0x142   :  { %4216 = vmatmul.mubr.bf16.vlgmr.msra.gmra.mrb[0].mxu0 %v145_v45  ;;  %4626 = vmatmul.mubr.bf16.vlgmr.msra.gmra.mrb[0].mxu1 %v145_v45  ;;  %v6574_v45 = vld [vmem:[%s9196_s1 + $0xbe4] ss:$16 sps:$4 sm:$0xff]  }
 0x143   :  { %4225 = vmatpush1.bf16.msra.mxu0 %v6482_v46  ;;  %4635 = vmatpush1.bf16.msra.mxu1 %v6485_v47  ;;  %v6577_v46 = vld [vmem:[%s9196_s1 + $0xbec] ss:$16 sps:$4 sm:$0xff]   ;;  %v8264_v47 = vrot.slane %v8248_v42, %v7188_v49 }
 0x144   :  { %4226 = vmatprep.subr.bf16.mxu0 %v6490_v48  ;;  %4636 = vmatprep.subr.bf16.mxu1 %v6493_v32  ;;  %v6572_v48 = vld [vmem:[%s9196_s1 + $0xbe0] ss:$16 sps:$4 sm:$0xff]   ;;  %v6575_v32 = vld [vmem:[%s9196_s1 + $0xbe8] ss:$16 sps:$4 sm:$0xff]  }
 0x145   :  { %4256 = vmatprep.mubr.bf16.mxu0 %v148_v50  ;;  %4666 = vmatprep.mubr.bf16.mxu1 %v148_v50  ;;  %v6581_v50 = vld [vmem:[%s9196_s1 + $0xc04] ss:$16 sps:$4 sm:$0xff]  }
 0x147   :  { %4227 = vmatpush1.bf16.msra.mxu0 %v6488_v51  ;;  %4637 = vmatpush1.bf16.msra.mxu1 %v6491_v52  ;;  %v6584_v51 = vld [vmem:[%s9196_s1 + $0xc0c] ss:$16 sps:$4 sm:$0xff]   ;;  %v98_v52 = vcombine.high %v8264_v47, %v8264_v47 }
 0x148   :  { %4228 = vmatprep.subr.bf16.mxu0 %v6496_v53  ;;  %4638 = vmatprep.subr.bf16.mxu1 %v6499_v54  ;;  %v147_v53 = vpack.c.bf16 %v8059_v39, %v8059_v39  ;;  %v6579_v54 = vld [vmem:[%s9196_s1 + $0xc00] ss:$16 sps:$4 sm:$0xff]   ;;  %v6590_v39 = vld [vmem:[%s9196_s1 + $0xc2c] ss:$16 sps:$4 sm:$0xff]  }
 0x14b   :  { %4229 = vmatpush1.bf16.msra.mxu0 %v6494_v55  ;;  %4639 = vmatpush1.bf16.msra.mxu1 %v6497_v56  ;;  %v6582_v55 = vld [vmem:[%s9196_s1 + $0xc08] ss:$16 sps:$4 sm:$0xff]   ;;  %v6587_v56 = vld [vmem:[%s9196_s1 + $0xc24] ss:$16 sps:$4 sm:$0xff]  }
 0x14c   :  { %4230 = vmatprep.subr.bf16.mxu0 %v6502_v57  ;;  %4640 = vmatprep.subr.bf16.mxu1 %v6505_v58  ;;  %v150_v57 = vpack.c.bf16 %v98_v52, %v98_v52  ;;  %v6585_v58 = vld [vmem:[%s9196_s1 + $0xc20] ss:$16 sps:$4 sm:$0xff]  }
 0x14f   :  { %4231 = vmatpush1.bf16.msra.mxu0 %v6500_v59  ;;  %4641 = vmatpush1.bf16.msra.mxu1 %v6503_v60  ;;  %v6588_v59 = vld [vmem:[%s9196_s1 + $0xc28] ss:$16 sps:$4 sm:$0xff]   ;;  %v6593_v60 = vld [vmem:[%s9196_s1 + $0xc44] ss:$16 sps:$4 sm:$0xff]  }
 0x150   :  { %4232 = vmatprep.subr.bf16.mxu0 %v6508_v61  ;;  %4642 = vmatprep.subr.bf16.mxu1 %v6511_v62  ;;  %v6596_v61 = vld [vmem:[%s9196_s1 + $0xc4c] ss:$16 sps:$4 sm:$0xff]   ;;  %v6591_v62 = vld [vmem:[%s9196_s1 + $0xc40] ss:$16 sps:$4 sm:$0xff]  }
 0x153   :  { %4233 = vmatpush1.bf16.msra.mxu0 %v6506_v63  ;;  %4643 = vmatpush1.bf16.msra.mxu1 %v6509_v0  ;;  %v6594_v63 = vld [vmem:[%s9196_s1 + $0xc48] ss:$16 sps:$4 sm:$0xff]   ;;  %v6599_v0 = vld [vmem:[%s9196_s1 + $0xc64] ss:$16 sps:$4 sm:$0xff]  }
 0x154   :  { %4234 = vmatprep.subr.bf16.mxu0 %v6514_v1  ;;  %4644 = vmatprep.subr.bf16.mxu1 %v6517_v2  ;;  %v6602_v1 = vld [vmem:[%s9196_s1 + $0xc6c] ss:$16 sps:$4 sm:$0xff]   ;;  %v6597_v2 = vld [vmem:[%s9196_s1 + $0xc60] ss:$16 sps:$4 sm:$0xff]  }
 0x157   :  { %4235 = vmatpush1.bf16.msra.mxu0 %v6512_v3  ;;  %4645 = vmatpush1.bf16.msra.mxu1 %v6515_v4  ;;  %v6600_v3 = vld [vmem:[%s9196_s1 + $0xc68] ss:$16 sps:$4 sm:$0xff]   ;;  %v6605_v4 = vld [vmem:[%s9196_s1 + $0xc84] ss:$16 sps:$4 sm:$0xff]  }
 0x158   :  { %4236 = vmatprep.subr.bf16.mxu0 %v6520_v5  ;;  %4646 = vmatprep.subr.bf16.mxu1 %v6523_v6  ;;  %v6608_v5 = vld [vmem:[%s9196_s1 + $0xc8c] ss:$16 sps:$4 sm:$0xff]   ;;  %v6603_v6 = vld [vmem:[%s9196_s1 + $0xc80] ss:$16 sps:$4 sm:$0xff]  }
 0x15b   :  { %4237 = vmatpush1.bf16.msra.mxu0 %v6518_v7  ;;  %4647 = vmatpush1.bf16.msra.mxu1 %v6521_v8  ;;  %v6606_v7 = vld [vmem:[%s9196_s1 + $0xc88] ss:$16 sps:$4 sm:$0xff]   ;;  %v6611_v8 = vld [vmem:[%s9196_s1 + $0xca4] ss:$16 sps:$4 sm:$0xff]  }
 0x15c   :  { %4238 = vmatprep.subr.bf16.mxu0 %v6526_v10  ;;  %4648 = vmatprep.subr.bf16.mxu1 %v6529_v11  ;;  %v6614_v10 = vld [vmem:[%s9196_s1 + $0xcac] ss:$16 sps:$4 sm:$0xff]   ;;  %v6609_v11 = vld [vmem:[%s9196_s1 + $0xca0] ss:$16 sps:$4 sm:$0xff]  }
 0x15f   :  { %4239 = vmatpush1.bf16.msra.mxu0 %v6524_v12  ;;  %4649 = vmatpush1.bf16.msra.mxu1 %v6527_v13  ;;  %v6612_v12 = vld [vmem:[%s9196_s1 + $0xca8] ss:$16 sps:$4 sm:$0xff]   ;;  %v6617_v13 = vld [vmem:[%s9196_s1 + $0xcc4] ss:$16 sps:$4 sm:$0xff]  }
 0x160   :  { %4240 = vmatprep.subr.bf16.mxu0 %v6532_v14  ;;  %4650 = vmatprep.subr.bf16.mxu1 %v6535_v15  ;;  %v6620_v14 = vld [vmem:[%s9196_s1 + $0xccc] ss:$16 sps:$4 sm:$0xff]   ;;  %v6615_v15 = vld [vmem:[%s9196_s1 + $0xcc0] ss:$16 sps:$4 sm:$0xff]  }
 0x163   :  { %4241 = vmatpush1.bf16.msra.mxu0 %v6530_v16  ;;  %4651 = vmatpush1.bf16.msra.mxu1 %v6533_v17  ;;  %v6618_v16 = vld [vmem:[%s9196_s1 + $0xcc8] ss:$16 sps:$4 sm:$0xff]   ;;  %v6623_v17 = vld [vmem:[%s9196_s1 + $0xce4] ss:$16 sps:$4 sm:$0xff]  }
 0x164   :  { %4242 = vmatprep.subr.bf16.mxu0 %v6538_v18  ;;  %4652 = vmatprep.subr.bf16.mxu1 %v6541_v19  ;;  %v6626_v18 = vld [vmem:[%s9196_s1 + $0xcec] ss:$16 sps:$4 sm:$0xff]   ;;  %v6621_v19 = vld [vmem:[%s9196_s1 + $0xce0] ss:$16 sps:$4 sm:$0xff]  }
 0x167   :  { %4243 = vmatpush1.bf16.msra.mxu0 %v6536_v20  ;;  %4653 = vmatpush1.bf16.msra.mxu1 %v6539_v21  ;;  %v6624_v20 = vld [vmem:[%s9196_s1 + $0xce8] ss:$16 sps:$4 sm:$0xff]   ;;  %v6629_v21 = vld [vmem:[%s9196_s1 + $0xd04] ss:$16 sps:$4 sm:$0xff]  }
 0x168   :  { %4244 = vmatprep.subr.bf16.mxu0 %v6544_v22  ;;  %4654 = vmatprep.subr.bf16.mxu1 %v6547_v23  ;;  %v6632_v22 = vld [vmem:[%s9196_s1 + $0xd0c] ss:$16 sps:$4 sm:$0xff]   ;;  %v6627_v23 = vld [vmem:[%s9196_s1 + $0xd00] ss:$16 sps:$4 sm:$0xff]  }
 0x16b   :  { %4245 = vmatpush1.bf16.msra.mxu0 %v6542_v9  ;;  %4655 = vmatpush1.bf16.msra.mxu1 %v6545_v26  ;;  %v6630_v9 = vld [vmem:[%s9196_s1 + $0xd08] ss:$16 sps:$4 sm:$0xff]   ;;  %v6635_v26 = vld [vmem:[%s9196_s1 + $0xd24] ss:$16 sps:$4 sm:$0xff]  }
 0x16c   :  { %4246 = vmatprep.subr.bf16.mxu0 %v6550_v27  ;;  %4656 = vmatprep.subr.bf16.mxu1 %v6553_v29  ;;  %v6638_v27 = vld [vmem:[%s9196_s1 + $0xd2c] ss:$16 sps:$4 sm:$0xff]  }
 0x16f   :  { %4247 = vmatpush1.bf16.msra.mxu0 %v6548_v30  ;;  %4657 = vmatpush1.bf16.msra.mxu1 %v6551_v31 }
 0x170   :  { %4248 = vmatprep.subr.bf16.mxu0 %v6556_v33  ;;  %4658 = vmatprep.subr.bf16.mxu1 %v6559_v25 }
 0x173   :  { %4249 = vmatpush1.bf16.msra.mxu0 %v6554_v34  ;;  %4659 = vmatpush1.bf16.msra.mxu1 %v6557_v35 }
 0x174   :  { %4250 = vmatprep.subr.bf16.mxu0 %v6562_v36  ;;  %4660 = vmatprep.subr.bf16.mxu1 %v6565_v37 }
 0x177   :  { %4251 = vmatpush1.bf16.msra.mxu0 %v6560_v38  ;;  %4661 = vmatpush1.bf16.msra.mxu1 %v6563_v28 }
 0x178   :  { %4252 = vmatprep.subr.bf16.mxu0 %v6568_v40  ;;  %4662 = vmatprep.subr.bf16.mxu1 %v6571_v41 }
 0x17b   :  { %4253 = vmatpush1.bf16.msra.mxu0 %v6566_v24  ;;  %4663 = vmatpush1.bf16.msra.mxu1 %v6569_v44 }
 0x17c   :  { %4254 = vmatprep.subr.bf16.mxu0 %v6574_v45  ;;  %4664 = vmatprep.subr.bf16.mxu1 %v6577_v46 }
 0x17f   :  { %4255 = vmatpush1.bf16.msra.mxu0 %v6572_v48  ;;  %4665 = vmatpush1.bf16.msra.mxu1 %v6575_v32 }
 0x180   :  { %4265 = vmatprep.subr.bf16.mxu0 %v6581_v50  ;;  %4675 = vmatprep.subr.bf16.mxu1 %v6584_v51 }
 0x182   :  { %4257 = vmatmul.mubr.bf16.vlgmr.msra.gmra.mrb[0].mxu0 %v147_v53  ;;  %4667 = vmatmul.mubr.bf16.vlgmr.msra.gmra.mrb[0].mxu1 %v147_v53 }
 0x183   :  { %4266 = vmatpush1.bf16.msra.mxu0 %v6579_v54  ;;  %4676 = vmatpush1.bf16.msra.mxu1 %v6582_v55 }
 0x184   :  { %4267 = vmatprep.subr.bf16.mxu0 %v6587_v56  ;;  %4677 = vmatprep.subr.bf16.mxu1 %v6590_v39 }
 0x185   :  { %4297 = vmatprep.mubr.bf16.mxu0 %v150_v57  ;;  %4707 = vmatprep.mubr.bf16.mxu1 %v150_v57 }
 0x187   :  { %4268 = vmatpush1.bf16.msra.mxu0 %v6585_v58  ;;  %4678 = vmatpush1.bf16.msra.mxu1 %v6588_v59 }
 0x188   :  { %4269 = vmatprep.subr.bf16.mxu0 %v6593_v60  ;;  %4679 = vmatprep.subr.bf16.mxu1 %v6596_v61 }
 0x18b   :  { %4270 = vmatpush1.bf16.msra.mxu0 %v6591_v62  ;;  %4680 = vmatpush1.bf16.msra.mxu1 %v6594_v63 }
 0x18c   :  { %4271 = vmatprep.subr.bf16.mxu0 %v6599_v0  ;;  %4681 = vmatprep.subr.bf16.mxu1 %v6602_v1 }
 0x18f   :  { %4272 = vmatpush1.bf16.msra.mxu0 %v6597_v2  ;;  %4682 = vmatpush1.bf16.msra.mxu1 %v6600_v3 }
 0x190   :  { %4273 = vmatprep.subr.bf16.mxu0 %v6605_v4  ;;  %4683 = vmatprep.subr.bf16.mxu1 %v6608_v5 }
 0x193   :  { %4274 = vmatpush1.bf16.msra.mxu0 %v6603_v6  ;;  %4684 = vmatpush1.bf16.msra.mxu1 %v6606_v7 }
 0x194   :  { %4275 = vmatprep.subr.bf16.mxu0 %v6611_v8  ;;  %4685 = vmatprep.subr.bf16.mxu1 %v6614_v10 }
 0x197   :  { %4276 = vmatpush1.bf16.msra.mxu0 %v6609_v11  ;;  %4686 = vmatpush1.bf16.msra.mxu1 %v6612_v12 }
 0x198   :  { %4277 = vmatprep.subr.bf16.mxu0 %v6617_v13  ;;  %4687 = vmatprep.subr.bf16.mxu1 %v6620_v14 }
 0x19b   :  { %4278 = vmatpush1.bf16.msra.mxu0 %v6615_v15  ;;  %4688 = vmatpush1.bf16.msra.mxu1 %v6618_v16 }
 0x19c   :  { %4279 = vmatprep.subr.bf16.mxu0 %v6623_v17  ;;  %4689 = vmatprep.subr.bf16.mxu1 %v6626_v18 }
 0x19f   :  { %4280 = vmatpush1.bf16.msra.mxu0 %v6621_v19  ;;  %4690 = vmatpush1.bf16.msra.mxu1 %v6624_v20 }
 0x1a0   :  { %4281 = vmatprep.subr.bf16.mxu0 %v6629_v21  ;;  %4691 = vmatprep.subr.bf16.mxu1 %v6632_v22 }
 0x1a1   :  { %10 = vsyncpa [#allocation3], 0  ;;  %v6633_v29 = vld [vmem:[%s9196_s1 + $0xd20] ss:$16 sps:$4 sm:$0xff]   ;;  %v6636_v30 = vld [vmem:[%s9196_s1 + $0xd28] ss:$16 sps:$4 sm:$0xff]   ;;  %v83_v51 = vcombine.high %v8248_v42, %v8248_v42  ;;  %v149_v60 = vpack.c.bf16 %v8264_v47, %v8264_v47 }
 0x1a2   :  { %v6641_v31 = vld [vmem:[%s9196_s1 + $0xd44] ss:$16 sps:$4 sm:$0xff]   ;;  %v6644_v33 = vld [vmem:[%s9196_s1 + $0xd4c] ss:$16 sps:$4 sm:$0xff]   ;;  %v6639_v25 = vld [vmem:[%s9196_s1 + $0xd40] ss:$16 sps:$4 sm:$0xff]  }
 0x1a3   :  { %4282 = vmatpush1.bf16.msra.mxu0 %v6627_v23  ;;  %4692 = vmatpush1.bf16.msra.mxu1 %v6630_v9  ;;  %v6642_v34 = vld [vmem:[%s9196_s1 + $0xd48] ss:$16 sps:$4 sm:$0xff]   ;;  %v6647_v35 = vld [vmem:[%s9196_s1 + $0xd64] ss:$16 sps:$4 sm:$0xff]   ;;  %v6650_v36 = vld [vmem:[%s9196_s1 + $0xd6c] ss:$16 sps:$4 sm:$0xff]   ;;  %v8465_v55 = vrot.slane %v83_v51, %v7188_v49 }
 0x1a4   :  { %4283 = vmatprep.subr.bf16.mxu0 %v6635_v26  ;;  %4693 = vmatprep.subr.bf16.mxu1 %v6638_v27  ;;  %v6645_v37 = vld [vmem:[%s9196_s1 + $0xd60] ss:$16 sps:$4 sm:$0xff]   ;;  %v6648_v38 = vld [vmem:[%s9196_s1 + $0xd68] ss:$16 sps:$4 sm:$0xff]   ;;  %v6653_v28 = vld [vmem:[%s9196_s1 + $0xd84] ss:$16 sps:$4 sm:$0xff]  }
 0x1a5   :  { %v6656_v40 = vld [vmem:[%s9196_s1 + $0xd8c] ss:$16 sps:$4 sm:$0xff]   ;;  %v6651_v41 = vld [vmem:[%s9196_s1 + $0xd80] ss:$16 sps:$4 sm:$0xff]   ;;  %v6654_v24 = vld [vmem:[%s9196_s1 + $0xd88] ss:$16 sps:$4 sm:$0xff]   ;;  %v99_v59 = vcombine.high %v8465_v55, %v8465_v55 }
 0x1a6   :  { %v6659_v44 = vld [vmem:[%s9196_s1 + $0xda4] ss:$16 sps:$4 sm:$0xff]   ;;  %v6662_v45 = vld [vmem:[%s9196_s1 + $0xdac] ss:$16 sps:$4 sm:$0xff]   ;;  %v6657_v46 = vld [vmem:[%s9196_s1 + $0xda0] ss:$16 sps:$4 sm:$0xff]  }
 0x1a7   :  { %4284 = vmatpush1.bf16.msra.mxu0 %v6633_v29  ;;  %4694 = vmatpush1.bf16.msra.mxu1 %v6636_v30  ;;  %v6660_v48 = vld [vmem:[%s9196_s1 + $0xda8] ss:$16 sps:$4 sm:$0xff]   ;;  %v6665_v32 = vld [vmem:[%s9196_s1 + $0xdc4] ss:$16 sps:$4 sm:$0xff]   ;;  %v6668_v50 = vld [vmem:[%s9196_s1 + $0xdcc] ss:$16 sps:$4 sm:$0xff]   ;;  %v152_v0 = vpack.c.bf16 %v99_v59, %v99_v59 }
 0x1a8   :  { %4285 = vmatprep.subr.bf16.mxu0 %v6641_v31  ;;  %4695 = vmatprep.subr.bf16.mxu1 %v6644_v33  ;;  %v6663_v52 = vld [vmem:[%s9196_s1 + $0xdc0] ss:$16 sps:$4 sm:$0xff]   ;;  %v6666_v53 = vld [vmem:[%s9196_s1 + $0xdc8] ss:$16 sps:$4 sm:$0xff]   ;;  %v6671_v54 = vld [vmem:[%s9196_s1 + $0xde4] ss:$16 sps:$4 sm:$0xff]  }
 0x1a9   :  { %v6674_v42 = vld [vmem:[%s9196_s1 + $0xdec] ss:$16 sps:$4 sm:$0xff]   ;;  %v6669_v56 = vld [vmem:[%s9196_s1 + $0xde0] ss:$16 sps:$4 sm:$0xff]   ;;  %v6672_v39 = vld [vmem:[%s9196_s1 + $0xde8] ss:$16 sps:$4 sm:$0xff]  }
 0x1aa   :  { %v6677_v57 = vld [vmem:[%s9196_s1 + $0xe04] ss:$16 sps:$4 sm:$0xff]   ;;  %v6680_v58 = vld [vmem:[%s9196_s1 + $0xe0c] ss:$16 sps:$4 sm:$0xff]   ;;  %v6675_v61 = vld [vmem:[%s9196_s1 + $0xe00] ss:$16 sps:$4 sm:$0xff]  }
 0x1ab   :  { %4286 = vmatpush1.bf16.msra.mxu0 %v6639_v25  ;;  %4696 = vmatpush1.bf16.msra.mxu1 %v6642_v34  ;;  %v6678_v62 = vld [vmem:[%s9196_s1 + $0xe08] ss:$16 sps:$4 sm:$0xff]   ;;  %v6683_v63 = vld [vmem:[%s9196_s1 + $0xe24] ss:$16 sps:$4 sm:$0xff]   ;;  %v6686_v47 = vld [vmem:[%s9196_s1 + $0xe2c] ss:$16 sps:$4 sm:$0xff]  }
 0x1ac   :  { %4287 = vmatprep.subr.bf16.mxu0 %v6647_v35  ;;  %4697 = vmatprep.subr.bf16.mxu1 %v6650_v36  ;;  %v6681_v1 = vld [vmem:[%s9196_s1 + $0xe20] ss:$16 sps:$4 sm:$0xff]   ;;  %v6684_v2 = vld [vmem:[%s9196_s1 + $0xe28] ss:$16 sps:$4 sm:$0xff]   ;;  %v6689_v3 = vld [vmem:[%s9196_s1 + $0xe44] ss:$16 sps:$4 sm:$0xff]  }
 0x1ad   :  { %v6692_v4 = vld [vmem:[%s9196_s1 + $0xe4c] ss:$16 sps:$4 sm:$0xff]   ;;  %v6687_v5 = vld [vmem:[%s9196_s1 + $0xe40] ss:$16 sps:$4 sm:$0xff]   ;;  %v6690_v6 = vld [vmem:[%s9196_s1 + $0xe48] ss:$16 sps:$4 sm:$0xff]  }
 0x1ae   :  { %v6695_v7 = vld [vmem:[%s9196_s1 + $0xe64] ss:$16 sps:$4 sm:$0xff]   ;;  %v6698_v8 = vld [vmem:[%s9196_s1 + $0xe6c] ss:$16 sps:$4 sm:$0xff]   ;;  %v6693_v10 = vld [vmem:[%s9196_s1 + $0xe60] ss:$16 sps:$4 sm:$0xff]  }
 0x1af   :  { %4288 = vmatpush1.bf16.msra.mxu0 %v6645_v37  ;;  %4698 = vmatpush1.bf16.msra.mxu1 %v6648_v38  ;;  %v6696_v11 = vld [vmem:[%s9196_s1 + $0xe68] ss:$16 sps:$4 sm:$0xff]   ;;  %v6701_v12 = vld [vmem:[%s9196_s1 + $0xe84] ss:$16 sps:$4 sm:$0xff]   ;;  %v6704_v13 = vld [vmem:[%s9196_s1 + $0xe8c] ss:$16 sps:$4 sm:$0xff]  }
 0x1b0   :  { %4289 = vmatprep.subr.bf16.mxu0 %v6653_v28  ;;  %4699 = vmatprep.subr.bf16.mxu1 %v6656_v40  ;;  %v6699_v14 = vld [vmem:[%s9196_s1 + $0xe80] ss:$16 sps:$4 sm:$0xff]   ;;  %v6702_v15 = vld [vmem:[%s9196_s1 + $0xe88] ss:$16 sps:$4 sm:$0xff]   ;;  %v6707_v16 = vld [vmem:[%s9196_s1 + $0xea4] ss:$16 sps:$4 sm:$0xff]  }
 0x1b1   :  { %v6710_v17 = vld [vmem:[%s9196_s1 + $0xeac] ss:$16 sps:$4 sm:$0xff]   ;;  %v6705_v18 = vld [vmem:[%s9196_s1 + $0xea0] ss:$16 sps:$4 sm:$0xff]   ;;  %v6708_v19 = vld [vmem:[%s9196_s1 + $0xea8] ss:$16 sps:$4 sm:$0xff]  }
 0x1b2   :  { %v6713_v20 = vld [vmem:[%s9196_s1 + $0xec4] ss:$16 sps:$4 sm:$0xff]   ;;  %v6716_v21 = vld [vmem:[%s9196_s1 + $0xecc] ss:$16 sps:$4 sm:$0xff]   ;;  %v6711_v22 = vld [vmem:[%s9196_s1 + $0xec0] ss:$16 sps:$4 sm:$0xff]  }
 0x1b3   :  { %4290 = vmatpush1.bf16.msra.mxu0 %v6651_v41  ;;  %4700 = vmatpush1.bf16.msra.mxu1 %v6654_v24  ;;  %v6714_v23 = vld [vmem:[%s9196_s1 + $0xec8] ss:$16 sps:$4 sm:$0xff]   ;;  %v6719_v9 = vld [vmem:[%s9196_s1 + $0xee4] ss:$16 sps:$4 sm:$0xff]   ;;  %v6722_v26 = vld [vmem:[%s9196_s1 + $0xeec] ss:$16 sps:$4 sm:$0xff]  }
 0x1b4   :  { %4291 = vmatprep.subr.bf16.mxu0 %v6659_v44  ;;  %4701 = vmatprep.subr.bf16.mxu1 %v6662_v45  ;;  %v6717_v27 = vld [vmem:[%s9196_s1 + $0xee0] ss:$16 sps:$4 sm:$0xff]   ;;  %v6720_v29 = vld [vmem:[%s9196_s1 + $0xee8] ss:$16 sps:$4 sm:$0xff]   ;;  %v6725_v30 = vld [vmem:[%s9196_s1 + $0xf04] ss:$16 sps:$4 sm:$0xff]  }
 0x1b5   :  { %v6728_v31 = vld [vmem:[%s9196_s1 + $0xf0c] ss:$16 sps:$4 sm:$0xff]   ;;  %v6723_v33 = vld [vmem:[%s9196_s1 + $0xf00] ss:$16 sps:$4 sm:$0xff]   ;;  %v6726_v25 = vld [vmem:[%s9196_s1 + $0xf08] ss:$16 sps:$4 sm:$0xff]  }
 0x1b6   :  { %v6731_v34 = vld [vmem:[%s9196_s1 + $0xf24] ss:$16 sps:$4 sm:$0xff]   ;;  %v6734_v35 = vld [vmem:[%s9196_s1 + $0xf2c] ss:$16 sps:$4 sm:$0xff]   ;;  %v6729_v36 = vld [vmem:[%s9196_s1 + $0xf20] ss:$16 sps:$4 sm:$0xff]  }
 0x1b7   :  { %4292 = vmatpush1.bf16.msra.mxu0 %v6657_v46  ;;  %4702 = vmatpush1.bf16.msra.mxu1 %v6660_v48  ;;  %v6732_v37 = vld [vmem:[%s9196_s1 + $0xf28] ss:$16 sps:$4 sm:$0xff]   ;;  %v6737_v38 = vld [vmem:[%s9196_s1 + $0xf44] ss:$16 sps:$4 sm:$0xff]   ;;  %v6740_v28 = vld [vmem:[%s9196_s1 + $0xf4c] ss:$16 sps:$4 sm:$0xff]  }
 0x1b8   :  { %4293 = vmatprep.subr.bf16.mxu0 %v6665_v32  ;;  %4703 = vmatprep.subr.bf16.mxu1 %v6668_v50  ;;  %v6735_v40 = vld [vmem:[%s9196_s1 + $0xf40] ss:$16 sps:$4 sm:$0xff]   ;;  %v6738_v41 = vld [vmem:[%s9196_s1 + $0xf48] ss:$16 sps:$4 sm:$0xff]   ;;  %v6743_v24 = vld [vmem:[%s9196_s1 + $0xf64] ss:$16 sps:$4 sm:$0xff]  }
 0x1b9   :  { %v6746_v44 = vld [vmem:[%s9196_s1 + $0xf6c] ss:$16 sps:$4 sm:$0xff]   ;;  %v6741_v45 = vld [vmem:[%s9196_s1 + $0xf60] ss:$16 sps:$4 sm:$0xff]   ;;  %v6744_v46 = vld [vmem:[%s9196_s1 + $0xf68] ss:$16 sps:$4 sm:$0xff]  }
 0x1ba   :  { %v6749_v48 = vld [vmem:[%s9196_s1 + $0xf84] ss:$16 sps:$4 sm:$0xff]   ;;  %v6752_v32 = vld [vmem:[%s9196_s1 + $0xf8c] ss:$16 sps:$4 sm:$0xff]   ;;  %v6747_v50 = vld [vmem:[%s9196_s1 + $0xf80] ss:$16 sps:$4 sm:$0xff]  }
 0x1bb   :  { %4294 = vmatpush1.bf16.msra.mxu0 %v6663_v52  ;;  %4704 = vmatpush1.bf16.msra.mxu1 %v6666_v53  ;;  %v6750_v51 = vld [vmem:[%s9196_s1 + $0xf88] ss:$16 sps:$4 sm:$0xff]   ;;  %v6755_v52 = vld [vmem:[%s9196_s1 + $0xfa4] ss:$16 sps:$4 sm:$0xff]   ;;  %v6758_v53 = vld [vmem:[%s9196_s1 + $0xfac] ss:$16 sps:$4 sm:$0xff]  }
 0x1bc   :  { %4295 = vmatprep.subr.bf16.mxu0 %v6671_v54  ;;  %4705 = vmatprep.subr.bf16.mxu1 %v6674_v42  ;;  %v6753_v54 = vld [vmem:[%s9196_s1 + $0xfa0] ss:$16 sps:$4 sm:$0xff]   ;;  %v6756_v42 = vld [vmem:[%s9196_s1 + $0xfa8] ss:$16 sps:$4 sm:$0xff]   ;;  %s7022_s8 = smov [#allocation2]  }
 0x1bd   :  { %v6762_v59 = vld [vmem:[%s9196_s1 + $0xfc8] ss:$16 sps:$4 sm:$0xff]   ;;  %s5197_s9 = sshll.u32 %s7022_s8, 4  ;;  %s5198_s9 = int_to_ptr.vmem [resolvable:$true] %s5197_s9 }
 0x1be   :  { %s6997_s10 = scalar_lea.vmem %s5198_s9, 32  ;;  %p7002_p1 = scmp.lt.s32.totalorder %s5198_s9, %s5198_s9 }
 0x1bf   :  { %4296 = vmatpush1.bf16.msra.mxu0 %v6669_v56  ;;  %4706 = vmatpush1.bf16.msra.mxu1 %v6672_v39  ;;  %v6761_v56 = vld [vmem:[%s9196_s1 + $0xfc4] ss:$16 sps:$4 sm:$0xff]   ;;  %v6764_v39 = vld [vmem:[%s9196_s1 + $0xfcc] ss:$16 sps:$4 sm:$0xff]   ;;  %p6998_p0 = scmp.ne.s32.totalorder %s5198_s9, %s6997_s10  ;;  %p7003_p2 = scmp.lt.s32.totalorder %s6997_s10, %s6997_s10 }
 0x1c0   :  { %4306 = vmatprep.subr.bf16.mxu0 %v6677_v57  ;;  %4716 = vmatprep.subr.bf16.mxu1 %v6680_v58  ;;  %v8654_v57 = vld [vmem:[%s9195_s0 + $0x20] sm:$0xff] }
 0x1c1   :  { %v6759_v58 = vld [vmem:[%s9196_s1 + $0xfc0] ss:$16 sps:$4 sm:$0xff]   ;;  %p7004_p3 = por %p7003_p2, %p7002_p1 }
 0x1c2   :  { %4298 = vmatmul.mubr.bf16.vlgmr.msra.gmra.mrb[0].mxu0 %v149_v60  ;;  %4708 = vmatmul.mubr.bf16.vlgmr.msra.gmra.mrb[0].mxu1 %v149_v60  ;;  %v6767_v60 = vld [vmem:[%s9196_s1 + $0xfe4] ss:$16 sps:$4 sm:$0xff]  }
 0x1c3   :  { %4307 = vmatpush1.bf16.msra.mxu0 %v6675_v61  ;;  %4717 = vmatpush1.bf16.msra.mxu1 %v6678_v62  ;;  %v6770_v61 = vld [vmem:[%s9196_s1 + $0xfec] ss:$16 sps:$4 sm:$0xff]   ;;  %v8670_v62 = vrot.slane %v8654_v57, %v7188_v49  ;;  %p7005_p4 = pnand %p7004_p3, %p6998_p0 }
 0x1c4   :  { %4308 = vmatprep.subr.bf16.mxu0 %v6683_v63  ;;  %4718 = vmatprep.subr.bf16.mxu1 %v6686_v47  ;;  %v6765_v63 = vld [vmem:[%s9196_s1 + $0xfe0] ss:$16 sps:$4 sm:$0xff]   ;;  %v6768_v47 = vld [vmem:[%s9196_s1 + $0xfe8] ss:$16 sps:$4 sm:$0xff]  }
 0x1c5   :  { %4338 = vmatprep.mubr.bf16.mxu0 %v152_v0  ;;  %4748 = vmatprep.mubr.bf16.mxu1 %v152_v0  ;;  %v6774_v0 = vld [vmem:[%s9196_s1 + $0x1004] ss:$16 sps:$4 sm:$0xff]  }
 0x1c7   :  { %4309 = vmatpush1.bf16.msra.mxu0 %v6681_v1  ;;  %4719 = vmatpush1.bf16.msra.mxu1 %v6684_v2  ;;  %v6777_v1 = vld [vmem:[%s9196_s1 + $0x100c] ss:$16 sps:$4 sm:$0xff]   ;;  %v115_v2 = vcombine.high %v8670_v62, %v8670_v62 }
 0x1c8   :  { %4310 = vmatprep.subr.bf16.mxu0 %v6689_v3  ;;  %4720 = vmatprep.subr.bf16.mxu1 %v6692_v4  ;;  %v151_v3 = vpack.c.bf16 %v8465_v55, %v8465_v55  ;;  %v6772_v4 = vld [vmem:[%s9196_s1 + $0x1000] ss:$16 sps:$4 sm:$0xff]   ;;  %v6783_v55 = vld [vmem:[%s9196_s1 + $0x102c] ss:$16 sps:$4 sm:$0xff]  }
 0x1cb   :  { %4311 = vmatpush1.bf16.msra.mxu0 %v6687_v5  ;;  %4721 = vmatpush1.bf16.msra.mxu1 %v6690_v6  ;;  %v6775_v5 = vld [vmem:[%s9196_s1 + $0x1008] ss:$16 sps:$4 sm:$0xff]   ;;  %v6780_v6 = vld [vmem:[%s9196_s1 + $0x1024] ss:$16 sps:$4 sm:$0xff]  }
 0x1cc   :  { %4312 = vmatprep.subr.bf16.mxu0 %v6695_v7  ;;  %4722 = vmatprep.subr.bf16.mxu1 %v6698_v8  ;;  %v154_v7 = vpack.c.bf16 %v115_v2, %v115_v2  ;;  %v6778_v8 = vld [vmem:[%s9196_s1 + $0x1020] ss:$16 sps:$4 sm:$0xff]  }
 0x1cd   :  { %v6856_v2 = vld [vmem:[%s9196_s1 + $0x11c0] ss:$16 sps:$4 sm:$0xff]  }
 0x1cf   :  { %4313 = vmatpush1.bf16.msra.mxu0 %v6693_v10  ;;  %4723 = vmatpush1.bf16.msra.mxu1 %v6696_v11  ;;  %v6781_v10 = vld [vmem:[%s9196_s1 + $0x1028] ss:$16 sps:$4 sm:$0xff]   ;;  %v6786_v11 = vld [vmem:[%s9196_s1 + $0x1044] ss:$16 sps:$4 sm:$0xff]  }
 0x1d0   :  { %4314 = vmatprep.subr.bf16.mxu0 %v6701_v12  ;;  %4724 = vmatprep.subr.bf16.mxu1 %v6704_v13  ;;  %v6789_v12 = vld [vmem:[%s9196_s1 + $0x104c] ss:$16 sps:$4 sm:$0xff]   ;;  %v6784_v13 = vld [vmem:[%s9196_s1 + $0x1040] ss:$16 sps:$4 sm:$0xff]  }
 0x1d3   :  { %4315 = vmatpush1.bf16.msra.mxu0 %v6699_v14  ;;  %4725 = vmatpush1.bf16.msra.mxu1 %v6702_v15  ;;  %v6787_v14 = vld [vmem:[%s9196_s1 + $0x1048] ss:$16 sps:$4 sm:$0xff]   ;;  %v6792_v15 = vld [vmem:[%s9196_s1 + $0x1064] ss:$16 sps:$4 sm:$0xff]  }
 0x1d4   :  { %4316 = vmatprep.subr.bf16.mxu0 %v6707_v16  ;;  %4726 = vmatprep.subr.bf16.mxu1 %v6710_v17  ;;  %v6795_v16 = vld [vmem:[%s9196_s1 + $0x106c] ss:$16 sps:$4 sm:$0xff]   ;;  %v6790_v17 = vld [vmem:[%s9196_s1 + $0x1060] ss:$16 sps:$4 sm:$0xff]  }
 0x1d7   :  { %4317 = vmatpush1.bf16.msra.mxu0 %v6705_v18  ;;  %4727 = vmatpush1.bf16.msra.mxu1 %v6708_v19  ;;  %v6793_v18 = vld [vmem:[%s9196_s1 + $0x1068] ss:$16 sps:$4 sm:$0xff]   ;;  %v6798_v19 = vld [vmem:[%s9196_s1 + $0x1084] ss:$16 sps:$4 sm:$0xff]  }
 0x1d8   :  { %4318 = vmatprep.subr.bf16.mxu0 %v6713_v20  ;;  %4728 = vmatprep.subr.bf16.mxu1 %v6716_v21  ;;  %v6801_v20 = vld [vmem:[%s9196_s1 + $0x108c] ss:$16 sps:$4 sm:$0xff]   ;;  %v6796_v21 = vld [vmem:[%s9196_s1 + $0x1080] ss:$16 sps:$4 sm:$0xff]  }
 0x1db   :  { %4319 = vmatpush1.bf16.msra.mxu0 %v6711_v22  ;;  %4729 = vmatpush1.bf16.msra.mxu1 %v6714_v23  ;;  %v6799_v22 = vld [vmem:[%s9196_s1 + $0x1088] ss:$16 sps:$4 sm:$0xff]   ;;  %v6804_v23 = vld [vmem:[%s9196_s1 + $0x10a4] ss:$16 sps:$4 sm:$0xff]  }
 0x1dc   :  { %4320 = vmatprep.subr.bf16.mxu0 %v6719_v9  ;;  %4730 = vmatprep.subr.bf16.mxu1 %v6722_v26  ;;  %v6807_v9 = vld [vmem:[%s9196_s1 + $0x10ac] ss:$16 sps:$4 sm:$0xff]   ;;  %v6802_v26 = vld [vmem:[%s9196_s1 + $0x10a0] ss:$16 sps:$4 sm:$0xff]  }
 0x1df   :  { %4321 = vmatpush1.bf16.msra.mxu0 %v6717_v27  ;;  %4731 = vmatpush1.bf16.msra.mxu1 %v6720_v29  ;;  %v6805_v27 = vld [vmem:[%s9196_s1 + $0x10a8] ss:$16 sps:$4 sm:$0xff]   ;;  %v6810_v29 = vld [vmem:[%s9196_s1 + $0x10c4] ss:$16 sps:$4 sm:$0xff]  }
 0x1e0   :  { %4322 = vmatprep.subr.bf16.mxu0 %v6725_v30  ;;  %4732 = vmatprep.subr.bf16.mxu1 %v6728_v31  ;;  %v6813_v30 = vld [vmem:[%s9196_s1 + $0x10cc] ss:$16 sps:$4 sm:$0xff]   ;;  %v6808_v31 = vld [vmem:[%s9196_s1 + $0x10c0] ss:$16 sps:$4 sm:$0xff]  }
 0x1e3   :  { %4323 = vmatpush1.bf16.msra.mxu0 %v6723_v33  ;;  %4733 = vmatpush1.bf16.msra.mxu1 %v6726_v25  ;;  %v6811_v33 = vld [vmem:[%s9196_s1 + $0x10c8] ss:$16 sps:$4 sm:$0xff]   ;;  %v6816_v25 = vld [vmem:[%s9196_s1 + $0x10e4] ss:$16 sps:$4 sm:$0xff]  }
 0x1e4   :  { %4324 = vmatprep.subr.bf16.mxu0 %v6731_v34  ;;  %4734 = vmatprep.subr.bf16.mxu1 %v6734_v35  ;;  %v6819_v34 = vld [vmem:[%s9196_s1 + $0x10ec] ss:$16 sps:$4 sm:$0xff]   ;;  %v6814_v35 = vld [vmem:[%s9196_s1 + $0x10e0] ss:$16 sps:$4 sm:$0xff]  }
 0x1e7   :  { %4325 = vmatpush1.bf16.msra.mxu0 %v6729_v36  ;;  %4735 = vmatpush1.bf16.msra.mxu1 %v6732_v37  ;;  %v6817_v36 = vld [vmem:[%s9196_s1 + $0x10e8] ss:$16 sps:$4 sm:$0xff]   ;;  %v6822_v37 = vld [vmem:[%s9196_s1 + $0x1104] ss:$16 sps:$4 sm:$0xff]  }
 0x1e8   :  { %4326 = vmatprep.subr.bf16.mxu0 %v6737_v38  ;;  %4736 = vmatprep.subr.bf16.mxu1 %v6740_v28  ;;  %v6825_v38 = vld [vmem:[%s9196_s1 + $0x110c] ss:$16 sps:$4 sm:$0xff]   ;;  %v6820_v28 = vld [vmem:[%s9196_s1 + $0x1100] ss:$16 sps:$4 sm:$0xff]  }
 0x1eb   :  { %4327 = vmatpush1.bf16.msra.mxu0 %v6735_v40  ;;  %4737 = vmatpush1.bf16.msra.mxu1 %v6738_v41  ;;  %v6823_v40 = vld [vmem:[%s9196_s1 + $0x1108] ss:$16 sps:$4 sm:$0xff]   ;;  %v6828_v41 = vld [vmem:[%s9196_s1 + $0x1124] ss:$16 sps:$4 sm:$0xff]  }
 0x1ec   :  { %4328 = vmatprep.subr.bf16.mxu0 %v6743_v24  ;;  %4738 = vmatprep.subr.bf16.mxu1 %v6746_v44  ;;  %v6831_v24 = vld [vmem:[%s9196_s1 + $0x112c] ss:$16 sps:$4 sm:$0xff]   ;;  %v6826_v44 = vld [vmem:[%s9196_s1 + $0x1120] ss:$16 sps:$4 sm:$0xff]  }
 0x1ef   :  { %4329 = vmatpush1.bf16.msra.mxu0 %v6741_v45  ;;  %4739 = vmatpush1.bf16.msra.mxu1 %v6744_v46  ;;  %v6829_v45 = vld [vmem:[%s9196_s1 + $0x1128] ss:$16 sps:$4 sm:$0xff]   ;;  %v6834_v46 = vld [vmem:[%s9196_s1 + $0x1144] ss:$16 sps:$4 sm:$0xff]  }
 0x1f0   :  { %4330 = vmatprep.subr.bf16.mxu0 %v6749_v48  ;;  %4740 = vmatprep.subr.bf16.mxu1 %v6752_v32  ;;  %v6837_v48 = vld [vmem:[%s9196_s1 + $0x114c] ss:$16 sps:$4 sm:$0xff]   ;;  %v6832_v32 = vld [vmem:[%s9196_s1 + $0x1140] ss:$16 sps:$4 sm:$0xff]  }
 0x1f3   :  { %4331 = vmatpush1.bf16.msra.mxu0 %v6747_v50  ;;  %4741 = vmatpush1.bf16.msra.mxu1 %v6750_v51  ;;  %v6835_v50 = vld [vmem:[%s9196_s1 + $0x1148] ss:$16 sps:$4 sm:$0xff]   ;;  %v6840_v51 = vld [vmem:[%s9196_s1 + $0x1164] ss:$16 sps:$4 sm:$0xff]  }
 0x1f4   :  { %4332 = vmatprep.subr.bf16.mxu0 %v6755_v52  ;;  %4742 = vmatprep.subr.bf16.mxu1 %v6758_v53  ;;  %v6843_v52 = vld [vmem:[%s9196_s1 + $0x116c] ss:$16 sps:$4 sm:$0xff]   ;;  %v6838_v53 = vld [vmem:[%s9196_s1 + $0x1160] ss:$16 sps:$4 sm:$0xff]  }
 0x1f7   :  { %4333 = vmatpush1.bf16.msra.mxu0 %v6753_v54  ;;  %4743 = vmatpush1.bf16.msra.mxu1 %v6756_v42  ;;  %v6841_v54 = vld [vmem:[%s9196_s1 + $0x1168] ss:$16 sps:$4 sm:$0xff]   ;;  %v6846_v42 = vld [vmem:[%s9196_s1 + $0x1184] ss:$16 sps:$4 sm:$0xff]  }
 0x1f8   :  { %4334 = vmatprep.subr.bf16.mxu0 %v6761_v56  ;;  %4744 = vmatprep.subr.bf16.mxu1 %v6764_v39  ;;  %v6849_v56 = vld [vmem:[%s9196_s1 + $0x118c] ss:$16 sps:$4 sm:$0xff]   ;;  %v6844_v39 = vld [vmem:[%s9196_s1 + $0x1180] ss:$16 sps:$4 sm:$0xff]  }
 0x1fb   :  { %4335 = vmatpush1.bf16.msra.mxu0 %v6759_v58  ;;  %4745 = vmatpush1.bf16.msra.mxu1 %v6762_v59  ;;  %v6847_v58 = vld [vmem:[%s9196_s1 + $0x1188] ss:$16 sps:$4 sm:$0xff]   ;;  %v6852_v59 = vld [vmem:[%s9196_s1 + $0x11a4] ss:$16 sps:$4 sm:$0xff]  }
 0x1fc   :  { %4336 = vmatprep.subr.bf16.mxu0 %v6767_v60  ;;  %4746 = vmatprep.subr.bf16.mxu1 %v6770_v61  ;;  %v6855_v60 = vld [vmem:[%s9196_s1 + $0x11ac] ss:$16 sps:$4 sm:$0xff]   ;;  %v6850_v61 = vld [vmem:[%s9196_s1 + $0x11a0] ss:$16 sps:$4 sm:$0xff]  }
 0x1ff   :  { %4337 = vmatpush1.bf16.msra.mxu0 %v6765_v63  ;;  %4747 = vmatpush1.bf16.msra.mxu1 %v6768_v47  ;;  %v6853_v63 = vld [vmem:[%s9196_s1 + $0x11a8] ss:$16 sps:$4 sm:$0xff]   ;;  %v6858_v47 = vld [vmem:[%s9196_s1 + $0x11c4] ss:$16 sps:$4 sm:$0xff]  }
 0x200   :  { %4347 = vmatprep.subr.bf16.mxu0 %v6774_v0  ;;  %4757 = vmatprep.subr.bf16.mxu1 %v6777_v1  ;;  %v6861_v0 = vld [vmem:[%s9196_s1 + $0x11cc] ss:$16 sps:$4 sm:$0xff]   ;;  %v100_v1 = vcombine.high %v8654_v57, %v8654_v57 }
 0x201   :  { %v6867_v57 = vld [vmem:[%s9196_s1 + $0x11ec] ss:$16 sps:$4 sm:$0xff]  }
 0x202   :  { %4339 = vmatmul.mubr.bf16.vlgmr.msra.gmra.mrb[0].mxu0 %v151_v3  ;;  %4749 = vmatmul.mubr.bf16.vlgmr.msra.gmra.mrb[0].mxu1 %v151_v3  ;;  %v6859_v3 = vld [vmem:[%s9196_s1 + $0x11c8] ss:$16 sps:$4 sm:$0xff]  }
 0x203   :  { %4348 = vmatpush1.bf16.msra.mxu0 %v6772_v4  ;;  %4758 = vmatpush1.bf16.msra.mxu1 %v6775_v5  ;;  %v6864_v4 = vld [vmem:[%s9196_s1 + $0x11e4] ss:$16 sps:$4 sm:$0xff]   ;;  %v8871_v5 = vrot.slane %v100_v1, %v7188_v49  ;;  %v6873_v49 = vld [vmem:[%s9196_s1 + $0x120c] ss:$16 sps:$4 sm:$0xff]  }
 0x204   :  { %4349 = vmatprep.subr.bf16.mxu0 %v6780_v6  ;;  %4759 = vmatprep.subr.bf16.mxu1 %v6783_v55  ;;  %v6862_v6 = vld [vmem:[%s9196_s1 + $0x11e0] ss:$16 sps:$4 sm:$0xff]   ;;  %v6865_v55 = vld [vmem:[%s9196_s1 + $0x11e8] ss:$16 sps:$4 sm:$0xff]   ;;  %v6948_v1 = vld [vmem:[%s9196_s1 + $0x13a4] ss:$16 sps:$4 sm:$0xff]  }
 0x205   :  { %4379 = vmatprep.mubr.bf16.mxu0 %v154_v7  ;;  %4789 = vmatprep.mubr.bf16.mxu1 %v154_v7  ;;  %v6870_v7 = vld [vmem:[%s9196_s1 + $0x1204] ss:$16 sps:$4 sm:$0xff]  }
 0x207   :  { %4350 = vmatpush1.bf16.msra.mxu0 %v6778_v8  ;;  %4760 = vmatpush1.bf16.msra.mxu1 %v6781_v10  ;;  %v116_v8 = vcombine.high %v8871_v5, %v8871_v5  ;;  %v153_v10 = vpack.c.bf16 %v8670_v62, %v8670_v62  ;;  %v6879_v62 = vld [vmem:[%s9196_s1 + $0x122c] ss:$16 sps:$4 sm:$0xff]  }
 0x208   :  { %4351 = vmatprep.subr.bf16.mxu0 %v6786_v11  ;;  %4761 = vmatprep.subr.bf16.mxu1 %v6789_v12  ;;  %v6868_v11 = vld [vmem:[%s9196_s1 + $0x1200] ss:$16 sps:$4 sm:$0xff]   ;;  %v6871_v12 = vld [vmem:[%s9196_s1 + $0x1208] ss:$16 sps:$4 sm:$0xff]  }
 0x20b   :  { %4352 = vmatpush1.bf16.msra.mxu0 %v6784_v13  ;;  %4762 = vmatpush1.bf16.msra.mxu1 %v6787_v14  ;;  %v6876_v13 = vld [vmem:[%s9196_s1 + $0x1224] ss:$16 sps:$4 sm:$0xff]   ;;  %v156_v14 = vpack.c.bf16 %v116_v8, %v116_v8  ;;  %v6963_v8 = vld [vmem:[%s9196_s1 + $0x13ec] ss:$16 sps:$4 sm:$0xff]  }
 0x20c   :  { %4353 = vmatprep.subr.bf16.mxu0 %v6792_v15  ;;  %4763 = vmatprep.subr.bf16.mxu1 %v6795_v16  ;;  %v6874_v15 = vld [vmem:[%s9196_s1 + $0x1220] ss:$16 sps:$4 sm:$0xff]   ;;  %v6877_v16 = vld [vmem:[%s9196_s1 + $0x1228] ss:$16 sps:$4 sm:$0xff]  }
 0x20f   :  { %4354 = vmatpush1.bf16.msra.mxu0 %v6790_v17  ;;  %4764 = vmatpush1.bf16.msra.mxu1 %v6793_v18  ;;  %v6882_v17 = vld [vmem:[%s9196_s1 + $0x1244] ss:$16 sps:$4 sm:$0xff]   ;;  %v6885_v18 = vld [vmem:[%s9196_s1 + $0x124c] ss:$16 sps:$4 sm:$0xff]  }
 0x210   :  { %4355 = vmatprep.subr.bf16.mxu0 %v6798_v19  ;;  %4765 = vmatprep.subr.bf16.mxu1 %v6801_v20  ;;  %v6880_v19 = vld [vmem:[%s9196_s1 + $0x1240] ss:$16 sps:$4 sm:$0xff]   ;;  %v6883_v20 = vld [vmem:[%s9196_s1 + $0x1248] ss:$16 sps:$4 sm:$0xff]  }
 0x213   :  { %4356 = vmatpush1.bf16.msra.mxu0 %v6796_v21  ;;  %4766 = vmatpush1.bf16.msra.mxu1 %v6799_v22  ;;  %v6888_v21 = vld [vmem:[%s9196_s1 + $0x1264] ss:$16 sps:$4 sm:$0xff]   ;;  %v6891_v22 = vld [vmem:[%s9196_s1 + $0x126c] ss:$16 sps:$4 sm:$0xff]  }
 0x214   :  { %4357 = vmatprep.subr.bf16.mxu0 %v6804_v23  ;;  %4767 = vmatprep.subr.bf16.mxu1 %v6807_v9  ;;  %v6886_v23 = vld [vmem:[%s9196_s1 + $0x1260] ss:$16 sps:$4 sm:$0xff]   ;;  %v6889_v9 = vld [vmem:[%s9196_s1 + $0x1268] ss:$16 sps:$4 sm:$0xff]  }
 0x217   :  { %4358 = vmatpush1.bf16.msra.mxu0 %v6802_v26  ;;  %4768 = vmatpush1.bf16.msra.mxu1 %v6805_v27  ;;  %v6894_v26 = vld [vmem:[%s9196_s1 + $0x1284] ss:$16 sps:$4 sm:$0xff]   ;;  %v6897_v27 = vld [vmem:[%s9196_s1 + $0x128c] ss:$16 sps:$4 sm:$0xff]  }
 0x218   :  { %4359 = vmatprep.subr.bf16.mxu0 %v6810_v29  ;;  %4769 = vmatprep.subr.bf16.mxu1 %v6813_v30  ;;  %v6892_v29 = vld [vmem:[%s9196_s1 + $0x1280] ss:$16 sps:$4 sm:$0xff]   ;;  %v6895_v30 = vld [vmem:[%s9196_s1 + $0x1288] ss:$16 sps:$4 sm:$0xff]  }
 0x21b   :  { %4360 = vmatpush1.bf16.msra.mxu0 %v6808_v31  ;;  %4770 = vmatpush1.bf16.msra.mxu1 %v6811_v33  ;;  %v6900_v31 = vld [vmem:[%s9196_s1 + $0x12a4] ss:$16 sps:$4 sm:$0xff]   ;;  %v6903_v33 = vld [vmem:[%s9196_s1 + $0x12ac] ss:$16 sps:$4 sm:$0xff]  }
 0x21c   :  { %4361 = vmatprep.subr.bf16.mxu0 %v6816_v25  ;;  %4771 = vmatprep.subr.bf16.mxu1 %v6819_v34  ;;  %v6898_v25 = vld [vmem:[%s9196_s1 + $0x12a0] ss:$16 sps:$4 sm:$0xff]   ;;  %v6901_v34 = vld [vmem:[%s9196_s1 + $0x12a8] ss:$16 sps:$4 sm:$0xff]  }
 0x21f   :  { %4362 = vmatpush1.bf16.msra.mxu0 %v6814_v35  ;;  %4772 = vmatpush1.bf16.msra.mxu1 %v6817_v36  ;;  %v6906_v35 = vld [vmem:[%s9196_s1 + $0x12c4] ss:$16 sps:$4 sm:$0xff]   ;;  %v6909_v36 = vld [vmem:[%s9196_s1 + $0x12cc] ss:$16 sps:$4 sm:$0xff]  }
 0x220   :  { %4363 = vmatprep.subr.bf16.mxu0 %v6822_v37  ;;  %4773 = vmatprep.subr.bf16.mxu1 %v6825_v38  ;;  %v6904_v37 = vld [vmem:[%s9196_s1 + $0x12c0] ss:$16 sps:$4 sm:$0xff]   ;;  %v6907_v38 = vld [vmem:[%s9196_s1 + $0x12c8] ss:$16 sps:$4 sm:$0xff]  }
 0x223   :  { %4364 = vmatpush1.bf16.msra.mxu0 %v6820_v28  ;;  %4774 = vmatpush1.bf16.msra.mxu1 %v6823_v40  ;;  %v6912_v28 = vld [vmem:[%s9196_s1 + $0x12e4] ss:$16 sps:$4 sm:$0xff]   ;;  %v6915_v40 = vld [vmem:[%s9196_s1 + $0x12ec] ss:$16 sps:$4 sm:$0xff]  }
 0x224   :  { %4365 = vmatprep.subr.bf16.mxu0 %v6828_v41  ;;  %4775 = vmatprep.subr.bf16.mxu1 %v6831_v24  ;;  %v6910_v41 = vld [vmem:[%s9196_s1 + $0x12e0] ss:$16 sps:$4 sm:$0xff]   ;;  %v6913_v24 = vld [vmem:[%s9196_s1 + $0x12e8] ss:$16 sps:$4 sm:$0xff]  }
 0x227   :  { %4366 = vmatpush1.bf16.msra.mxu0 %v6826_v44  ;;  %4776 = vmatpush1.bf16.msra.mxu1 %v6829_v45  ;;  %v6918_v44 = vld [vmem:[%s9196_s1 + $0x1304] ss:$16 sps:$4 sm:$0xff]   ;;  %v6921_v45 = vld [vmem:[%s9196_s1 + $0x130c] ss:$16 sps:$4 sm:$0xff]  }
 0x228   :  { %4367 = vmatprep.subr.bf16.mxu0 %v6834_v46  ;;  %4777 = vmatprep.subr.bf16.mxu1 %v6837_v48  ;;  %v6916_v46 = vld [vmem:[%s9196_s1 + $0x1300] ss:$16 sps:$4 sm:$0xff]   ;;  %v6919_v48 = vld [vmem:[%s9196_s1 + $0x1308] ss:$16 sps:$4 sm:$0xff]  }
 0x22b   :  { %4368 = vmatpush1.bf16.msra.mxu0 %v6832_v32  ;;  %4778 = vmatpush1.bf16.msra.mxu1 %v6835_v50  ;;  %v6924_v32 = vld [vmem:[%s9196_s1 + $0x1324] ss:$16 sps:$4 sm:$0xff]   ;;  %v6927_v50 = vld [vmem:[%s9196_s1 + $0x132c] ss:$16 sps:$4 sm:$0xff]  }
 0x22c   :  { %4369 = vmatprep.subr.bf16.mxu0 %v6840_v51  ;;  %4779 = vmatprep.subr.bf16.mxu1 %v6843_v52  ;;  %v6922_v51 = vld [vmem:[%s9196_s1 + $0x1320] ss:$16 sps:$4 sm:$0xff]   ;;  %v6925_v52 = vld [vmem:[%s9196_s1 + $0x1328] ss:$16 sps:$4 sm:$0xff]  }
 0x22f   :  { %4370 = vmatpush1.bf16.msra.mxu0 %v6838_v53  ;;  %4780 = vmatpush1.bf16.msra.mxu1 %v6841_v54  ;;  %v6930_v53 = vld [vmem:[%s9196_s1 + $0x1344] ss:$16 sps:$4 sm:$0xff]   ;;  %v6933_v54 = vld [vmem:[%s9196_s1 + $0x134c] ss:$16 sps:$4 sm:$0xff]  }
 0x230   :  { %4371 = vmatprep.subr.bf16.mxu0 %v6846_v42  ;;  %4781 = vmatprep.subr.bf16.mxu1 %v6849_v56  ;;  %v6928_v42 = vld [vmem:[%s9196_s1 + $0x1340] ss:$16 sps:$4 sm:$0xff]   ;;  %v6931_v56 = vld [vmem:[%s9196_s1 + $0x1348] ss:$16 sps:$4 sm:$0xff]  }
 0x233   :  { %4372 = vmatpush1.bf16.msra.mxu0 %v6844_v39  ;;  %4782 = vmatpush1.bf16.msra.mxu1 %v6847_v58  ;;  %v6936_v39 = vld [vmem:[%s9196_s1 + $0x1364] ss:$16 sps:$4 sm:$0xff]   ;;  %v6939_v58 = vld [vmem:[%s9196_s1 + $0x136c] ss:$16 sps:$4 sm:$0xff]  }
 0x234   :  { %4373 = vmatprep.subr.bf16.mxu0 %v6852_v59  ;;  %4783 = vmatprep.subr.bf16.mxu1 %v6855_v60  ;;  %v6934_v59 = vld [vmem:[%s9196_s1 + $0x1360] ss:$16 sps:$4 sm:$0xff]   ;;  %v6937_v60 = vld [vmem:[%s9196_s1 + $0x1368] ss:$16 sps:$4 sm:$0xff]  }
 0x237   :  { %4374 = vmatpush1.bf16.msra.mxu0 %v6850_v61  ;;  %4784 = vmatpush1.bf16.msra.mxu1 %v6853_v63  ;;  %v6942_v61 = vld [vmem:[%s9196_s1 + $0x1384] ss:$16 sps:$4 sm:$0xff]   ;;  %v6945_v63 = vld [vmem:[%s9196_s1 + $0x138c] ss:$16 sps:$4 sm:$0xff]  }
 0x238   :  { %4375 = vmatprep.subr.bf16.mxu0 %v6858_v47  ;;  %4785 = vmatprep.subr.bf16.mxu1 %v6861_v0  ;;  %v6940_v47 = vld [vmem:[%s9196_s1 + $0x1380] ss:$16 sps:$4 sm:$0xff]   ;;  %v6943_v0 = vld [vmem:[%s9196_s1 + $0x1388] ss:$16 sps:$4 sm:$0xff]  }
 0x23b   :  { %4376 = vmatpush1.bf16.msra.mxu0 %v6856_v2  ;;  %4786 = vmatpush1.bf16.msra.mxu1 %v6859_v3  ;;  %v6951_v2 = vld [vmem:[%s9196_s1 + $0x13ac] ss:$16 sps:$4 sm:$0xff]   ;;  %v6946_v3 = vld [vmem:[%s9196_s1 + $0x13a0] ss:$16 sps:$4 sm:$0xff]  }
 0x23c   :  { %4377 = vmatprep.subr.bf16.mxu0 %v6864_v4  ;;  %4787 = vmatprep.subr.bf16.mxu1 %v6867_v57  ;;  %v6949_v4 = vld [vmem:[%s9196_s1 + $0x13a8] ss:$16 sps:$4 sm:$0xff]   ;;  %v6954_v57 = vld [vmem:[%s9196_s1 + $0x13c4] ss:$16 sps:$4 sm:$0xff]  }
 0x23f   :  { %4378 = vmatpush1.bf16.msra.mxu0 %v6862_v6  ;;  %4788 = vmatpush1.bf16.msra.mxu1 %v6865_v55  ;;  %v6957_v6 = vld [vmem:[%s9196_s1 + $0x13cc] ss:$16 sps:$4 sm:$0xff]   ;;  %v6952_v55 = vld [vmem:[%s9196_s1 + $0x13c0] ss:$16 sps:$4 sm:$0xff]  }
 0x240   :  { %4388 = vmatprep.subr.bf16.mxu0 %v6870_v7  ;;  %4798 = vmatprep.subr.bf16.mxu1 %v6873_v49  ;;  %v6955_v7 = vld [vmem:[%s9196_s1 + $0x13c8] ss:$16 sps:$4 sm:$0xff]   ;;  %v6960_v49 = vld [vmem:[%s9196_s1 + $0x13e4] ss:$16 sps:$4 sm:$0xff]  }
 0x242   :  { %4380 = vmatmul.mubr.bf16.vlgmr.msra.gmra.mrb[0].mxu0 %v153_v10  ;;  %4790 = vmatmul.mubr.bf16.vlgmr.msra.gmra.mrb[0].mxu1 %v153_v10  ;;  %v6958_v10 = vld [vmem:[%s9196_s1 + $0x13e0] ss:$16 sps:$4 sm:$0xff]  }
 0x243   :  { %4389 = vmatpush1.bf16.msra.mxu0 %v6868_v11  ;;  %4799 = vmatpush1.bf16.msra.mxu1 %v6871_v12  ;;  %v6961_v11 = vld [vmem:[%s9196_s1 + $0x13e8] ss:$16 sps:$4 sm:$0xff]   ;;  %v6965_v12 = vld [vmem:[%s9198_s3 + $0x40] sm:$0xff]  }
 0x244   :  { %4390 = vmatprep.subr.bf16.mxu0 %v6876_v13  ;;  %4800 = vmatprep.subr.bf16.mxu1 %v6879_v62  ;;  %v6966_v13 = vld [vmem:[%s9198_s3 + $0xc0] sm:$0xff]   ;;  %v155_v62 = vpack.c.bf16 %v8871_v5, %v8871_v5  ;;  %v6970_v5 = vld [vmem:[%s9198_s3 + $0xc8] sm:$0xff]  }
 0x245   :  { %4420 = vmatprep.mubr.bf16.mxu0 %v156_v14  ;;  %4830 = vmatprep.mubr.bf16.mxu1 %v156_v14  ;;  %v6967_v14 = vld [vmem:[%s9198_s3] sm:$0xff]  }
 0x247   :  { %4391 = vmatpush1.bf16.msra.mxu0 %v6874_v15  ;;  %4801 = vmatpush1.bf16.msra.mxu1 %v6877_v16  ;;  %v6968_v15 = vld [vmem:[%s9198_s3 + $0x80] sm:$0xff]   ;;  %v6969_v16 = vld [vmem:[%s9198_s3 + $0x48] sm:$0xff]  }
 0x248   :  { %4392 = vmatprep.subr.bf16.mxu0 %v6882_v17  ;;  %4802 = vmatprep.subr.bf16.mxu1 %v6885_v18  ;;  %v6971_v17 = vld [vmem:[%s9198_s3 + $0x8] sm:$0xff]  }
 0x249   :  { %v6972_v18 = vld [vmem:[%s9198_s3 + $0x88] sm:$0xff]  }
 0x24b   :  { %4393 = vmatpush1.bf16.msra.mxu0 %v6880_v19  ;;  %4803 = vmatpush1.bf16.msra.mxu1 %v6883_v20  ;;  %v6973_v19 = vld [vmem:[%s9198_s3 + $0x50] sm:$0xff]  }
 0x24c   :  { %4394 = vmatprep.subr.bf16.mxu0 %v6888_v21  ;;  %4804 = vmatprep.subr.bf16.mxu1 %v6891_v22  ;;  %v6974_v20 = vld [vmem:[%s9198_s3 + $0xd0] sm:$0xff]  }
 0x24d   :  { %v6975_v21 = vld [vmem:[%s9198_s3 + $0x10] sm:$0xff]  }
 0x24e   :  { %v6976_v22 = vld [vmem:[%s9198_s3 + $0x90] sm:$0xff]  }
 0x24f   :  { %4395 = vmatpush1.bf16.msra.mxu0 %v6886_v23  ;;  %4805 = vmatpush1.bf16.msra.mxu1 %v6889_v9  ;;  %v6977_v23 = vld [vmem:[%s9198_s3 + $0x58] sm:$0xff]  }
 0x250   :  { %4396 = vmatprep.subr.bf16.mxu0 %v6894_v26  ;;  %4806 = vmatprep.subr.bf16.mxu1 %v6897_v27  ;;  %v6978_v9 = vld [vmem:[%s9198_s3 + $0xd8] sm:$0xff]  }
 0x251   :  { %v6979_v26 = vld [vmem:[%s9198_s3 + $0x18] sm:$0xff]  }
 0x252   :  { %v6980_v27 = vld [vmem:[%s9198_s3 + $0x98] sm:$0xff]  }
 0x253   :  { %4397 = vmatpush1.bf16.msra.mxu0 %v6892_v29  ;;  %4807 = vmatpush1.bf16.msra.mxu1 %v6895_v30  ;;  %v6981_v29 = vld [vmem:[%s9198_s3 + $0x60] sm:$0xff]  }
 0x254   :  { %4398 = vmatprep.subr.bf16.mxu0 %v6900_v31  ;;  %4808 = vmatprep.subr.bf16.mxu1 %v6903_v33  ;;  %v6982_v30 = vld [vmem:[%s9198_s3 + $0xe0] sm:$0xff]  }
 0x255   :  { %v6983_v31 = vld [vmem:[%s9198_s3 + $0x20] sm:$0xff]  }
 0x256   :  { %v6984_v33 = vld [vmem:[%s9198_s3 + $0xa0] sm:$0xff]  }
 0x257   :  { %4399 = vmatpush1.bf16.msra.mxu0 %v6898_v25  ;;  %4809 = vmatpush1.bf16.msra.mxu1 %v6901_v34  ;;  %v6985_v25 = vld [vmem:[%s9198_s3 + $0x68] sm:$0xff]  }
 0x258   :  { %4400 = vmatprep.subr.bf16.mxu0 %v6906_v35  ;;  %4810 = vmatprep.subr.bf16.mxu1 %v6909_v36  ;;  %v6986_v34 = vld [vmem:[%s9198_s3 + $0xe8] sm:$0xff]  }
 0x259   :  { %v6987_v35 = vld [vmem:[%s9198_s3 + $0x28] sm:$0xff]  }
 0x25a   :  { %v6988_v36 = vld [vmem:[%s9198_s3 + $0xa8] sm:$0xff]  }
 0x25b   :  { %4401 = vmatpush1.bf16.msra.mxu0 %v6904_v37  ;;  %4811 = vmatpush1.bf16.msra.mxu1 %v6907_v38  ;;  %v6989_v37 = vld [vmem:[%s9198_s3 + $0x70] sm:$0xff]  }
 0x25c   :  { %4402 = vmatprep.subr.bf16.mxu0 %v6912_v28  ;;  %4812 = vmatprep.subr.bf16.mxu1 %v6915_v40  ;;  %v6990_v38 = vld [vmem:[%s9198_s3 + $0xf0] sm:$0xff]  }
 0x25d   :  { %v6991_v28 = vld [vmem:[%s9198_s3 + $0x30] sm:$0xff]  }
 0x25e   :  { %v6992_v40 = vld [vmem:[%s9198_s3 + $0xb0] sm:$0xff]  }
 0x25f   :  { %4403 = vmatpush1.bf16.msra.mxu0 %v6910_v41  ;;  %4813 = vmatpush1.bf16.msra.mxu1 %v6913_v24  ;;  %v6993_v41 = vld [vmem:[%s9198_s3 + $0x78] sm:$0xff]  }
 0x260   :  { %4404 = vmatprep.subr.bf16.mxu0 %v6918_v44  ;;  %4814 = vmatprep.subr.bf16.mxu1 %v6921_v45  ;;  %v6994_v24 = vld [vmem:[%s9198_s3 + $0xf8] sm:$0xff]  }
 0x261   :  { %v6995_v44 = vld [vmem:[%s9198_s3 + $0x38] sm:$0xff]  }
 0x262   :  { %v6996_v45 = vld [vmem:[%s9198_s3 + $0xb8] sm:$0xff]  }
 0x263   :  { %4405 = vmatpush1.bf16.msra.mxu0 %v6916_v46  ;;  %4815 = vmatpush1.bf16.msra.mxu1 %v6919_v48  ;;  %v801_v46 = vsub.s32 0, %v7170_v43  ;;  %v809_v48 = vsub.s32 2, %v7170_v43 }
 0x264   :  { %4406 = vmatprep.subr.bf16.mxu0 %v6924_v32  ;;  %4816 = vmatprep.subr.bf16.mxu1 %v6927_v50  ;;  %v797_v32 = vld [vmem:[%s9197_s2] sm:$0xf]  ;;  %v805_v50 = vsub.s32 1, %v7170_v43 }
 0x267   :  { %4407 = vmatpush1.bf16.msra.mxu0 %v6922_v51  ;;  %4817 = vmatpush1.bf16.msra.mxu1 %v6925_v52  ;;  %v813_v51 = vsub.s32 3, %v7170_v43  ;;  %v802_v52 = vrot.slane %v797_v32, %v801_v46 }
 0x268   :  { %4408 = vmatprep.subr.bf16.mxu0 %v6930_v53  ;;  %4818 = vmatprep.subr.bf16.mxu1 %v6933_v54  ;;  %v810_v53 = vrot.slane %v797_v32, %v809_v48  ;;  %v806_v54 = vrot.slane %v797_v32, %v805_v50 }
 0x26b   :  { %4409 = vmatpush1.bf16.msra.mxu0 %v6928_v42  ;;  %4819 = vmatpush1.bf16.msra.mxu1 %v6931_v56  ;;  %v814_v42 = vrot.slane %v797_v32, %v813_v51 }
 0x26c   :  { %4410 = vmatprep.subr.bf16.mxu0 %v6936_v39  ;;  %4820 = vmatprep.subr.bf16.mxu1 %v6939_v58 }
 0x26f   :  { %4411 = vmatpush1.bf16.msra.mxu0 %v6934_v59  ;;  %4821 = vmatpush1.bf16.msra.mxu1 %v6937_v60 }
 0x270   :  { %4412 = vmatprep.subr.bf16.mxu0 %v6942_v61  ;;  %4822 = vmatprep.subr.bf16.mxu1 %v6945_v63 }
 0x273   :  { %4413 = vmatpush1.bf16.msra.mxu0 %v6940_v47  ;;  %4823 = vmatpush1.bf16.msra.mxu1 %v6943_v0 }
 0x274   :  { %4414 = vmatprep.subr.bf16.mxu0 %v6948_v1  ;;  %4824 = vmatprep.subr.bf16.mxu1 %v6951_v2 }
 0x277   :  { %4415 = vmatpush1.bf16.msra.mxu0 %v6946_v3  ;;  %4825 = vmatpush1.bf16.msra.mxu1 %v6949_v4 }
 0x278   :  { %4416 = vmatprep.subr.bf16.mxu0 %v6954_v57  ;;  %4826 = vmatprep.subr.bf16.mxu1 %v6957_v6 }
 0x27b   :  { %4417 = vmatpush1.bf16.msra.mxu0 %v6952_v55  ;;  %4827 = vmatpush1.bf16.msra.mxu1 %v6955_v7 }
 0x27c   :  { %4418 = vmatprep.subr.bf16.mxu0 %v6960_v49  ;;  %4828 = vmatprep.subr.bf16.mxu1 %v6963_v8 }
 0x27f   :  { %4419 = vmatpush1.bf16.msra.mxu0 %v6958_v10  ;;  %4829 = vmatpush1.bf16.msra.mxu1 %v6961_v11 }
 0x280   :  { %5878 = vmatprep.subr.bf16.mxu0 %v6965_v12  ;;  %5900 = vmatprep.subr.bf16.mxu1 %v6966_v13  ;;  %v5845_v12 = vld [vmem:[%s9199_s4] ss:$0 sm:$0xff] }
 0x282   :  { %4421 = vmatmul.mubr.bf16.vlgmr.msra.gmra.mrb[0].mxu0 %v155_v62  ;;  %4831 = vmatmul.mubr.bf16.vlgmr.msra.gmra.mrb[0].mxu1 %v155_v62 }
 0x283   :  { %5879 = vmatpush3.bf16.msra.mxu0 %v6967_v14  ;;  %5901 = vmatpush3.bf16.msra.mxu1 %v6968_v15 }
 0x284   :  { %5880 = vmatprep.subr.bf16.mxu0 %v6969_v16  ;;  %5902 = vmatprep.subr.bf16.mxu1 %v6970_v5 }
 0x287   :  { %5881 = vmatpush3.bf16.msra.mxu0 %v6971_v17  ;;  %5903 = vmatpush3.bf16.msra.mxu1 %v6972_v18 }
 0x288   :  { %5882 = vmatprep.subr.bf16.mxu0 %v6973_v19  ;;  %5904 = vmatprep.subr.bf16.mxu1 %v6974_v20 }
 0x28b   :  { %5883 = vmatpush3.bf16.msra.mxu0 %v6975_v21  ;;  %5905 = vmatpush3.bf16.msra.mxu1 %v6976_v22 }
 0x28c   :  { %5884 = vmatprep.subr.bf16.mxu0 %v6977_v23  ;;  %5906 = vmatprep.subr.bf16.mxu1 %v6978_v9 }
 0x28f   :  { %5885 = vmatpush3.bf16.msra.mxu0 %v6979_v26  ;;  %5907 = vmatpush3.bf16.msra.mxu1 %v6980_v27 }
 0x290   :  { %5886 = vmatprep.subr.bf16.mxu0 %v6981_v29  ;;  %5908 = vmatprep.subr.bf16.mxu1 %v6982_v30 }
 0x293   :  { %5887 = vmatpush3.bf16.msra.mxu0 %v6983_v31  ;;  %5909 = vmatpush3.bf16.msra.mxu1 %v6984_v33 }
 0x294   :  { %5888 = vmatprep.subr.bf16.mxu0 %v6985_v25  ;;  %5910 = vmatprep.subr.bf16.mxu1 %v6986_v34 }
 0x297   :  { %5889 = vmatpush3.bf16.msra.mxu0 %v6987_v35  ;;  %5911 = vmatpush3.bf16.msra.mxu1 %v6988_v36 }
 0x298   :  { %5890 = vmatprep.subr.bf16.mxu0 %v6989_v37  ;;  %5912 = vmatprep.subr.bf16.mxu1 %v6990_v38 }
 0x29b   :  { %5891 = vmatpush3.bf16.msra.mxu0 %v6991_v28  ;;  %5913 = vmatpush3.bf16.msra.mxu1 %v6992_v40 }
 0x29c   :  { %5892 = vmatprep.subr.bf16.mxu0 %v6993_v41  ;;  %5914 = vmatprep.subr.bf16.mxu1 %v6994_v24 }
 0x29f   :  { %5893 = vmatpush3.bf16.msra.mxu0 %v6995_v44  ;;  %5915 = vmatpush3.bf16.msra.mxu1 %v6996_v45 }
 0x355   :  { %v4422_v56 = vpop.f32.mrb[0].mxu0  ;;  %v4832_v39 = vpop.f32.mrb[0].mxu1 }
 0x356   :  { %v5922_v58 = vadd.f32 %v4422_v56, %v802_v52  ;;  %v5924_v59 = vadd.f32 %v4832_v39, %v810_v53  ;;  %v4424_v60 = vpop.f32.mrb[1].mxu0  ;;  %v4834_v61 = vpop.f32.mrb[1].mxu1 }
 0x357   :  { %v5923_v63 = vadd.f32 %v4424_v60, %v806_v54  ;;  %v5925_v47 = vadd.f32 %v4834_v61, %v814_v42  ;;  %v4426_v0 = vpop.f32.mrb[2].mxu0  ;;  %v4836_v1 = vpop.f32.mrb[2].mxu1 }
 0x358   :  { %v4839_v2 = vmax.f32 %v5922_v58, 0.0  ;;  %v4841_v3 = vmax.f32 %v5924_v59, 0.0  ;;  %v4427_v4 = vpop.f32.mrb[3].mxu0  ;;  %v4837_v57 = vpop.f32.mrb[3].mxu1 }
 0x359   :  { %v4840_v6 = vmax.f32 %v5923_v63, 0.0  ;;  %v4842_v43 = vmax.f32 %v5925_v47, 0.0 }
 0x35a   :  { %v4843_v49 = vpack.c.bf16 %v4839_v2, %v4839_v2  ;;  %v4845_v8 = vpack.c.bf16 %v4841_v3, %v4841_v3 }
 0x35b   :  { %v4844_v55 = vpack.c.bf16 %v4840_v6, %v4840_v6  ;;  %v4846_v7 = vpack.c.bf16 %v4842_v43, %v4842_v43 }
 0x35d   :  { %5142 = vmatprep.mubr.bf16.mxu0 %v4844_v55  ;;  %5182 = vmatprep.mubr.bf16.mxu1 %v4846_v7 }
 0x35e   :  { %5143 = vmatmul.mubr.bf16.vlgmr.msra.gmra.mrb[4].mxu0 %v4843_v49  ;;  %5183 = vmatmul.mubr.bf16.vlgmr.msra.gmra.mrb[4].mxu1 %v4845_v8 }
 0x431   :  { %v5894_v10 = vpop.f32.mrb[4].mxu0  ;;  %v5916_v11 = vpop.f32.mrb[4].mxu1 }
 0x432   :  { %v5895_v13 = vpop.f32.mrb[5].mxu0  ;;  %v5917_v62 = vpop.f32.mrb[5].mxu1 }
 0x433   :  { %v5896_v14 = vadd.f32 %v5895_v13, %v5894_v10  ;;  %v5918_v15 = vadd.f32 %v5917_v62, %v5916_v11  ;;  %v5897_v16 = vpop.f32.mrb[6].mxu0  ;;  %v5919_v5 = vpop.f32.mrb[6].mxu1 }
 0x434   :  { %v5898_v17 = vpop.f32.mrb[7].mxu0  ;;  %v5920_v18 = vpop.f32.mrb[7].mxu1 }
 0x435   :  { %v5145_v19 = vadd.f32 %v5896_v14, %v5845_v12 }
 0x437   :  { %v5185_v20 = vadd.f32 %v5918_v15, %v5145_v19 }
 0x439   :  { %5190 = vst [vmem:[#allocation2] sm:$0x3] %v5185_v20 }
 0x43a   :  { %7008 = shalt.err (!%p7005_p4)
}
 0x43b   :  { %s7009_s12 = scalar_lea.hbm %s9200_s5, 32 }
 0x43c   :  { %p7010_p5 = scmp.ne.s32.totalorder %s9200_s5, %s7009_s12  ;;  %p7013_p6 = scmp.lt.u32.totalorder %s7009_s12, %s9200_s5 }
 0x43e   :  { %p7015_p7 = pnand %p7013_p6, %p7010_p5 }
 0x440   :  { %7018 = shalt.err (!%p7015_p7)
}
 0x441   :  { %5200 = dma.vmem_to_hbm [thread:$0]  %s5198_s9, 32, %s9200_s5, [#allocation3]  }
 0x442   :  { %7019 = dma.done.wait [#allocation3], 32  }
 0x443   :  { %7020 = vsyncadd [#allocation3], 4294967264 }
 0x444   :  { %5204 = vsyncpa [#allocation3], 1 }

</bundles_post_ra>
